<compile_context>
chip_gen: v7x
topology: tpu7x:2x2x1
jax: 0.10.0
libtpu: 0.0.40
codegen_flags: <defaults>
</compile_context>

<pallas_src>
import numpy as np
import jax
import jax.numpy as jnp
from jax import lax
from jax.experimental import pallas as pl
from jax.experimental.pallas import tpu as pltpu

PAD_TOKEN = 0


# -----------------------------------------------------------------------------
# Pallas kernel: fused bidirectional LSTM recurrence over one (batch, T-chunk)
# grid cell.  Gate inputs already contain x @ W_ih + b (bf16), gate order
# [i, f, o, g].  h/c state lives in VMEM scratch and is carried across the
# T-chunk ("arbitrary") grid axis.
# -----------------------------------------------------------------------------
def _encoder_lstm_kernel(gf_ref, gb_ref, len_ref, whh_f_ref, whh_b_ref,
                         outf_ref, outb_ref, hn_ref, cn_ref,
                         hf, cf, hb, cb):
    Tc = gf_ref.shape[0]
    bb, H = hf.shape
    tc = pl.program_id(1)
    n_tc = pl.num_programs(1)

    @pl.when(tc == 0)
    def _():
        hf[...] = jnp.zeros_like(hf)
        cf[...] = jnp.zeros_like(cf)
        hb[...] = jnp.zeros_like(hb)
        cb[...] = jnp.zeros_like(cb)

    lens = len_ref[...]                       # (bb, 1) int32 — hoisted load

    def cell(gx, h, c, whh_ref):
        # gx = x @ W_ih + b (bf16, precomputed); bf16 recurrent matmul with f32
        # accumulation; elementwise math stays f32 (v5e-safe).
        gates = gx.astype(jnp.float32) + jnp.dot(
            h.astype(jnp.bfloat16), whh_ref[...],
            preferred_element_type=jnp.float32)
        sig = jax.nn.sigmoid(gates[:, :3 * H])      # i, f, o contiguous
        i = sig[:, 0:H]
        f = sig[:, H:2 * H]
        o = sig[:, 2 * H:3 * H]
        g = jnp.tanh(gates[:, 3 * H:])
        c_new = f * c + i * g
        h_new = o * jnp.tanh(c_new)
        return h_new, c_new

    def body(j, carry):
        # ---- forward direction, global timestep t_g ----
        t_g = tc * Tc + j
        h_f, c_f = cell(gf_ref[j], hf[...], cf[...], whh_f_ref)
        mf = t_g < lens
        hf[...] = jnp.where(mf, h_f, hf[...])
        cf[...] = jnp.where(mf, c_f, cf[...])
        outf_ref[j] = jnp.where(mf, h_f, 0.0)
        # ---- backward direction, global timestep s_g (independent chain) ----
        jl = Tc - 1 - j
        s_g = (n_tc - 1 - tc) * Tc + jl
        h_b, c_b = cell(gb_ref[jl], hb[...], cb[...], whh_b_ref)
        mb = s_g < lens
        hb[...] = jnp.where(mb, h_b, hb[...])
        cb[...] = jnp.where(mb, c_b, cb[...])
        outb_ref[jl] = jnp.where(mb, h_b, 0.0)
        return carry

    # Full unroll only when the per-step working set is small; otherwise
    # unroll=2 (fwd/bwd interleave already hides MXU/EUP latency).
    unroll = True if (Tc <= 8 and bb <= 32) else 2
    lax.fori_loop(0, Tc, body, 0, unroll=unroll)

    @pl.when(tc == n_tc - 1)
    def _():
        hn_ref[0] = hf[...]
        hn_ref[1] = hb[...]
        cn_ref[0] = cf[...]
        cn_ref[1] = cb[...]


# -----------------------------------------------------------------------------
# Wrapper helpers: gate-column permutation, block-size / VMEM heuristics.
# -----------------------------------------------------------------------------
def _prep_direction(w_ih, w_hh, b_ih, b_hh, hidden_size):
    H = hidden_size
    # PyTorch gate order [i, f, g, o] -> [i, f, o, g] (sigmoid gates contiguous)
    perm = np.concatenate([np.arange(0, H), np.arange(H, 2 * H),
                           np.arange(3 * H, 4 * H), np.arange(2 * H, 3 * H)])
    w_ih_t = w_ih.T[:, perm]                          # (E, 4H)
    w_hh_t = w_hh.T[:, perm]                          # (H, 4H)
    b = (b_ih + b_hh)[perm].reshape(1, 4 * H)         # combined bias, (1, 4H)
    return w_ih_t, w_hh_t, b


def _vmem_capacity_bytes():
    try:
        info = pltpu.get_tpu_info()
        for attr in ("vmem_capacity_bytes", "vmem_size_bytes", "vmem_bytes"):
            v = getattr(info, attr, None)
            if v:
                return int(v)
    except Exception:
        pass
    return 64 * 1024 * 1024        # conservative default (v7x per-TC)


def _choose_block_b(batch):
    # Multiple of 16 (bf16 sublane packing), capped at 128 MXU rows; prefer
    # >= 2 batch blocks so v7x megacore can shard them across its two TCs.
    b = ((batch + 15) // 16) * 16
    bb = min(128, b)
    if b // bb < 2 and b >= 32:
        bb = ((b // 2 + 15) // 16) * 16
    return max(16, bb)


def _vmem_need_bytes(bt, bb, H):
    gate_tile = bt * bb * 4 * H * 2           # bf16, per direction
    out_tile = bt * bb * H * 4                # f32, per direction
    stream = 2 * (2 * gate_tile + 2 * out_tile)   # double-buffered in/out
    fixed = (2 * H * 4 * H * 2                # W_hh x 2 dirs (bf16)
             + 4 * bb * H * 4                 # h/c scratch (both dirs)
             + 2 * 2 * 2 * bb * H * 4         # h_n/c_n output blocks (dbl-buf)
             + 2 * bb * 128 * 4)              # lengths block (lane padded)
    return stream + fixed + (2 << 20)         # margin


def _choose_block_t(T, bb, H, vmem_cap):
    bt = min(T, 16)
    while bt > 1 and _vmem_need_bytes(bt, bb, H) > int(0.45 * vmem_cap):
        bt = max(1, bt // 2)
    return bt


# -----------------------------------------------------------------------------
# Wrapper: embedding gather + token-sized input projection, padding/blocking,
# pallas_call over a (batch-block, T-chunk) grid.
# -----------------------------------------------------------------------------
def encoder_rnn_forward(input_seqs, input_lengths, params, *,
                        block_b=None, block_t=None):
    emb_w = params["embedding"].astype(jnp.float32)   # (V, E), PAD row is zero
    T, B = input_seqs.shape
    H = params["w_hh_f"].shape[1]
    E = emb_w.shape[1]

    wih_f_t, whh_f_t, b_f = _prep_direction(params["w_ih_f"], params["w_hh_f"],
                                            params["b_ih_f"], params["b_hh_f"], H)
    wih_b_t, whh_b_t, b_b = _prep_direction(params["w_ih_b"], params["w_hh_b"],
                                            params["b_ih_b"], params["b_hh_b"], H)

    # Gather embeddings, then one token-sized (T*B, E) @ (E, 8H) projection
    # with both directions' biases folded in (cost scales with tokens, not V).
    emb = jnp.take(emb_w, input_seqs, axis=0)                   # (T, B, E)
    w_all = jnp.concatenate([wih_f_t, wih_b_t], axis=1)         # (E, 8H)
    b_all = jnp.concatenate([b_f, b_b], axis=1)                 # (1, 8H)
    gates = (emb.reshape(T * B, E) @ w_all + b_all).reshape(T, B, 8 * H)
    gates_f = gates[..., :4 * H].astype(jnp.bfloat16)           # bf16 streams
    gates_b = gates[..., 4 * H:].astype(jnp.bfloat16)

    lengths = input_lengths.astype(jnp.int32).reshape(B, 1)

    vmem_cap = _vmem_capacity_bytes()
    bb = block_b if block_b is not None else _choose_block_b(B)
    bt = block_t if block_t is not None else _choose_block_t(T, bb, H, vmem_cap)

    B_pad = pl.cdiv(B, bb) * bb
    T_pad = pl.cdiv(T, bt) * bt
    if B_pad != B or T_pad != T:
        gates_f = jnp.pad(gates_f, ((0, T_pad - T), (0, B_pad - B), (0, 0)))
        gates_b = jnp.pad(gates_b, ((0, T_pad - T), (0, B_pad - B), (0, 0)))
        lengths = jnp.pad(lengths, ((0, B_pad - B), (0, 0)))

    whh_f_bf = whh_f_t.astype(jnp.bfloat16)
    whh_b_bf = whh_b_t.astype(jnp.bfloat16)

    n_tc = T_pad // bt
    grid = (B_pad // bb, n_tc)

    in_specs = [
        pl.BlockSpec((bt, bb, 4 * H), lambda i, t: (t, i, 0)),               # gates fwd
        pl.BlockSpec((bt, bb, 4 * H), lambda i, t, n=n_tc: (n - 1 - t, i, 0)),  # gates bwd (reversed)
        pl.BlockSpec((bb, 1), lambda i, t: (i, 0)),                          # lengths
        pl.BlockSpec((H, 4 * H), lambda i, t: (0, 0)),                       # W_hh fwd
        pl.BlockSpec((H, 4 * H), lambda i, t: (0, 0)),                       # W_hh bwd
    ]
    out_specs = (
        pl.BlockSpec((bt, bb, H), lambda i, t: (t, i, 0)),                   # out fwd
        pl.BlockSpec((bt, bb, H), lambda i, t, n=n_tc: (n - 1 - t, i, 0)),   # out bwd (reversed)
        pl.BlockSpec((2, bb, H), lambda i, t: (0, i, 0)),                    # h_n
        pl.BlockSpec((2, bb, H), lambda i, t: (0, i, 0)),                    # c_n
    )
    out_shape = (jax.ShapeDtypeStruct((T_pad, B_pad, H), jnp.float32),
                 jax.ShapeDtypeStruct((T_pad, B_pad, H), jnp.float32),
                 jax.ShapeDtypeStruct((2, B_pad, H), jnp.float32),
                 jax.ShapeDtypeStruct((2, B_pad, H), jnp.float32))

    cost = pl.CostEstimate(
        flops=2 * 2 * T_pad * B_pad * H * 4 * H,               # 2 dirs, h@W_hh
        transcendentals=2 * 5 * T_pad * B_pad * H,             # 3 sigmoid + 2 tanh
        bytes_accessed=(2 * T_pad * B_pad * 4 * H * 2          # bf16 gate reads
                        + 2 * T_pad * B_pad * H * 4            # f32 fwd/bwd writes
                        + 2 * H * 4 * H * 2                    # bf16 weights
                        + 4 * 2 * B_pad * H * 4                # h_n / c_n
                        + B_pad * 4),
    )

    vmem_limit = int(min(0.8 * vmem_cap,
                         max(_vmem_need_bytes(bt, bb, H), 32 * 1024 * 1024)))

    out_f, out_b, h_n, c_n = pl.pallas_call(
        _encoder_lstm_kernel,
        out_shape=out_shape,
        grid=grid,
        in_specs=in_specs,
        out_specs=out_specs,
        scratch_shapes=[
            pltpu.VMEM((bb, H), jnp.float32),        # h forward
            pltpu.VMEM((bb, H), jnp.float32),        # c forward
            pltpu.VMEM((bb, H), jnp.float32),        # h backward
            pltpu.VMEM((bb, H), jnp.float32),        # c backward
        ],
        compiler_params=pltpu.CompilerParams(
            dimension_semantics=("parallel", "arbitrary"),
            vmem_limit_bytes=vmem_limit),
        cost_estimate=cost,
    )(gates_f, gates_b, lengths, whh_f_bf, whh_b_bf)

    outputs = (out_f + out_b)[:T, :B]                # fwd + bwd, un-padded
    return outputs, (h_n[:, :B], c_n[:, :B])


# -----------------------------------------------------------------------------
# Deterministic parameter init (shapes from EncoderRNN.__init__).
# -----------------------------------------------------------------------------
def init_params(key, input_size, embed_size, hidden_size):
    ks = jax.random.split(key, 9)
    bound = 1.0 / np.sqrt(hidden_size)

    def u(kk, shape):
        return jax.random.uniform(kk, shape, jnp.float32, -bound, bound)

    emb = jax.random.normal(ks[0], (input_size, embed_size), jnp.float32)
    emb = emb.at[PAD_TOKEN].set(0.0)             # padding_idx=PAD_TOKEN

    return {
        "embedding": emb,
        "w_ih_f": u(ks[1], (4 * hidden_size, embed_size)),
        "w_hh_f": u(ks[2], (4 * hidden_size, hidden_size)),
        "b_ih_f": u(ks[3], (4 * hidden_size,)),
        "b_hh_f": u(ks[4], (4 * hidden_size,)),
        "w_ih_b": u(ks[5], (4 * hidden_size, embed_size)),
        "w_hh_b": u(ks[6], (4 * hidden_size, hidden_size)),
        "b_ih_b": u(ks[7], (4 * hidden_size,)),
        "b_hh_b": u(ks[8], (4 * hidden_size,)),
    }


# -----------------------------------------------------------------------------
# Pure-JAX f32 reference (canonical PyTorch gate order / packed-seq masking).
# -----------------------------------------------------------------------------
def ref_forward(input_seqs, lengths, params):
    emb = jnp.take(params["embedding"], input_seqs, axis=0)
    T, B, _ = emb.shape
    H = params["w_hh_f"].shape[1]

    def run_dir(w_ih, w_hh, b_ih, b_hh, reverse):
        h = jnp.zeros((B, H), jnp.float32)
        c = jnp.zeros((B, H), jnp.float32)
        outs = [None] * T
        order = range(T - 1, -1, -1) if reverse else range(T)
        for t in order:
            x = emb[t]
            g = x @ w_ih.T + h @ w_hh.T + b_ih + b_hh
            i = jax.nn.sigmoid(g[:, :H])
            f = jax.nn.sigmoid(g[:, H:2 * H])
            gg = jnp.tanh(g[:, 2 * H:3 * H])
            o = jax.nn.sigmoid(g[:, 3 * H:])
            c_new = f * c + i * gg
            h_new = o * jnp.tanh(c_new)
            m = (t < lengths)[:, None]
            h = jnp.where(m, h_new, h)
            c = jnp.where(m, c_new, c)
            outs[t] = jnp.where(m, h_new, 0.0)
        return jnp.stack(outs), h, c

    of, hf, cf = run_dir(params["w_ih_f"], params["w_hh_f"],
                         params["b_ih_f"], params["b_hh_f"], False)
    ob, hb, cb = run_dir(params["w_ih_b"], params["w_hh_b"],
                         params["b_ih_b"], params["b_hh_b"], True)
    return of + ob, (jnp.stack([hf, hb]), jnp.stack([cf, cb]))


if __name__ == "__main__":
    key = jax.random.PRNGKey(0)
    # Small but TPU-friendly shapes: H multiple of 128 (lane-dense), batch big
    # enough to exercise 2 batch blocks x 2 time chunks in the grid.
    vocab_size, embed_size, hidden_size = 64, 64, 128
    T, B = 8, 32

    params = init_params(key, vocab_size, embed_size, hidden_size)

    # lengths sorted descending, as required by pack_padded_sequence.
    input_lengths = jnp.maximum(
        T - (jnp.arange(B, dtype=jnp.int32) // 4), 1).astype(jnp.int32)
    tok_key = jax.random.fold_in(key, 123)
    input_seqs = jax.random.randint(tok_key, (T, B), 1, vocab_size,
                                    dtype=jnp.int32)
    t_idx = jnp.arange(T)[:, None]
    input_seqs = jnp.where(t_idx < input_lengths[None, :], input_seqs,
                           PAD_TOKEN)

    # block_t=4 so the demo exercises the T-chunked ("arbitrary") grid axis.
    outputs, (h_n, c_n) = encoder_rnn_forward(input_seqs, input_lengths, params,
                                              block_t=4)
    outputs = jax.block_until_ready(outputs)
    h_n = jax.block_until_ready(h_n)
    c_n = jax.block_until_ready(c_n)

    ref_out, (ref_h, ref_c) = ref_forward(input_seqs, input_lengths, params)
    # Tolerance loosened vs. the all-f32 kernel: gate streams and the recurrent
    # matmul operands are bf16 (f32 accumulation), per the performance review.
    assert np.allclose(np.asarray(outputs), np.asarray(ref_out), atol=4e-2)
    assert np.allclose(np.asarray(h_n), np.asarray(ref_h), atol=4e-2)
    assert np.allclose(np.asarray(c_n), np.asarray(ref_c), atol=4e-2)

    print("KERNEL_OK")
</pallas_src>

<mosaic_0001>
module attributes {stable_mosaic.version = 11 : i64} {
  func.func @_encoder_lstm_kernel(%arg0: i32, %arg1: i32, %arg2: memref<4x16x512xbf16, #tpu.memory_space<vmem>>, %arg3: memref<4x16x512xbf16, #tpu.memory_space<vmem>>, %arg4: memref<16x1xi32, #tpu.memory_space<vmem>>, %arg5: memref<128x512xbf16, #tpu.memory_space<vmem>>, %arg6: memref<128x512xbf16, #tpu.memory_space<vmem>>, %arg7: memref<4x16x128xf32, #tpu.memory_space<vmem>>, %arg8: memref<4x16x128xf32, #tpu.memory_space<vmem>>, %arg9: memref<2x16x128xf32, #tpu.memory_space<vmem>>, %arg10: memref<2x16x128xf32, #tpu.memory_space<vmem>>, %arg11: memref<16x128xf32, #tpu.memory_space<vmem>>, %arg12: memref<16x128xf32, #tpu.memory_space<vmem>>, %arg13: memref<16x128xf32, #tpu.memory_space<vmem>>, %arg14: memref<16x128xf32, #tpu.memory_space<vmem>>) attributes {dimension_semantics = [#tpu.dimension_semantics<parallel>, #tpu.dimension_semantics<arbitrary>], iteration_bounds = array<i64: 2, 2>, scalar_prefetch = 0 : i64, scratch_operands = 4 : i64, tpu.core_type = #tpu.core_type<tc>, window_params = [{transform_indices = @transform_0, window_bounds = array<i64: 4, 16, 512>}, {transform_indices = @transform_1, window_bounds = array<i64: 4, 16, 512>}, {transform_indices = @transform_2, window_bounds = array<i64: 16, 1>}, {pipeline_mode = #tpu.pipeline_mode<synchronous>, transform_indices = @transform_3, window_bounds = array<i64: 128, 512>}, {pipeline_mode = #tpu.pipeline_mode<synchronous>, transform_indices = @transform_4, window_bounds = array<i64: 128, 512>}, {transform_indices = @transform_5, window_bounds = array<i64: 4, 16, 128>}, {transform_indices = @transform_6, window_bounds = array<i64: 4, 16, 128>}, {transform_indices = @transform_7, window_bounds = array<i64: 2, 16, 128>}, {transform_indices = @transform_8, window_bounds = array<i64: 2, 16, 128>}]} {
    %c0_i32 = arith.constant 0 : i32
    %0 = arith.cmpi eq, %arg1, %c0_i32 : i32
    %1 = arith.extui %0 : i1 to i32
    %c0_i32_0 = arith.constant 0 : i32
    %2 = arith.cmpi ne, %1, %c0_i32_0 : i32
    scf.if %2 {
      %cst_188 = arith.constant 0.000000e+00 : f32
      %399 = vector.broadcast %cst_188 : f32 to vector<16x128xf32>
      %c0_189 = arith.constant 0 : index
      %c0_190 = arith.constant 0 : index
      %400 = vector.load %arg11[%c0_189, %c0_190] : memref<16x128xf32, #tpu.memory_space<vmem>>, vector<16x128xf32>
      tpu.vector_store %arg11[%c0_189, %c0_190], %399 {strides = array<i32>} : memref<16x128xf32, #tpu.memory_space<vmem>>, vector<16x128xf32>,
      %cst_191 = arith.constant 0.000000e+00 : f32
      %401 = vector.broadcast %cst_191 : f32 to vector<16x128xf32>
      %c0_192 = arith.constant 0 : index
      %c0_193 = arith.constant 0 : index
      %402 = vector.load %arg12[%c0_192, %c0_193] : memref<16x128xf32, #tpu.memory_space<vmem>>, vector<16x128xf32>
      tpu.vector_store %arg12[%c0_192, %c0_193], %401 {strides = array<i32>} : memref<16x128xf32, #tpu.memory_space<vmem>>, vector<16x128xf32>,
      %cst_194 = arith.constant 0.000000e+00 : f32
      %403 = vector.broadcast %cst_194 : f32 to vector<16x128xf32>
      %c0_195 = arith.constant 0 : index
      %c0_196 = arith.constant 0 : index
      %404 = vector.load %arg13[%c0_195, %c0_196] : memref<16x128xf32, #tpu.memory_space<vmem>>, vector<16x128xf32>
      tpu.vector_store %arg13[%c0_195, %c0_196], %403 {strides = array<i32>} : memref<16x128xf32, #tpu.memory_space<vmem>>, vector<16x128xf32>,
      %cst_197 = arith.constant 0.000000e+00 : f32
      %405 = vector.broadcast %cst_197 : f32 to vector<16x128xf32>
      %c0_198 = arith.constant 0 : index
      %c0_199 = arith.constant 0 : index
      %406 = vector.load %arg14[%c0_198, %c0_199] : memref<16x128xf32, #tpu.memory_space<vmem>>, vector<16x128xf32>
      tpu.vector_store %arg14[%c0_198, %c0_199], %405 {strides = array<i32>} : memref<16x128xf32, #tpu.memory_space<vmem>>, vector<16x128xf32>,
    } else {
    }
    %c0 = arith.constant 0 : index
    %c0_1 = arith.constant 0 : index
    %3 = vector.load %arg4[%c0, %c0_1] : memref<16x1xi32, #tpu.memory_space<vmem>>, vector<16x1xi32>
    %c0_i32_2 = arith.constant 0 : i32
    %c4_i32 = arith.constant 4 : i32
    %4 = arith.muli %arg1, %c4_i32 : i32
    %5 = arith.addi %4, %c0_i32_2 : i32
    %6 = arith.index_cast %c0_i32_2 : i32 to index
    %c0_3 = arith.constant 0 : index
    %c0_4 = arith.constant 0 : index
    %7 = vector.load %arg2[%6, %c0_3, %c0_4] : memref<4x16x512xbf16, #tpu.memory_space<vmem>>, vector<1x16x512xbf16>
    %8 = vector.shape_cast %7 : vector<1x16x512xbf16> to vector<16x512xbf16>
    %c0_5 = arith.constant 0 : index
    %c0_6 = arith.constant 0 : index
    %9 = vector.load %arg11[%c0_5, %c0_6] : memref<16x128xf32, #tpu.memory_space<vmem>>, vector<16x128xf32>
    %c0_7 = arith.constant 0 : index
    %c0_8 = arith.constant 0 : index
    %10 = vector.load %arg12[%c0_7, %c0_8] : memref<16x128xf32, #tpu.memory_space<vmem>>, vector<16x128xf32>
    %11 = arith.extf %8 : vector<16x512xbf16> to vector<16x512xf32>
    %12 = arith.truncf %9 : vector<16x128xf32> to vector<16x128xbf16>
    %c0_9 = arith.constant 0 : index
    %c0_10 = arith.constant 0 : index
    %13 = vector.load %arg5[%c0_9, %c0_10] : memref<128x512xbf16, #tpu.memory_space<vmem>>, vector<128x512xbf16>
    %cst = arith.constant dense<0.000000e+00> : vector<16x512xf32>
    %14 = tpu.matmul %12, %13, %cst {dimension_numbers = #tpu.dot_dimension_numbers<[1], [0], [0], [1], [0, 0, 1, 1], [], []>} : vector<16x128xbf16>, vector<128x512xbf16>, vector<16x512xf32> -> vector<16x512xf32>
    %15 = arith.addf %11, %14 : vector<16x512xf32>
    %16 = vector.extract_strided_slice %15 {offsets = [0, 0], sizes = [16, 384], strides = [1, 1]} : vector<16x512xf32> to vector<16x384xf32>
    %17 = arith.negf %16 : vector<16x384xf32>
    %18 = math.exp %17 : vector<16x384xf32>
    %cst_11 = arith.constant 1.000000e+00 : f32
    %19 = vector.broadcast %cst_11 : f32 to vector<16x384xf32>
    %20 = arith.addf %19, %18 : vector<16x384xf32>
    %21 = arith.divf %19, %20 : vector<16x384xf32>
    %22 = vector.extract_strided_slice %21 {offsets = [0, 0], sizes = [16, 128], strides = [1, 1]} : vector<16x384xf32> to vector<16x128xf32>
    %23 = vector.extract_strided_slice %21 {offsets = [0, 128], sizes = [16, 128], strides = [1, 1]} : vector<16x384xf32> to vector<16x128xf32>
    %24 = vector.extract_strided_slice %21 {offsets = [0, 256], sizes = [16, 128], strides = [1, 1]} : vector<16x384xf32> to vector<16x128xf32>
    %25 = vector.extract_strided_slice %15 {offsets = [0, 384], sizes = [16, 128], strides = [1, 1]} : vector<16x512xf32> to vector<16x128xf32>
    %26 = math.tanh %25 : vector<16x128xf32>
    %27 = arith.mulf %23, %10 : vector<16x128xf32>
    %28 = arith.mulf %22, %26 : vector<16x128xf32>
    %29 = arith.addf %27, %28 : vector<16x128xf32>
    %30 = math.tanh %29 : vector<16x128xf32>
    %31 = arith.mulf %24, %30 : vector<16x128xf32>
    %32 = vector.broadcast %5 : i32 to vector<16x1xi32>
    %33 = arith.cmpi slt, %32, %3 : vector<16x1xi32>
    %c0_12 = arith.constant 0 : index
    %c0_13 = arith.constant 0 : index
    %34 = vector.load %arg11[%c0_12, %c0_13] : memref<16x128xf32, #tpu.memory_space<vmem>>, vector<16x128xf32>
    %35 = vector.shape_cast %33 : vector<16x1xi1> to vector<16x1xi1>
    %36 = vector.broadcast %35 : vector<16x1xi1> to vector<16x128xi1>
    %37 = arith.select %36, %31, %34 : vector<16x128xi1>, vector<16x128xf32>
    %c0_14 = arith.constant 0 : index
    %c0_15 = arith.constant 0 : index
    %38 = vector.load %arg11[%c0_14, %c0_15] : memref<16x128xf32, #tpu.memory_space<vmem>>, vector<16x128xf32>
    tpu.vector_store %arg11[%c0_14, %c0_15], %37 {strides = array<i32>} : memref<16x128xf32, #tpu.memory_space<vmem>>, vector<16x128xf32>,
    %c0_16 = arith.constant 0 : index
    %c0_17 = arith.constant 0 : index
    %39 = vector.load %arg12[%c0_16, %c0_17] : memref<16x128xf32, #tpu.memory_space<vmem>>, vector<16x128xf32>
    %40 = vector.shape_cast %33 : vector<16x1xi1> to vector<16x1xi1>
    %41 = vector.broadcast %40 : vector<16x1xi1> to vector<16x128xi1>
    %42 = arith.select %41, %29, %39 : vector<16x128xi1>, vector<16x128xf32>
    %c0_18 = arith.constant 0 : index
    %c0_19 = arith.constant 0 : index
    %43 = vector.load %arg12[%c0_18, %c0_19] : memref<16x128xf32, #tpu.memory_space<vmem>>, vector<16x128xf32>
    tpu.vector_store %arg12[%c0_18, %c0_19], %42 {strides = array<i32>} : memref<16x128xf32, #tpu.memory_space<vmem>>, vector<16x128xf32>,
    %cst_20 = arith.constant 0.000000e+00 : f32
    %44 = vector.shape_cast %33 : vector<16x1xi1> to vector<16x1xi1>
    %45 = vector.broadcast %44 : vector<16x1xi1> to vector<16x128xi1>
    %46 = vector.broadcast %cst_20 : f32 to vector<16x128xf32>
    %47 = arith.select %45, %31, %46 : vector<16x128xi1>, vector<16x128xf32>
    %48 = arith.index_cast %c0_i32_2 : i32 to index
    %c0_21 = arith.constant 0 : index
    %c0_22 = arith.constant 0 : index
    %49 = vector.load %arg7[%48, %c0_21, %c0_22] : memref<4x16x128xf32, #tpu.memory_space<vmem>>, vector<1x16x128xf32>
    %50 = vector.shape_cast %49 : vector<1x16x128xf32> to vector<16x128xf32>
    %51 = vector.shape_cast %47 : vector<16x128xf32> to vector<1x16x128xf32>
    tpu.vector_store %arg7[%48, %c0_21, %c0_22], %51 {strides = array<i32>} : memref<4x16x128xf32, #tpu.memory_space<vmem>>, vector<1x16x128xf32>,
    %c3_i32 = arith.constant 3 : i32
    %52 = arith.subi %c3_i32, %c0_i32_2 : i32
    %c1_i32 = arith.constant 1 : i32
    %53 = arith.subi %c1_i32, %arg1 : i32
    %c4_i32_23 = arith.constant 4 : i32
    %54 = arith.muli %53, %c4_i32_23 : i32
    %55 = arith.addi %54, %52 : i32
    %56 = arith.index_cast %52 : i32 to index
    %c0_24 = arith.constant 0 : index
    %c0_25 = arith.constant 0 : index
    %57 = vector.load %arg3[%56, %c0_24, %c0_25] : memref<4x16x512xbf16, #tpu.memory_space<vmem>>, vector<1x16x512xbf16>
    %58 = vector.shape_cast %57 : vector<1x16x512xbf16> to vector<16x512xbf16>
    %c0_26 = arith.constant 0 : index
    %c0_27 = arith.constant 0 : index
    %59 = vector.load %arg13[%c0_26, %c0_27] : memref<16x128xf32, #tpu.memory_space<vmem>>, vector<16x128xf32>
    %c0_28 = arith.constant 0 : index
    %c0_29 = arith.constant 0 : index
    %60 = vector.load %arg14[%c0_28, %c0_29] : memref<16x128xf32, #tpu.memory_space<vmem>>, vector<16x128xf32>
    %61 = arith.extf %58 : vector<16x512xbf16> to vector<16x512xf32>
    %62 = arith.truncf %59 : vector<16x128xf32> to vector<16x128xbf16>
    %c0_30 = arith.constant 0 : index
    %c0_31 = arith.constant 0 : index
    %63 = vector.load %arg6[%c0_30, %c0_31] : memref<128x512xbf16, #tpu.memory_space<vmem>>, vector<128x512xbf16>
    %cst_32 = arith.constant dense<0.000000e+00> : vector<16x512xf32>
    %64 = tpu.matmul %62, %63, %cst_32 {dimension_numbers = #tpu.dot_dimension_numbers<[1], [0], [0], [1], [0, 0, 1, 1], [], []>} : vector<16x128xbf16>, vector<128x512xbf16>, vector<16x512xf32> -> vector<16x512xf32>
    %65 = arith.addf %61, %64 : vector<16x512xf32>
    %66 = vector.extract_strided_slice %65 {offsets = [0, 0], sizes = [16, 384], strides = [1, 1]} : vector<16x512xf32> to vector<16x384xf32>
    %67 = arith.negf %66 : vector<16x384xf32>
    %68 = math.exp %67 : vector<16x384xf32>
    %cst_33 = arith.constant 1.000000e+00 : f32
    %69 = vector.broadcast %cst_33 : f32 to vector<16x384xf32>
    %70 = arith.addf %69, %68 : vector<16x384xf32>
    %71 = arith.divf %69, %70 : vector<16x384xf32>
    %72 = vector.extract_strided_slice %71 {offsets = [0, 0], sizes = [16, 128], strides = [1, 1]} : vector<16x384xf32> to vector<16x128xf32>
    %73 = vector.extract_strided_slice %71 {offsets = [0, 128], sizes = [16, 128], strides = [1, 1]} : vector<16x384xf32> to vector<16x128xf32>
    %74 = vector.extract_strided_slice %71 {offsets = [0, 256], sizes = [16, 128], strides = [1, 1]} : vector<16x384xf32> to vector<16x128xf32>
    %75 = vector.extract_strided_slice %65 {offsets = [0, 384], sizes = [16, 128], strides = [1, 1]} : vector<16x512xf32> to vector<16x128xf32>
    %76 = math.tanh %75 : vector<16x128xf32>
    %77 = arith.mulf %73, %60 : vector<16x128xf32>
    %78 = arith.mulf %72, %76 : vector<16x128xf32>
    %79 = arith.addf %77, %78 : vector<16x128xf32>
    %80 = math.tanh %79 : vector<16x128xf32>
    %81 = arith.mulf %74, %80 : vector<16x128xf32>
    %82 = vector.broadcast %55 : i32 to vector<16x1xi32>
    %83 = arith.cmpi slt, %82, %3 : vector<16x1xi32>
    %c0_34 = arith.constant 0 : index
    %c0_35 = arith.constant 0 : index
    %84 = vector.load %arg13[%c0_34, %c0_35] : memref<16x128xf32, #tpu.memory_space<vmem>>, vector<16x128xf32>
    %85 = vector.shape_cast %83 : vector<16x1xi1> to vector<16x1xi1>
    %86 = vector.broadcast %85 : vector<16x1xi1> to vector<16x128xi1>
    %87 = arith.select %86, %81, %84 : vector<16x128xi1>, vector<16x128xf32>
    %c0_36 = arith.constant 0 : index
    %c0_37 = arith.constant 0 : index
    %88 = vector.load %arg13[%c0_36, %c0_37] : memref<16x128xf32, #tpu.memory_space<vmem>>, vector<16x128xf32>
    tpu.vector_store %arg13[%c0_36, %c0_37], %87 {strides = array<i32>} : memref<16x128xf32, #tpu.memory_space<vmem>>, vector<16x128xf32>,
    %c0_38 = arith.constant 0 : index
    %c0_39 = arith.constant 0 : index
    %89 = vector.load %arg14[%c0_38, %c0_39] : memref<16x128xf32, #tpu.memory_space<vmem>>, vector<16x128xf32>
    %90 = vector.shape_cast %83 : vector<16x1xi1> to vector<16x1xi1>
    %91 = vector.broadcast %90 : vector<16x1xi1> to vector<16x128xi1>
    %92 = arith.select %91, %79, %89 : vector<16x128xi1>, vector<16x128xf32>
    %c0_40 = arith.constant 0 : index
    %c0_41 = arith.constant 0 : index
    %93 = vector.load %arg14[%c0_40, %c0_41] : memref<16x128xf32, #tpu.memory_space<vmem>>, vector<16x128xf32>
    tpu.vector_store %arg14[%c0_40, %c0_41], %92 {strides = array<i32>} : memref<16x128xf32, #tpu.memory_space<vmem>>, vector<16x128xf32>,
    %cst_42 = arith.constant 0.000000e+00 : f32
    %94 = vector.shape_cast %83 : vector<16x1xi1> to vector<16x1xi1>
    %95 = vector.broadcast %94 : vector<16x1xi1> to vector<16x128xi1>
    %96 = vector.broadcast %cst_42 : f32 to vector<16x128xf32>
    %97 = arith.select %95, %81, %96 : vector<16x128xi1>, vector<16x128xf32>
    %98 = arith.index_cast %52 : i32 to index
    %c0_43 = arith.constant 0 : index
    %c0_44 = arith.constant 0 : index
    %99 = vector.load %arg8[%98, %c0_43, %c0_44] : memref<4x16x128xf32, #tpu.memory_space<vmem>>, vector<1x16x128xf32>
    %100 = vector.shape_cast %99 : vector<1x16x128xf32> to vector<16x128xf32>
    %101 = vector.shape_cast %97 : vector<16x128xf32> to vector<1x16x128xf32>
    tpu.vector_store %arg8[%98, %c0_43, %c0_44], %101 {strides = array<i32>} : memref<4x16x128xf32, #tpu.memory_space<vmem>>, vector<1x16x128xf32>,
    %c1_i32_45 = arith.constant 1 : i32
    %c4_i32_46 = arith.constant 4 : i32
    %102 = arith.muli %arg1, %c4_i32_46 : i32
    %103 = arith.addi %102, %c1_i32_45 : i32
    %104 = arith.index_cast %c1_i32_45 : i32 to index
    %c0_47 = arith.constant 0 : index
    %c0_48 = arith.constant 0 : index
    %105 = vector.load %arg2[%104, %c0_47, %c0_48] : memref<4x16x512xbf16, #tpu.memory_space<vmem>>, vector<1x16x512xbf16>
    %106 = vector.shape_cast %105 : vector<1x16x512xbf16> to vector<16x512xbf16>
    %c0_49 = arith.constant 0 : index
    %c0_50 = arith.constant 0 : index
    %107 = vector.load %arg11[%c0_49, %c0_50] : memref<16x128xf32, #tpu.memory_space<vmem>>, vector<16x128xf32>
    %c0_51 = arith.constant 0 : index
    %c0_52 = arith.constant 0 : index
    %108 = vector.load %arg12[%c0_51, %c0_52] : memref<16x128xf32, #tpu.memory_space<vmem>>, vector<16x128xf32>
    %109 = arith.extf %106 : vector<16x512xbf16> to vector<16x512xf32>
    %110 = arith.truncf %107 : vector<16x128xf32> to vector<16x128xbf16>
    %c0_53 = arith.constant 0 : index
    %c0_54 = arith.constant 0 : index
    %111 = vector.load %arg5[%c0_53, %c0_54] : memref<128x512xbf16, #tpu.memory_space<vmem>>, vector<128x512xbf16>
    %cst_55 = arith.constant dense<0.000000e+00> : vector<16x512xf32>
    %112 = tpu.matmul %110, %111, %cst_55 {dimension_numbers = #tpu.dot_dimension_numbers<[1], [0], [0], [1], [0, 0, 1, 1], [], []>} : vector<16x128xbf16>, vector<128x512xbf16>, vector<16x512xf32> -> vector<16x512xf32>
    %113 = arith.addf %109, %112 : vector<16x512xf32>
    %114 = vector.extract_strided_slice %113 {offsets = [0, 0], sizes = [16, 384], strides = [1, 1]} : vector<16x512xf32> to vector<16x384xf32>
    %115 = arith.negf %114 : vector<16x384xf32>
    %116 = math.exp %115 : vector<16x384xf32>
    %cst_56 = arith.constant 1.000000e+00 : f32
    %117 = vector.broadcast %cst_56 : f32 to vector<16x384xf32>
    %118 = arith.addf %117, %116 : vector<16x384xf32>
    %119 = arith.divf %117, %118 : vector<16x384xf32>
    %120 = vector.extract_strided_slice %119 {offsets = [0, 0], sizes = [16, 128], strides = [1, 1]} : vector<16x384xf32> to vector<16x128xf32>
    %121 = vector.extract_strided_slice %119 {offsets = [0, 128], sizes = [16, 128], strides = [1, 1]} : vector<16x384xf32> to vector<16x128xf32>
    %122 = vector.extract_strided_slice %119 {offsets = [0, 256], sizes = [16, 128], strides = [1, 1]} : vector<16x384xf32> to vector<16x128xf32>
    %123 = vector.extract_strided_slice %113 {offsets = [0, 384], sizes = [16, 128], strides = [1, 1]} : vector<16x512xf32> to vector<16x128xf32>
    %124 = math.tanh %123 : vector<16x128xf32>
    %125 = arith.mulf %121, %108 : vector<16x128xf32>
    %126 = arith.mulf %120, %124 : vector<16x128xf32>
    %127 = arith.addf %125, %126 : vector<16x128xf32>
    %128 = math.tanh %127 : vector<16x128xf32>
    %129 = arith.mulf %122, %128 : vector<16x128xf32>
    %130 = vector.broadcast %103 : i32 to vector<16x1xi32>
    %131 = arith.cmpi slt, %130, %3 : vector<16x1xi32>
    %c0_57 = arith.constant 0 : index
    %c0_58 = arith.constant 0 : index
    %132 = vector.load %arg11[%c0_57, %c0_58] : memref<16x128xf32, #tpu.memory_space<vmem>>, vector<16x128xf32>
    %133 = vector.shape_cast %131 : vector<16x1xi1> to vector<16x1xi1>
    %134 = vector.broadcast %133 : vector<16x1xi1> to vector<16x128xi1>
    %135 = arith.select %134, %129, %132 : vector<16x128xi1>, vector<16x128xf32>
    %c0_59 = arith.constant 0 : index
    %c0_60 = arith.constant 0 : index
    %136 = vector.load %arg11[%c0_59, %c0_60] : memref<16x128xf32, #tpu.memory_space<vmem>>, vector<16x128xf32>
    tpu.vector_store %arg11[%c0_59, %c0_60], %135 {strides = array<i32>} : memref<16x128xf32, #tpu.memory_space<vmem>>, vector<16x128xf32>,
    %c0_61 = arith.constant 0 : index
    %c0_62 = arith.constant 0 : index
    %137 = vector.load %arg12[%c0_61, %c0_62] : memref<16x128xf32, #tpu.memory_space<vmem>>, vector<16x128xf32>
    %138 = vector.shape_cast %131 : vector<16x1xi1> to vector<16x1xi1>
    %139 = vector.broadcast %138 : vector<16x1xi1> to vector<16x128xi1>
    %140 = arith.select %139, %127, %137 : vector<16x128xi1>, vector<16x128xf32>
    %c0_63 = arith.constant 0 : index
    %c0_64 = arith.constant 0 : index
    %141 = vector.load %arg12[%c0_63, %c0_64] : memref<16x128xf32, #tpu.memory_space<vmem>>, vector<16x128xf32>
    tpu.vector_store %arg12[%c0_63, %c0_64], %140 {strides = array<i32>} : memref<16x128xf32, #tpu.memory_space<vmem>>, vector<16x128xf32>,
    %cst_65 = arith.constant 0.000000e+00 : f32
    %142 = vector.shape_cast %131 : vector<16x1xi1> to vector<16x1xi1>
    %143 = vector.broadcast %142 : vector<16x1xi1> to vector<16x128xi1>
    %144 = vector.broadcast %cst_65 : f32 to vector<16x128xf32>
    %145 = arith.select %143, %129, %144 : vector<16x128xi1>, vector<16x128xf32>
    %146 = arith.index_cast %c1_i32_45 : i32 to index
    %c0_66 = arith.constant 0 : index
    %c0_67 = arith.constant 0 : index
    %147 = vector.load %arg7[%146, %c0_66, %c0_67] : memref<4x16x128xf32, #tpu.memory_space<vmem>>, vector<1x16x128xf32>
    %148 = vector.shape_cast %147 : vector<1x16x128xf32> to vector<16x128xf32>
    %149 = vector.shape_cast %145 : vector<16x128xf32> to vector<1x16x128xf32>
    tpu.vector_store %arg7[%146, %c0_66, %c0_67], %149 {strides = array<i32>} : memref<4x16x128xf32, #tpu.memory_space<vmem>>, vector<1x16x128xf32>,
    %c3_i32_68 = arith.constant 3 : i32
    %150 = arith.subi %c3_i32_68, %c1_i32_45 : i32
    %c1_i32_69 = arith.constant 1 : i32
    %151 = arith.subi %c1_i32_69, %arg1 : i32
    %c4_i32_70 = arith.constant 4 : i32
    %152 = arith.muli %151, %c4_i32_70 : i32
    %153 = arith.addi %152, %150 : i32
    %154 = arith.index_cast %150 : i32 to index
    %c0_71 = arith.constant 0 : index
    %c0_72 = arith.constant 0 : index
    %155 = vector.load %arg3[%154, %c0_71, %c0_72] : memref<4x16x512xbf16, #tpu.memory_space<vmem>>, vector<1x16x512xbf16>
    %156 = vector.shape_cast %155 : vector<1x16x512xbf16> to vector<16x512xbf16>
    %c0_73 = arith.constant 0 : index
    %c0_74 = arith.constant 0 : index
    %157 = vector.load %arg13[%c0_73, %c0_74] : memref<16x128xf32, #tpu.memory_space<vmem>>, vector<16x128xf32>
    %c0_75 = arith.constant 0 : index
    %c0_76 = arith.constant 0 : index
    %158 = vector.load %arg14[%c0_75, %c0_76] : memref<16x128xf32, #tpu.memory_space<vmem>>, vector<16x128xf32>
    %159 = arith.extf %156 : vector<16x512xbf16> to vector<16x512xf32>
    %160 = arith.truncf %157 : vector<16x128xf32> to vector<16x128xbf16>
    %c0_77 = arith.constant 0 : index
    %c0_78 = arith.constant 0 : index
    %161 = vector.load %arg6[%c0_77, %c0_78] : memref<128x512xbf16, #tpu.memory_space<vmem>>, vector<128x512xbf16>
    %cst_79 = arith.constant dense<0.000000e+00> : vector<16x512xf32>
    %162 = tpu.matmul %160, %161, %cst_79 {dimension_numbers = #tpu.dot_dimension_numbers<[1], [0], [0], [1], [0, 0, 1, 1], [], []>} : vector<16x128xbf16>, vector<128x512xbf16>, vector<16x512xf32> -> vector<16x512xf32>
    %163 = arith.addf %159, %162 : vector<16x512xf32>
    %164 = vector.extract_strided_slice %163 {offsets = [0, 0], sizes = [16, 384], strides = [1, 1]} : vector<16x512xf32> to vector<16x384xf32>
    %165 = arith.negf %164 : vector<16x384xf32>
    %166 = math.exp %165 : vector<16x384xf32>
    %cst_80 = arith.constant 1.000000e+00 : f32
    %167 = vector.broadcast %cst_80 : f32 to vector<16x384xf32>
    %168 = arith.addf %167, %166 : vector<16x384xf32>
    %169 = arith.divf %167, %168 : vector<16x384xf32>
    %170 = vector.extract_strided_slice %169 {offsets = [0, 0], sizes = [16, 128], strides = [1, 1]} : vector<16x384xf32> to vector<16x128xf32>
    %171 = vector.extract_strided_slice %169 {offsets = [0, 128], sizes = [16, 128], strides = [1, 1]} : vector<16x384xf32> to vector<16x128xf32>
    %172 = vector.extract_strided_slice %169 {offsets = [0, 256], sizes = [16, 128], strides = [1, 1]} : vector<16x384xf32> to vector<16x128xf32>
    %173 = vector.extract_strided_slice %163 {offsets = [0, 384], sizes = [16, 128], strides = [1, 1]} : vector<16x512xf32> to vector<16x128xf32>
    %174 = math.tanh %173 : vector<16x128xf32>
    %175 = arith.mulf %171, %158 : vector<16x128xf32>
    %176 = arith.mulf %170, %174 : vector<16x128xf32>
    %177 = arith.addf %175, %176 : vector<16x128xf32>
    %178 = math.tanh %177 : vector<16x128xf32>
    %179 = arith.mulf %172, %178 : vector<16x128xf32>
    %180 = vector.broadcast %153 : i32 to vector<16x1xi32>
    %181 = arith.cmpi slt, %180, %3 : vector<16x1xi32>
    %c0_81 = arith.constant 0 : index
    %c0_82 = arith.constant 0 : index
    %182 = vector.load %arg13[%c0_81, %c0_82] : memref<16x128xf32, #tpu.memory_space<vmem>>, vector<16x128xf32>
    %183 = vector.shape_cast %181 : vector<16x1xi1> to vector<16x1xi1>
    %184 = vector.broadcast %183 : vector<16x1xi1> to vector<16x128xi1>
    %185 = arith.select %184, %179, %182 : vector<16x128xi1>, vector<16x128xf32>
    %c0_83 = arith.constant 0 : index
    %c0_84 = arith.constant 0 : index
    %186 = vector.load %arg13[%c0_83, %c0_84] : memref<16x128xf32, #tpu.memory_space<vmem>>, vector<16x128xf32>
    tpu.vector_store %arg13[%c0_83, %c0_84], %185 {strides = array<i32>} : memref<16x128xf32, #tpu.memory_space<vmem>>, vector<16x128xf32>,
    %c0_85 = arith.constant 0 : index
    %c0_86 = arith.constant 0 : index
    %187 = vector.load %arg14[%c0_85, %c0_86] : memref<16x128xf32, #tpu.memory_space<vmem>>, vector<16x128xf32>
    %188 = vector.shape_cast %181 : vector<16x1xi1> to vector<16x1xi1>
    %189 = vector.broadcast %188 : vector<16x1xi1> to vector<16x128xi1>
    %190 = arith.select %189, %177, %187 : vector<16x128xi1>, vector<16x128xf32>
    %c0_87 = arith.constant 0 : index
    %c0_88 = arith.constant 0 : index
    %191 = vector.load %arg14[%c0_87, %c0_88] : memref<16x128xf32, #tpu.memory_space<vmem>>, vector<16x128xf32>
    tpu.vector_store %arg14[%c0_87, %c0_88], %190 {strides = array<i32>} : memref<16x128xf32, #tpu.memory_space<vmem>>, vector<16x128xf32>,
    %cst_89 = arith.constant 0.000000e+00 : f32
    %192 = vector.shape_cast %181 : vector<16x1xi1> to vector<16x1xi1>
    %193 = vector.broadcast %192 : vector<16x1xi1> to vector<16x128xi1>
    %194 = vector.broadcast %cst_89 : f32 to vector<16x128xf32>
    %195 = arith.select %193, %179, %194 : vector<16x128xi1>, vector<16x128xf32>
    %196 = arith.index_cast %150 : i32 to index
    %c0_90 = arith.constant 0 : index
    %c0_91 = arith.constant 0 : index
    %197 = vector.load %arg8[%196, %c0_90, %c0_91] : memref<4x16x128xf32, #tpu.memory_space<vmem>>, vector<1x16x128xf32>
    %198 = vector.shape_cast %197 : vector<1x16x128xf32> to vector<16x128xf32>
    %199 = vector.shape_cast %195 : vector<16x128xf32> to vector<1x16x128xf32>
    tpu.vector_store %arg8[%196, %c0_90, %c0_91], %199 {strides = array<i32>} : memref<4x16x128xf32, #tpu.memory_space<vmem>>, vector<1x16x128xf32>,
    %c2_i32 = arith.constant 2 : i32
    %c4_i32_92 = arith.constant 4 : i32
    %200 = arith.muli %arg1, %c4_i32_92 : i32
    %201 = arith.addi %200, %c2_i32 : i32
    %202 = arith.index_cast %c2_i32 : i32 to index
    %c0_93 = arith.constant 0 : index
    %c0_94 = arith.constant 0 : index
    %203 = vector.load %arg2[%202, %c0_93, %c0_94] : memref<4x16x512xbf16, #tpu.memory_space<vmem>>, vector<1x16x512xbf16>
    %204 = vector.shape_cast %203 : vector<1x16x512xbf16> to vector<16x512xbf16>
    %c0_95 = arith.constant 0 : index
    %c0_96 = arith.constant 0 : index
    %205 = vector.load %arg11[%c0_95, %c0_96] : memref<16x128xf32, #tpu.memory_space<vmem>>, vector<16x128xf32>
    %c0_97 = arith.constant 0 : index
    %c0_98 = arith.constant 0 : index
    %206 = vector.load %arg12[%c0_97, %c0_98] : memref<16x128xf32, #tpu.memory_space<vmem>>, vector<16x128xf32>
    %207 = arith.extf %204 : vector<16x512xbf16> to vector<16x512xf32>
    %208 = arith.truncf %205 : vector<16x128xf32> to vector<16x128xbf16>
    %c0_99 = arith.constant 0 : index
    %c0_100 = arith.constant 0 : index
    %209 = vector.load %arg5[%c0_99, %c0_100] : memref<128x512xbf16, #tpu.memory_space<vmem>>, vector<128x512xbf16>
    %cst_101 = arith.constant dense<0.000000e+00> : vector<16x512xf32>
    %210 = tpu.matmul %208, %209, %cst_101 {dimension_numbers = #tpu.dot_dimension_numbers<[1], [0], [0], [1], [0, 0, 1, 1], [], []>} : vector<16x128xbf16>, vector<128x512xbf16>, vector<16x512xf32> -> vector<16x512xf32>
    %211 = arith.addf %207, %210 : vector<16x512xf32>
    %212 = vector.extract_strided_slice %211 {offsets = [0, 0], sizes = [16, 384], strides = [1, 1]} : vector<16x512xf32> to vector<16x384xf32>
    %213 = arith.negf %212 : vector<16x384xf32>
    %214 = math.exp %213 : vector<16x384xf32>
    %cst_102 = arith.constant 1.000000e+00 : f32
    %215 = vector.broadcast %cst_102 : f32 to vector<16x384xf32>
    %216 = arith.addf %215, %214 : vector<16x384xf32>
    %217 = arith.divf %215, %216 : vector<16x384xf32>
    %218 = vector.extract_strided_slice %217 {offsets = [0, 0], sizes = [16, 128], strides = [1, 1]} : vector<16x384xf32> to vector<16x128xf32>
    %219 = vector.extract_strided_slice %217 {offsets = [0, 128], sizes = [16, 128], strides = [1, 1]} : vector<16x384xf32> to vector<16x128xf32>
    %220 = vector.extract_strided_slice %217 {offsets = [0, 256], sizes = [16, 128], strides = [1, 1]} : vector<16x384xf32> to vector<16x128xf32>
    %221 = vector.extract_strided_slice %211 {offsets = [0, 384], sizes = [16, 128], strides = [1, 1]} : vector<16x512xf32> to vector<16x128xf32>
    %222 = math.tanh %221 : vector<16x128xf32>
    %223 = arith.mulf %219, %206 : vector<16x128xf32>
    %224 = arith.mulf %218, %222 : vector<16x128xf32>
    %225 = arith.addf %223, %224 : vector<16x128xf32>
    %226 = math.tanh %225 : vector<16x128xf32>
    %227 = arith.mulf %220, %226 : vector<16x128xf32>
    %228 = vector.broadcast %201 : i32 to vector<16x1xi32>
    %229 = arith.cmpi slt, %228, %3 : vector<16x1xi32>
    %c0_103 = arith.constant 0 : index
    %c0_104 = arith.constant 0 : index
    %230 = vector.load %arg11[%c0_103, %c0_104] : memref<16x128xf32, #tpu.memory_space<vmem>>, vector<16x128xf32>
    %231 = vector.shape_cast %229 : vector<16x1xi1> to vector<16x1xi1>
    %232 = vector.broadcast %231 : vector<16x1xi1> to vector<16x128xi1>
    %233 = arith.select %232, %227, %230 : vector<16x128xi1>, vector<16x128xf32>
    %c0_105 = arith.constant 0 : index
    %c0_106 = arith.constant 0 : index
    %234 = vector.load %arg11[%c0_105, %c0_106] : memref<16x128xf32, #tpu.memory_space<vmem>>, vector<16x128xf32>
    tpu.vector_store %arg11[%c0_105, %c0_106], %233 {strides = array<i32>} : memref<16x128xf32, #tpu.memory_space<vmem>>, vector<16x128xf32>,
    %c0_107 = arith.constant 0 : index
    %c0_108 = arith.constant 0 : index
    %235 = vector.load %arg12[%c0_107, %c0_108] : memref<16x128xf32, #tpu.memory_space<vmem>>, vector<16x128xf32>
    %236 = vector.shape_cast %229 : vector<16x1xi1> to vector<16x1xi1>
    %237 = vector.broadcast %236 : vector<16x1xi1> to vector<16x128xi1>
    %238 = arith.select %237, %225, %235 : vector<16x128xi1>, vector<16x128xf32>
    %c0_109 = arith.constant 0 : index
    %c0_110 = arith.constant 0 : index
    %239 = vector.load %arg12[%c0_109, %c0_110] : memref<16x128xf32, #tpu.memory_space<vmem>>, vector<16x128xf32>
    tpu.vector_store %arg12[%c0_109, %c0_110], %238 {strides = array<i32>} : memref<16x128xf32, #tpu.memory_space<vmem>>, vector<16x128xf32>,
    %cst_111 = arith.constant 0.000000e+00 : f32
    %240 = vector.shape_cast %229 : vector<16x1xi1> to vector<16x1xi1>
    %241 = vector.broadcast %240 : vector<16x1xi1> to vector<16x128xi1>
    %242 = vector.broadcast %cst_111 : f32 to vector<16x128xf32>
    %243 = arith.select %241, %227, %242 : vector<16x128xi1>, vector<16x128xf32>
    %244 = arith.index_cast %c2_i32 : i32 to index
    %c0_112 = arith.constant 0 : index
    %c0_113 = arith.constant 0 : index
    %245 = vector.load %arg7[%244, %c0_112, %c0_113] : memref<4x16x128xf32, #tpu.memory_space<vmem>>, vector<1x16x128xf32>
    %246 = vector.shape_cast %245 : vector<1x16x128xf32> to vector<16x128xf32>
    %247 = vector.shape_cast %243 : vector<16x128xf32> to vector<1x16x128xf32>
    tpu.vector_store %arg7[%244, %c0_112, %c0_113], %247 {strides = array<i32>} : memref<4x16x128xf32, #tpu.memory_space<vmem>>, vector<1x16x128xf32>,
    %c3_i32_114 = arith.constant 3 : i32
    %248 = arith.subi %c3_i32_114, %c2_i32 : i32
    %c1_i32_115 = arith.constant 1 : i32
    %249 = arith.subi %c1_i32_115, %arg1 : i32
    %c4_i32_116 = arith.constant 4 : i32
    %250 = arith.muli %249, %c4_i32_116 : i32
    %251 = arith.addi %250, %248 : i32
    %252 = arith.index_cast %248 : i32 to index
    %c0_117 = arith.constant 0 : index
    %c0_118 = arith.constant 0 : index
    %253 = vector.load %arg3[%252, %c0_117, %c0_118] : memref<4x16x512xbf16, #tpu.memory_space<vmem>>, vector<1x16x512xbf16>
    %254 = vector.shape_cast %253 : vector<1x16x512xbf16> to vector<16x512xbf16>
    %c0_119 = arith.constant 0 : index
    %c0_120 = arith.constant 0 : index
    %255 = vector.load %arg13[%c0_119, %c0_120] : memref<16x128xf32, #tpu.memory_space<vmem>>, vector<16x128xf32>
    %c0_121 = arith.constant 0 : index
    %c0_122 = arith.constant 0 : index
    %256 = vector.load %arg14[%c0_121, %c0_122] : memref<16x128xf32, #tpu.memory_space<vmem>>, vector<16x128xf32>
    %257 = arith.extf %254 : vector<16x512xbf16> to vector<16x512xf32>
    %258 = arith.truncf %255 : vector<16x128xf32> to vector<16x128xbf16>
    %c0_123 = arith.constant 0 : index
    %c0_124 = arith.constant 0 : index
    %259 = vector.load %arg6[%c0_123, %c0_124] : memref<128x512xbf16, #tpu.memory_space<vmem>>, vector<128x512xbf16>
    %cst_125 = arith.constant dense<0.000000e+00> : vector<16x512xf32>
    %260 = tpu.matmul %258, %259, %cst_125 {dimension_numbers = #tpu.dot_dimension_numbers<[1], [0], [0], [1], [0, 0, 1, 1], [], []>} : vector<16x128xbf16>, vector<128x512xbf16>, vector<16x512xf32> -> vector<16x512xf32>
    %261 = arith.addf %257, %260 : vector<16x512xf32>
    %262 = vector.extract_strided_slice %261 {offsets = [0, 0], sizes = [16, 384], strides = [1, 1]} : vector<16x512xf32> to vector<16x384xf32>
    %263 = arith.negf %262 : vector<16x384xf32>
    %264 = math.exp %263 : vector<16x384xf32>
    %cst_126 = arith.constant 1.000000e+00 : f32
    %265 = vector.broadcast %cst_126 : f32 to vector<16x384xf32>
    %266 = arith.addf %265, %264 : vector<16x384xf32>
    %267 = arith.divf %265, %266 : vector<16x384xf32>
    %268 = vector.extract_strided_slice %267 {offsets = [0, 0], sizes = [16, 128], strides = [1, 1]} : vector<16x384xf32> to vector<16x128xf32>
    %269 = vector.extract_strided_slice %267 {offsets = [0, 128], sizes = [16, 128], strides = [1, 1]} : vector<16x384xf32> to vector<16x128xf32>
    %270 = vector.extract_strided_slice %267 {offsets = [0, 256], sizes = [16, 128], strides = [1, 1]} : vector<16x384xf32> to vector<16x128xf32>
    %271 = vector.extract_strided_slice %261 {offsets = [0, 384], sizes = [16, 128], strides = [1, 1]} : vector<16x512xf32> to vector<16x128xf32>
    %272 = math.tanh %271 : vector<16x128xf32>
    %273 = arith.mulf %269, %256 : vector<16x128xf32>
    %274 = arith.mulf %268, %272 : vector<16x128xf32>
    %275 = arith.addf %273, %274 : vector<16x128xf32>
    %276 = math.tanh %275 : vector<16x128xf32>
    %277 = arith.mulf %270, %276 : vector<16x128xf32>
    %278 = vector.broadcast %251 : i32 to vector<16x1xi32>
    %279 = arith.cmpi slt, %278, %3 : vector<16x1xi32>
    %c0_127 = arith.constant 0 : index
    %c0_128 = arith.constant 0 : index
    %280 = vector.load %arg13[%c0_127, %c0_128] : memref<16x128xf32, #tpu.memory_space<vmem>>, vector<16x128xf32>
    %281 = vector.shape_cast %279 : vector<16x1xi1> to vector<16x1xi1>
    %282 = vector.broadcast %281 : vector<16x1xi1> to vector<16x128xi1>
    %283 = arith.select %282, %277, %280 : vector<16x128xi1>, vector<16x128xf32>
    %c0_129 = arith.constant 0 : index
    %c0_130 = arith.constant 0 : index
    %284 = vector.load %arg13[%c0_129, %c0_130] : memref<16x128xf32, #tpu.memory_space<vmem>>, vector<16x128xf32>
    tpu.vector_store %arg13[%c0_129, %c0_130], %283 {strides = array<i32>} : memref<16x128xf32, #tpu.memory_space<vmem>>, vector<16x128xf32>,
    %c0_131 = arith.constant 0 : index
    %c0_132 = arith.constant 0 : index
    %285 = vector.load %arg14[%c0_131, %c0_132] : memref<16x128xf32, #tpu.memory_space<vmem>>, vector<16x128xf32>
    %286 = vector.shape_cast %279 : vector<16x1xi1> to vector<16x1xi1>
    %287 = vector.broadcast %286 : vector<16x1xi1> to vector<16x128xi1>
    %288 = arith.select %287, %275, %285 : vector<16x128xi1>, vector<16x128xf32>
    %c0_133 = arith.constant 0 : index
    %c0_134 = arith.constant 0 : index
    %289 = vector.load %arg14[%c0_133, %c0_134] : memref<16x128xf32, #tpu.memory_space<vmem>>, vector<16x128xf32>
    tpu.vector_store %arg14[%c0_133, %c0_134], %288 {strides = array<i32>} : memref<16x128xf32, #tpu.memory_space<vmem>>, vector<16x128xf32>,
    %cst_135 = arith.constant 0.000000e+00 : f32
    %290 = vector.shape_cast %279 : vector<16x1xi1> to vector<16x1xi1>
    %291 = vector.broadcast %290 : vector<16x1xi1> to vector<16x128xi1>
    %292 = vector.broadcast %cst_135 : f32 to vector<16x128xf32>
    %293 = arith.select %291, %277, %292 : vector<16x128xi1>, vector<16x128xf32>
    %294 = arith.index_cast %248 : i32 to index
    %c0_136 = arith.constant 0 : index
    %c0_137 = arith.constant 0 : index
    %295 = vector.load %arg8[%294, %c0_136, %c0_137] : memref<4x16x128xf32, #tpu.memory_space<vmem>>, vector<1x16x128xf32>
    %296 = vector.shape_cast %295 : vector<1x16x128xf32> to vector<16x128xf32>
    %297 = vector.shape_cast %293 : vector<16x128xf32> to vector<1x16x128xf32>
    tpu.vector_store %arg8[%294, %c0_136, %c0_137], %297 {strides = array<i32>} : memref<4x16x128xf32, #tpu.memory_space<vmem>>, vector<1x16x128xf32>,
    %c3_i32_138 = arith.constant 3 : i32
    %c4_i32_139 = arith.constant 4 : i32
    %298 = arith.muli %arg1, %c4_i32_139 : i32
    %299 = arith.addi %298, %c3_i32_138 : i32
    %300 = arith.index_cast %c3_i32_138 : i32 to index
    %c0_140 = arith.constant 0 : index
    %c0_141 = arith.constant 0 : index
    %301 = vector.load %arg2[%300, %c0_140, %c0_141] : memref<4x16x512xbf16, #tpu.memory_space<vmem>>, vector<1x16x512xbf16>
    %302 = vector.shape_cast %301 : vector<1x16x512xbf16> to vector<16x512xbf16>
    %c0_142 = arith.constant 0 : index
    %c0_143 = arith.constant 0 : index
    %303 = vector.load %arg11[%c0_142, %c0_143] : memref<16x128xf32, #tpu.memory_space<vmem>>, vector<16x128xf32>
    %c0_144 = arith.constant 0 : index
    %c0_145 = arith.constant 0 : index
    %304 = vector.load %arg12[%c0_144, %c0_145] : memref<16x128xf32, #tpu.memory_space<vmem>>, vector<16x128xf32>
    %305 = arith.extf %302 : vector<16x512xbf16> to vector<16x512xf32>
    %306 = arith.truncf %303 : vector<16x128xf32> to vector<16x128xbf16>
    %c0_146 = arith.constant 0 : index
    %c0_147 = arith.constant 0 : index
    %307 = vector.load %arg5[%c0_146, %c0_147] : memref<128x512xbf16, #tpu.memory_space<vmem>>, vector<128x512xbf16>
    %cst_148 = arith.constant dense<0.000000e+00> : vector<16x512xf32>
    %308 = tpu.matmul %306, %307, %cst_148 {dimension_numbers = #tpu.dot_dimension_numbers<[1], [0], [0], [1], [0, 0, 1, 1], [], []>} : vector<16x128xbf16>, vector<128x512xbf16>, vector<16x512xf32> -> vector<16x512xf32>
    %309 = arith.addf %305, %308 : vector<16x512xf32>
    %310 = vector.extract_strided_slice %309 {offsets = [0, 0], sizes = [16, 384], strides = [1, 1]} : vector<16x512xf32> to vector<16x384xf32>
    %311 = arith.negf %310 : vector<16x384xf32>
    %312 = math.exp %311 : vector<16x384xf32>
    %cst_149 = arith.constant 1.000000e+00 : f32
    %313 = vector.broadcast %cst_149 : f32 to vector<16x384xf32>
    %314 = arith.addf %313, %312 : vector<16x384xf32>
    %315 = arith.divf %313, %314 : vector<16x384xf32>
    %316 = vector.extract_strided_slice %315 {offsets = [0, 0], sizes = [16, 128], strides = [1, 1]} : vector<16x384xf32> to vector<16x128xf32>
    %317 = vector.extract_strided_slice %315 {offsets = [0, 128], sizes = [16, 128], strides = [1, 1]} : vector<16x384xf32> to vector<16x128xf32>
    %318 = vector.extract_strided_slice %315 {offsets = [0, 256], sizes = [16, 128], strides = [1, 1]} : vector<16x384xf32> to vector<16x128xf32>
    %319 = vector.extract_strided_slice %309 {offsets = [0, 384], sizes = [16, 128], strides = [1, 1]} : vector<16x512xf32> to vector<16x128xf32>
    %320 = math.tanh %319 : vector<16x128xf32>
    %321 = arith.mulf %317, %304 : vector<16x128xf32>
    %322 = arith.mulf %316, %320 : vector<16x128xf32>
    %323 = arith.addf %321, %322 : vector<16x128xf32>
    %324 = math.tanh %323 : vector<16x128xf32>
    %325 = arith.mulf %318, %324 : vector<16x128xf32>
    %326 = vector.broadcast %299 : i32 to vector<16x1xi32>
    %327 = arith.cmpi slt, %326, %3 : vector<16x1xi32>
    %c0_150 = arith.constant 0 : index
    %c0_151 = arith.constant 0 : index
    %328 = vector.load %arg11[%c0_150, %c0_151] : memref<16x128xf32, #tpu.memory_space<vmem>>, vector<16x128xf32>
    %329 = vector.shape_cast %327 : vector<16x1xi1> to vector<16x1xi1>
    %330 = vector.broadcast %329 : vector<16x1xi1> to vector<16x128xi1>
    %331 = arith.select %330, %325, %328 : vector<16x128xi1>, vector<16x128xf32>
    %c0_152 = arith.constant 0 : index
    %c0_153 = arith.constant 0 : index
    %332 = vector.load %arg11[%c0_152, %c0_153] : memref<16x128xf32, #tpu.memory_space<vmem>>, vector<16x128xf32>
    tpu.vector_store %arg11[%c0_152, %c0_153], %331 {strides = array<i32>} : memref<16x128xf32, #tpu.memory_space<vmem>>, vector<16x128xf32>,
    %c0_154 = arith.constant 0 : index
    %c0_155 = arith.constant 0 : index
    %333 = vector.load %arg12[%c0_154, %c0_155] : memref<16x128xf32, #tpu.memory_space<vmem>>, vector<16x128xf32>
    %334 = vector.shape_cast %327 : vector<16x1xi1> to vector<16x1xi1>
    %335 = vector.broadcast %334 : vector<16x1xi1> to vector<16x128xi1>
    %336 = arith.select %335, %323, %333 : vector<16x128xi1>, vector<16x128xf32>
    %c0_156 = arith.constant 0 : index
    %c0_157 = arith.constant 0 : index
    %337 = vector.load %arg12[%c0_156, %c0_157] : memref<16x128xf32, #tpu.memory_space<vmem>>, vector<16x128xf32>
    tpu.vector_store %arg12[%c0_156, %c0_157], %336 {strides = array<i32>} : memref<16x128xf32, #tpu.memory_space<vmem>>, vector<16x128xf32>,
    %cst_158 = arith.constant 0.000000e+00 : f32
    %338 = vector.shape_cast %327 : vector<16x1xi1> to vector<16x1xi1>
    %339 = vector.broadcast %338 : vector<16x1xi1> to vector<16x128xi1>
    %340 = vector.broadcast %cst_158 : f32 to vector<16x128xf32>
    %341 = arith.select %339, %325, %340 : vector<16x128xi1>, vector<16x128xf32>
    %342 = arith.index_cast %c3_i32_138 : i32 to index
    %c0_159 = arith.constant 0 : index
    %c0_160 = arith.constant 0 : index
    %343 = vector.load %arg7[%342, %c0_159, %c0_160] : memref<4x16x128xf32, #tpu.memory_space<vmem>>, vector<1x16x128xf32>
    %344 = vector.shape_cast %343 : vector<1x16x128xf32> to vector<16x128xf32>
    %345 = vector.shape_cast %341 : vector<16x128xf32> to vector<1x16x128xf32>
    tpu.vector_store %arg7[%342, %c0_159, %c0_160], %345 {strides = array<i32>} : memref<4x16x128xf32, #tpu.memory_space<vmem>>, vector<1x16x128xf32>,
    %c3_i32_161 = arith.constant 3 : i32
    %346 = arith.subi %c3_i32_161, %c3_i32_138 : i32
    %c1_i32_162 = arith.constant 1 : i32
    %347 = arith.subi %c1_i32_162, %arg1 : i32
    %c4_i32_163 = arith.constant 4 : i32
    %348 = arith.muli %347, %c4_i32_163 : i32
    %349 = arith.addi %348, %346 : i32
    %350 = arith.index_cast %346 : i32 to index
    %c0_164 = arith.constant 0 : index
    %c0_165 = arith.constant 0 : index
    %351 = vector.load %arg3[%350, %c0_164, %c0_165] : memref<4x16x512xbf16, #tpu.memory_space<vmem>>, vector<1x16x512xbf16>
    %352 = vector.shape_cast %351 : vector<1x16x512xbf16> to vector<16x512xbf16>
    %c0_166 = arith.constant 0 : index
    %c0_167 = arith.constant 0 : index
    %353 = vector.load %arg13[%c0_166, %c0_167] : memref<16x128xf32, #tpu.memory_space<vmem>>, vector<16x128xf32>
    %c0_168 = arith.constant 0 : index
    %c0_169 = arith.constant 0 : index
    %354 = vector.load %arg14[%c0_168, %c0_169] : memref<16x128xf32, #tpu.memory_space<vmem>>, vector<16x128xf32>
    %355 = arith.extf %352 : vector<16x512xbf16> to vector<16x512xf32>
    %356 = arith.truncf %353 : vector<16x128xf32> to vector<16x128xbf16>
    %c0_170 = arith.constant 0 : index
    %c0_171 = arith.constant 0 : index
    %357 = vector.load %arg6[%c0_170, %c0_171] : memref<128x512xbf16, #tpu.memory_space<vmem>>, vector<128x512xbf16>
    %cst_172 = arith.constant dense<0.000000e+00> : vector<16x512xf32>
    %358 = tpu.matmul %356, %357, %cst_172 {dimension_numbers = #tpu.dot_dimension_numbers<[1], [0], [0], [1], [0, 0, 1, 1], [], []>} : vector<16x128xbf16>, vector<128x512xbf16>, vector<16x512xf32> -> vector<16x512xf32>
    %359 = arith.addf %355, %358 : vector<16x512xf32>
    %360 = vector.extract_strided_slice %359 {offsets = [0, 0], sizes = [16, 384], strides = [1, 1]} : vector<16x512xf32> to vector<16x384xf32>
    %361 = arith.negf %360 : vector<16x384xf32>
    %362 = math.exp %361 : vector<16x384xf32>
    %cst_173 = arith.constant 1.000000e+00 : f32
    %363 = vector.broadcast %cst_173 : f32 to vector<16x384xf32>
    %364 = arith.addf %363, %362 : vector<16x384xf32>
    %365 = arith.divf %363, %364 : vector<16x384xf32>
    %366 = vector.extract_strided_slice %365 {offsets = [0, 0], sizes = [16, 128], strides = [1, 1]} : vector<16x384xf32> to vector<16x128xf32>
    %367 = vector.extract_strided_slice %365 {offsets = [0, 128], sizes = [16, 128], strides = [1, 1]} : vector<16x384xf32> to vector<16x128xf32>
    %368 = vector.extract_strided_slice %365 {offsets = [0, 256], sizes = [16, 128], strides = [1, 1]} : vector<16x384xf32> to vector<16x128xf32>
    %369 = vector.extract_strided_slice %359 {offsets = [0, 384], sizes = [16, 128], strides = [1, 1]} : vector<16x512xf32> to vector<16x128xf32>
    %370 = math.tanh %369 : vector<16x128xf32>
    %371 = arith.mulf %367, %354 : vector<16x128xf32>
    %372 = arith.mulf %366, %370 : vector<16x128xf32>
    %373 = arith.addf %371, %372 : vector<16x128xf32>
    %374 = math.tanh %373 : vector<16x128xf32>
    %375 = arith.mulf %368, %374 : vector<16x128xf32>
    %376 = vector.broadcast %349 : i32 to vector<16x1xi32>
    %377 = arith.cmpi slt, %376, %3 : vector<16x1xi32>
    %c0_174 = arith.constant 0 : index
    %c0_175 = arith.constant 0 : index
    %378 = vector.load %arg13[%c0_174, %c0_175] : memref<16x128xf32, #tpu.memory_space<vmem>>, vector<16x128xf32>
    %379 = vector.shape_cast %377 : vector<16x1xi1> to vector<16x1xi1>
    %380 = vector.broadcast %379 : vector<16x1xi1> to vector<16x128xi1>
    %381 = arith.select %380, %375, %378 : vector<16x128xi1>, vector<16x128xf32>
    %c0_176 = arith.constant 0 : index
    %c0_177 = arith.constant 0 : index
    %382 = vector.load %arg13[%c0_176, %c0_177] : memref<16x128xf32, #tpu.memory_space<vmem>>, vector<16x128xf32>
    tpu.vector_store %arg13[%c0_176, %c0_177], %381 {strides = array<i32>} : memref<16x128xf32, #tpu.memory_space<vmem>>, vector<16x128xf32>,
    %c0_178 = arith.constant 0 : index
    %c0_179 = arith.constant 0 : index
    %383 = vector.load %arg14[%c0_178, %c0_179] : memref<16x128xf32, #tpu.memory_space<vmem>>, vector<16x128xf32>
    %384 = vector.shape_cast %377 : vector<16x1xi1> to vector<16x1xi1>
    %385 = vector.broadcast %384 : vector<16x1xi1> to vector<16x128xi1>
    %386 = arith.select %385, %373, %383 : vector<16x128xi1>, vector<16x128xf32>
    %c0_180 = arith.constant 0 : index
    %c0_181 = arith.constant 0 : index
    %387 = vector.load %arg14[%c0_180, %c0_181] : memref<16x128xf32, #tpu.memory_space<vmem>>, vector<16x128xf32>
    tpu.vector_store %arg14[%c0_180, %c0_181], %386 {strides = array<i32>} : memref<16x128xf32, #tpu.memory_space<vmem>>, vector<16x128xf32>,
    %cst_182 = arith.constant 0.000000e+00 : f32
    %388 = vector.shape_cast %377 : vector<16x1xi1> to vector<16x1xi1>
    %389 = vector.broadcast %388 : vector<16x1xi1> to vector<16x128xi1>
    %390 = vector.broadcast %cst_182 : f32 to vector<16x128xf32>
    %391 = arith.select %389, %375, %390 : vector<16x128xi1>, vector<16x128xf32>
    %392 = arith.index_cast %346 : i32 to index
    %c0_183 = arith.constant 0 : index
    %c0_184 = arith.constant 0 : index
    %393 = vector.load %arg8[%392, %c0_183, %c0_184] : memref<4x16x128xf32, #tpu.memory_space<vmem>>, vector<1x16x128xf32>
    %394 = vector.shape_cast %393 : vector<1x16x128xf32> to vector<16x128xf32>
    %395 = vector.shape_cast %391 : vector<16x128xf32> to vector<1x16x128xf32>
    tpu.vector_store %arg8[%392, %c0_183, %c0_184], %395 {strides = array<i32>} : memref<4x16x128xf32, #tpu.memory_space<vmem>>, vector<1x16x128xf32>,
    %c4_i32_185 = arith.constant 4 : i32
    %c1_i32_186 = arith.constant 1 : i32
    %396 = arith.cmpi eq, %arg1, %c1_i32_186 : i32
    %397 = arith.extui %396 : i1 to i32
    %c0_i32_187 = arith.constant 0 : i32
    %398 = arith.cmpi ne, %397, %c0_i32_187 : i32
    scf.if %398 {
      %c0_188 = arith.constant 0 : index
      %c0_189 = arith.constant 0 : index
      %399 = vector.load %arg11[%c0_188, %c0_189] : memref<16x128xf32, #tpu.memory_space<vmem>>, vector<16x128xf32>
      %c0_190 = arith.constant 0 : index
      %c0_191 = arith.constant 0 : index
      %c0_192 = arith.constant 0 : index
      %400 = vector.load %arg9[%c0_190, %c0_191, %c0_192] : memref<2x16x128xf32, #tpu.memory_space<vmem>>, vector<1x16x128xf32>
      %401 = vector.shape_cast %400 : vector<1x16x128xf32> to vector<16x128xf32>
      %402 = vector.shape_cast %399 : vector<16x128xf32> to vector<1x16x128xf32>
      tpu.vector_store %arg9[%c0_190, %c0_191, %c0_192], %402 {strides = array<i32>} : memref<2x16x128xf32, #tpu.memory_space<vmem>>, vector<1x16x128xf32>,
      %c0_193 = arith.constant 0 : index
      %c0_194 = arith.constant 0 : index
      %403 = vector.load %arg13[%c0_193, %c0_194] : memref<16x128xf32, #tpu.memory_space<vmem>>, vector<16x128xf32>
      %c1 = arith.constant 1 : index
      %c0_195 = arith.constant 0 : index
      %c0_196 = arith.constant 0 : index
      %404 = vector.load %arg9[%c1, %c0_195, %c0_196] : memref<2x16x128xf32, #tpu.memory_space<vmem>>, vector<1x16x128xf32>
      %405 = vector.shape_cast %404 : vector<1x16x128xf32> to vector<16x128xf32>
      %406 = vector.shape_cast %403 : vector<16x128xf32> to vector<1x16x128xf32>
      tpu.vector_store %arg9[%c1, %c0_195, %c0_196], %406 {strides = array<i32>} : memref<2x16x128xf32, #tpu.memory_space<vmem>>, vector<1x16x128xf32>,
      %c0_197 = arith.constant 0 : index
      %c0_198 = arith.constant 0 : index
      %407 = vector.load %arg12[%c0_197, %c0_198] : memref<16x128xf32, #tpu.memory_space<vmem>>, vector<16x128xf32>
      %c0_199 = arith.constant 0 : index
      %c0_200 = arith.constant 0 : index
      %c0_201 = arith.constant 0 : index
      %408 = vector.load %arg10[%c0_199, %c0_200, %c0_201] : memref<2x16x128xf32, #tpu.memory_space<vmem>>, vector<1x16x128xf32>
      %409 = vector.shape_cast %408 : vector<1x16x128xf32> to vector<16x128xf32>
      %410 = vector.shape_cast %407 : vector<16x128xf32> to vector<1x16x128xf32>
      tpu.vector_store %arg10[%c0_199, %c0_200, %c0_201], %410 {strides = array<i32>} : memref<2x16x128xf32, #tpu.memory_space<vmem>>, vector<1x16x128xf32>,
      %c0_202 = arith.constant 0 : index
      %c0_203 = arith.constant 0 : index
      %411 = vector.load %arg14[%c0_202, %c0_203] : memref<16x128xf32, #tpu.memory_space<vmem>>, vector<16x128xf32>
      %c1_204 = arith.constant 1 : index
      %c0_205 = arith.constant 0 : index
      %c0_206 = arith.constant 0 : index
      %412 = vector.load %arg10[%c1_204, %c0_205, %c0_206] : memref<2x16x128xf32, #tpu.memory_space<vmem>>, vector<1x16x128xf32>
      %413 = vector.shape_cast %412 : vector<1x16x128xf32> to vector<16x128xf32>
      %414 = vector.shape_cast %411 : vector<16x128xf32> to vector<1x16x128xf32>
      tpu.vector_store %arg10[%c1_204, %c0_205, %c0_206], %414 {strides = array<i32>} : memref<2x16x128xf32, #tpu.memory_space<vmem>>, vector<1x16x128xf32>,
    } else {
    }
    return
  }
  func.func @transform_0(%arg0: i32, %arg1: i32) -> (i32, i32, i32) {
    %c0_i32 = arith.constant 0 : i32
    %c0_i32_0 = arith.constant 0 : i32
    return %arg1, %arg0, %c0_i32 : i32, i32, i32
  }
  func.func @transform_1(%arg0: i32, %arg1: i32) -> (i32, i32, i32) {
    %c1_i32 = arith.constant 1 : i32
    %0 = arith.subi %c1_i32, %arg1 : i32
    %c0_i32 = arith.constant 0 : i32
    %c0_i32_0 = arith.constant 0 : i32
    return %0, %arg0, %c0_i32 : i32, i32, i32
  }
  func.func @transform_2(%arg0: i32, %arg1: i32) -> (i32, i32) {
    %c0_i32 = arith.constant 0 : i32
    %c0_i32_0 = arith.constant 0 : i32
    return %arg0, %c0_i32 : i32, i32
  }
  func.func @transform_3(%arg0: i32, %arg1: i32) -> (i32, i32) {
    %c0_i32 = arith.constant 0 : i32
    %c0_i32_0 = arith.constant 0 : i32
    %c0_i32_1 = arith.constant 0 : i32
    return %c0_i32, %c0_i32_0 : i32, i32
  }
  func.func @transform_4(%arg0: i32, %arg1: i32) -> (i32, i32) {
    %c0_i32 = arith.constant 0 : i32
    %c0_i32_0 = arith.constant 0 : i32
    %c0_i32_1 = arith.constant 0 : i32
    return %c0_i32, %c0_i32_0 : i32, i32
  }
  func.func @transform_5(%arg0: i32, %arg1: i32) -> (i32, i32, i32) {
    %c0_i32 = arith.constant 0 : i32
    %c0_i32_0 = arith.constant 0 : i32
    return %arg1, %arg0, %c0_i32 : i32, i32, i32
  }
  func.func @transform_6(%arg0: i32, %arg1: i32) -> (i32, i32, i32) {
    %c1_i32 = arith.constant 1 : i32
    %0 = arith.subi %c1_i32, %arg1 : i32
    %c0_i32 = arith.constant 0 : i32
    %c0_i32_0 = arith.constant 0 : i32
    return %0, %arg0, %c0_i32 : i32, i32, i32
  }
  func.func @transform_7(%arg0: i32, %arg1: i32) -> (i32, i32, i32) {
    %c0_i32 = arith.constant 0 : i32
    %c0_i32_0 = arith.constant 0 : i32
    %c0_i32_1 = arith.constant 0 : i32
    return %c0_i32, %arg0, %c0_i32_0 : i32, i32, i32
  }
  func.func @transform_8(%arg0: i32, %arg1: i32) -> (i32, i32, i32) {
    %c0_i32 = arith.constant 0 : i32
    %c0_i32_0 = arith.constant 0 : i32
    %c0_i32_1 = arith.constant 0 : i32
    return %c0_i32, %arg0, %c0_i32_0 : i32, i32, i32
  }
}

</mosaic_0001>

<bundles_post_ra>
// kernel: tpu_custom_call.1
= control target key start
LH: loop header
LB: loop body
LE: loop exit
PB: predicated region body
PF: predicated region fallthrough
CT: control target
= control target key end

     0   :  { %s6787_s0 = inlined_call_operand.hbm [shape: bf16[8,32,512], index: 0, kind: input, shape index: {}]   ;;  %s6788_s1 = inlined_call_operand.hbm [shape: bf16[8,32,512], index: 1, kind: input, shape index: {}]   ;;  %s6789_s2 = inlined_call_operand.vmem [shape: s32[32,1], index: 2, kind: input, shape index: {}]   ;;  %s6790_s3 = inlined_call_operand.hbm [shape: bf16[128,512], index: 3, kind: input, shape index: {}]   ;;  %s6791_s4 = inlined_call_operand.hbm [shape: bf16[128,512], index: 4, kind: input, shape index: {}]   ;;  %s6792_s5 = inlined_call_operand.hbm [shape: f32[8,32,128], index: 5, kind: output, shape index: {0}]   ;;  %s6793_s6 = inlined_call_operand.hbm [shape: f32[8,32,128], index: 6, kind: output, shape index: {1}]   ;;  %s6794_s7 = inlined_call_operand.hbm [shape: f32[2,32,128], index: 7, kind: output, shape index: {2}]   ;;  %s6795_s8 = inlined_call_operand.hbm [shape: f32[2,32,128], index: 8, kind: output, shape index: {3}]  }
   0x1   :  { %6864 = sst [smem:[#allocation78_spill]] %s6787_s0 }
   0x2   :  { %6865 = sst [smem:[#allocation79_spill]] %s6788_s1 }
   0x3   :  { %6866 = sst [smem:[#allocation80_spill]] %s6789_s2 }
   0x4   :  { %6867 = sst [smem:[#allocation81_spill]] %s6792_s5 }
   0x5   :  { %6868 = sst [smem:[#allocation82_spill]] %s6793_s6 }
   0x6   :  { %6869 = sst [smem:[#allocation83_spill]] %s6794_s7 }
   0x7   :  { %6870 = sst [smem:[#allocation84_spill]] %s6795_s8 }
   0x8   :  { %14 = vsyncpa [#allocation7], 0 }
   0x9   :  { %16 = vsyncpa [#allocation7 + $0x1], 0 }
   0xa   :  { %17 = vsyncpa [#allocation10], 0 }
   0xb   :  { %19 = vsyncpa [#allocation10 + $0x1], 0 }
   0xc   :  { %20 = vsyncpa [#allocation13], 0 }
   0xd   :  { %21 = vsyncpa [#allocation8], 0 }
   0xe   :  { %23 = vsyncpa [#allocation8 + $0x1], 0 }
   0xf   :  { %24 = vsyncpa [#allocation16], 0 }
  0x10   :  { %26 = vsyncpa [#allocation16 + $0x1], 0 }
  0x11   :  { %27 = vsyncpa [#allocation19], 0 }
  0x12   :  { %29 = vsyncpa [#allocation19 + $0x1], 0  ;;  %s5452_s27 = smov 0   ;;  %s5454_s28 = smov 0  }
  0x13   :  { %s5456_s29 = smov 0   ;;  %s5458_s30 = smov 0  }
  0x14   :  { %s5460_s9 = smov 0   ;;  %s5462_s10 = smov 0  }
  0x15   :  { %s5464_s11 = smov 0   ;;  %s5466_s12 = smov 0  }
  0x16   :  { %s5468_s13 = smov 0   ;;  %s5470_s14 = smov 0  }
  0x17   :  { %s5472_s15 = smov 0   ;;  %s5474_s16 = smov 0  }
  0x18   :  { %s5476_s17 = smov 0   ;;  %s5478_s18 = smov 0  }
  0x19 LB: > { %6871 = sst [smem:[#allocation42_spill]] %s5307_s27  ;;  %s5523_s19 = sadd.s32 4294967295, %s5359_s18   ;;  %s5359_s18 = sphi %s5478_s18, %s35_s18   ;;  %s5355_s17 = sphi %s5476_s17, %s7033_s17   ;;  %s5351_s16 = sphi %s5474_s16, %s7032_s16   ;;  %s5347_s15 = sphi %s5472_s15, %s7031_s15   ;;  %s5343_s14 = sphi %s5470_s14, %s7030_s14   ;;  %s5339_s13 = sphi %s5468_s13, %s7029_s13   ;;  %s5335_s12 = sphi %s5466_s12, %s7028_s12   ;;  %s5331_s11 = sphi %s5464_s11, %s7027_s11   ;;  %s5327_s10 = sphi %s5462_s10, %s7026_s10   ;;  %s5323_s9 = sphi %s5460_s9, %s7025_s9   ;;  %s5319_s30 = sphi %s5458_s30, %s7024_s30   ;;  %s5315_s29 = sphi %s5456_s29, %s7019_s29   ;;  %s5311_s28 = sphi %s5454_s28, %s7018_s28   ;;  %s5307_s27 = sphi %s5452_s27, %s7017_s27  }
  0x1a   : > { %6872 = sst [smem:[#allocation43_spill]] %s5311_s28  ;;  %s44_s21 = sadd.s32 1, %s5351_s16 }
  0x1b   : > { %6873 = sst [smem:[#allocation44_spill]] %s5315_s29  ;;  %s47_s22 = sadd.s32 1, %s5355_s17 }
  0x1c   : > { %6874 = sst [smem:[#allocation45_spill]] %s5331_s11  ;;  %p45_p0 = scmp.ge.s32.totalorder %s44_s21, 2 }
  0x1d   : > { %6875 = sst [smem:[#allocation46_spill]] %s5343_s14  ;;  %s56_s23 = sadd.s32 1, %s5339_s13 }
  0x1e   : > { %6876 = sst [smem:[#allocation47_spill]] %s5347_s15  ;;  %p63_p1 = scmp.ne.s32.totalorder %s5339_s13, %s5335_s12 }
  0x1f   : > { %p64_p2 = scmp.eq.s32.totalorder %s5359_s18, 0  ;;  %s7035_s21 = smov (%p45_p0, %s44_s21), 0 }
  0x20   : > { %6877 = sst [smem:[#allocation48_spill]] %s7035_s21  ;;  %s7037_s22 = smov (!%p45_p0, %s47_s22), %s5355_s17 }
  0x21   : > { %s51_s24 = ssub.s32 %s5351_s16, %s7035_s21  ;;  %p5542_p3 = por %p64_p2, %p63_p1 }
  0x22   : > { %p49_p4 = scmp.ge.s32.totalorder %s7037_s22, 2  ;;  %p69_p5 = scmp.ne.s32.totalorder %s5335_s12, %s5331_s11 }
  0x23   : > { %s6878_s25 = scalar_select %p5542_p3, 1, 0 }
  0x24   : > { %p6800_p6 = scmp.eq.s32.totalorder %s5523_s19, 0  ;;  %s6802_s26 = ssub.s32 1, %s5351_s16 }
  0x25   : > { %s7039_s22 = smov (%p49_p4, %s7037_s22), 0  ;;  %s80_s8 = ssub.s32 1, %s7035_s21 }
  0x26   : > { %6879 = sst [smem:[#allocation49_spill]] %s7039_s22  ;;  %p5557_p7 = por %p6800_p6, %p69_p5 }
  0x27   : > { %s52_s7 = ssub.s32 %s5355_s17, %s7039_s22  ;;  %s81_s6 = ssub.s32 %s6802_s26, %s80_s8 }
  0x28   : > { %s6880_s20 = scalar_select %p5557_p7, 1, 0 }
  0x29   : > { %s53_s5 = sor.u32 %s52_s7, %s51_s24  ;;  %s83_s14 = sor.u32 %s81_s6, %s52_s7 }
  0x2a   : > { %p54_p8 = scmp.eq.s32.totalorder %s53_s5, 0  ;;  %p84_p9 = scmp.eq.s32.totalorder %s83_s14, 0 }
  0x2b   : > { %s86_s2 = sadd.s32 1, %s5327_s10  ;;  %p93_p10 = scmp.ne.s32.totalorder %s5327_s10, %s5323_s9 }
  0x2c   : > { %s5570_s15 = scalar_select %p54_p8, %s5339_s13, %s56_s23  }
  0x2d   : > { %s5573_s22 = scalar_select %p84_p9, %s5327_s10, %s86_s2  }
  0x2e   : > { %6881 = sst [smem:[#allocation50_spill]] %s5570_s15  ;;  %p5577_p11 = por %p93_p10, %p64_p2 }
  0x2f   : > { %6882 = sst [smem:[#allocation51_spill]] %s5573_s22  ;;  %p99_p12 = scmp.ne.s32.totalorder %s5323_s9, %s5319_s30 }
  0x30   : > { %s6883_s8 = scalar_select %p5577_p11, 1, 0 }
  0x31   : > { %p193_p13 = scmp.eq.s32.totalorder %s5523_s19, 3  ;;  %s6884_s5 = sadd.s32 4294967294, %s5359_s18  }
  0x32   : > { %p5586_p0 = scmp.eq.s32.totalorder %s6884_s5, 3  ;;  %p5592_p4 = por %p99_p12, %p6800_p6 }
  0x33   : > { %p236_p2 = scmp.eq.s32.totalorder %s52_s7, 0  ;;  %p5599_p8 = por %p193_p13, %p63_p1 }
  0x34   : > { %s6886_s2 = scalar_select %p5592_p4, 1, 0 }
  0x35   : > { %s6887_s14 = scalar_select %p5599_p8, 1, 0 }
  0x36   : > { %p5608_p9 = por %p5586_p0, %p69_p5  ;;  %p5612_p7 = por %p193_p13, %p93_p10 }
  0x37   : > { %6888 = sst [smem:[#allocation52_spill]] %s6887_s14  ;;  %p5618_p6 = por %p5586_p0, %p99_p12 }
  0x38   : > { %s6889_s30 = scalar_select %p5608_p9, 1, 0 }
  0x39   : > { %s6891_s23 = scalar_select %p5612_p7, 1, 0 }
  0x3a   : > { %6890 = sst [smem:[#allocation53_spill]] %s6889_s30  ;;  %s238_s7 = sadd.s32 1, %s5315_s29 }
  0x3b   : > { %6892 = sst [smem:[#allocation54_spill]] %s6891_s23  ;;  %p248_p1 = scmp.ne.s32.totalorder %s5315_s29, %s5311_s28 }
  0x3c   : > { %s6893_s24 = scalar_select %p5618_p6, 1, 0 }
  0x3d   : > { %s5626_s5 = scalar_select %p236_p2, %s5315_s29, %s238_s7  }
  0x3e   : > { %6894 = sst [smem:[#allocation55_spill]] %s6893_s24  ;;  %p5628_p8 = por %p248_p1, %p193_p13 }
  0x3f   : > { %6895 = sst [smem:[#allocation56_spill]] %s5626_s5  ;;  %p254_p5 = scmp.ne.s32.totalorder %s5311_s28, %s5307_s27 }
  0x40   : > { %s6896_s26 = scalar_select %p5628_p8, 1, 0 }
  0x41   : > { %p4065_p9 = scmp.ge.s32.totalorder %s5359_s18, 1  ;;  %p288_p4 = scmp.lt.s32.totalorder %s5359_s18, 5 }
  0x42   : > { %6897 = sst [smem:[#allocation57_spill]] %s6896_s26  ;;  %p5638_p10 = por %p254_p5, %p5586_p0 }
  0x43   : > { %p5642_p12 = pnand %p4065_p9, %p288_p4  ;;  %s5361_s22 = smov [#allocation11]  }
  0x44   : > { %s6898_s21 = scalar_select %p5638_p10, 1, 0 }
  0x45   : > { %s6900_s15 = scalar_select %p5642_p12, 1, 0 }
  0x46   : > { %6899 = sst [smem:[#allocation58_spill]] %s6898_s21  ;;  %s300_s7 = sshll.u32 %s5361_s22, 4  ;;  %s301_s7 = int_to_ptr.vmem [resolvable:$true] %s300_s7 }
  0x47   : > { %p4528_p13 = pneg %p5642_p12  ;;  %p6901_p2 = scmp.eq.s32.totalorder %s5523_s19, 0 }
  0x48   : > { %s5362_s6 = smov [#allocation12]   ;;  %s5161_s24 = scalar_lea.hbm %s6790_s3, 4096 }
  0x49   : > { %p5650_p1 = pnand %p4528_p13, %p6901_p2  ;;  %s313_s29 = sshll.u32 %s5362_s6, 4  ;;  %s5654_s29 = int_to_ptr.vmem [resolvable:$true] %s313_s29 }
  0x4a   : > { %p5162_p0 = scmp.ne.s32.totalorder %s6790_s3, %s5161_s24  ;;  %p5168_p13 = scmp.lt.u32.totalorder %s5161_s24, %s6790_s3 }
  0x4b   : > { %p5163_p4 = pneg %p5650_p1 }
  0x4d   : > { %p5164_p9 = pnand %p5163_p4, %p5162_p0 }
  0x4f   : > { %p5165_p5 = pneg %p5164_p9 }
  0x51   : > { %p5170_p2 = pnand %p5168_p13, %p5165_p5 }
  0x53   : > { %5173 = shalt.err (!%p5170_p2)
}
  0x54   : > { %s5174_s6 = scalar_lea.vmem %s301_s7, 4096  ;;  %p5182_p7 = scmp.lt.s32.totalorder %s301_s7, %s301_s7 }
  0x55   : > { %p5175_p10 = scmp.ne.s32.totalorder %s301_s7, %s5174_s6  ;;  %p5183_p12 = scmp.lt.s32.totalorder %s5174_s6, %s5174_s6 }
  0x57   : > { %p5177_p6 = pnand %p5175_p10, %p5163_p4  ;;  %p5184_p11 = por %p5183_p12, %p5182_p7 }
  0x59   : > { %p5178_p8 = pneg %p5177_p6 }
  0x5b   : > { %p5185_p3 = pnand %p5184_p11, %p5178_p8 }
  0x5d   : > { %5188 = shalt.err (!%p5185_p3)
}
  0x5e   : > { %s5363_s27 = smov 256   ;;  %s5364_s21 = smov 16  }
  0x5f   : > { %4531 = dma.hbm_to_vmem [thread:$0]  (!%p5650_p1), %s6790_s3, 4096, %s301_s7, [#allocation10], %s5363_s27, %s5363_s27, %s5364_s21  }
  0x60   : > { %s5189_s22 = scalar_lea.hbm %s6791_s4, 4096 }
  0x61   : > { %p5190_p6 = scmp.ne.s32.totalorder %s6791_s4, %s5189_s22  ;;  %p5196_p11 = scmp.lt.u32.totalorder %s5189_s22, %s6791_s4 }
  0x63   : > { %p5192_p3 = pnand %p5190_p6, %p5163_p4 }
  0x65   : > { %p5193_p7 = pneg %p5192_p3 }
  0x67   : > { %p5198_p8 = pnand %p5196_p11, %p5193_p7 }
  0x69   : > { %5201 = shalt.err (!%p5198_p8)
}
  0x6a   : > { %s5202_s7 = scalar_lea.vmem %s5654_s29, 4096  ;;  %p5210_p9 = scmp.lt.s32.totalorder %s5654_s29, %s5654_s29 }
  0x6b   : > { %p5203_p10 = scmp.ne.s32.totalorder %s5654_s29, %s5202_s7  ;;  %p5211_p5 = scmp.lt.s32.totalorder %s5202_s7, %s5202_s7 }
  0x6d   : > { %p5205_p12 = pnand %p5203_p10, %p5163_p4  ;;  %p5212_p13 = por %p5211_p5, %p5210_p9 }
  0x6f   : > { %p5206_p0 = pneg %p5205_p12 }
  0x71   : > { %p5213_p2 = pnand %p5212_p13, %p5206_p0 }
  0x73   : > { %5216 = shalt.err (!%p5213_p2)
}
  0x74   : > { %4534 = dma.hbm_to_vmem [thread:$0]  (!%p5650_p1), %s6791_s4, 4096, %s5654_s29, [#allocation13], %s5363_s27, %s5363_s27, %s5364_s21  }
  0x75   : > { %p4068_p6 = scmp.ge.s32.totalorder %s5359_s18, 4 }
  0x77   : > { %323 = sbr.rel (%p4068_p6) target bundleno = 162 (0xa2), region = 24 }
  0x7e   : > { %s327_s23 = sand.u32 1, %s5339_s13   ;;  %s6824_s11 = sshll.u32 %s5355_s17, 3 }
  0x7f   : > { %s4069_s26 = sshll.u32 %s327_s23, 7  ;;  %s4463_s5 = sshll.u32 %s5351_s16, 6 }
  0x80   : > { %s339_s30 = sadd.s32 %s4463_s5, %s6824_s11  ;;  %s331_s29 = scalar_lea.vmem [#allocation6], %s4069_s26 }
  0x81   : > { %s354_s27 = sshll.u32 %s331_s29, 4  ;;  %s4074_s21 = sshll.u32 %s339_s30, 6  ;;  %s355_s27 = int_to_ptr.vmem [resolvable:$true] %s354_s27 }
  0x82   : > { %p6903_p1 = scmp.ne.s32.totalorder %s6878_s25, 0  ;;  %s5365_s22 = smov 1024  }
  0x83   : > { %s5366_s7 = smov 512   ;;  %s5367_s28 = smov 2  }
  0x84   : > { %s4474_s24 = scalar_select %p6903_p1, [#allocation0], [#allocation32] }
  0x85   : > { %4475 = sst [smem:[#allocation21]] (%p6903_p1), %s5365_s22  ;;  %s5368_s14 = smov 256  }
  0x86   : > { %s346_s6 = sld [smem:[%s4474_s24]]   ;;  %s5369_s29 = smov 16  }
  0x87   : > { %4476 = sst [smem:[#allocation21 + $0x1]] (%p6903_p1), %s5366_s7  ;;  %s6904_s0 = sld [smem:[#allocation78_spill]] }
  0x88   : > { %4477 = sst [smem:[#allocation21 + $0x2]] (%p6903_p1), %s5367_s28  ;;  %s328_s11 = scalar_lea.sflag [#allocation7], %s327_s23 }
  0x89   : > { %4478 = sst [smem:[#allocation21 + $0x3]] (%p6903_p1), %s5368_s14  ;;  %s5370_s7 = smov [#allocation20]  }
  0x8a   : > { %4479 = sst [smem:[#allocation21 + $0x4]] (%p6903_p1), %s5368_s14 }
  0x8b   : > { %4480 = sst [smem:[#allocation21 + $0x5]] (%p6903_p1), %s5369_s29 }
  0x8c   : > { %s4075_s24 = sshll.u32 %s346_s6, 26 }
  0x8d   : > { %s341_s30 = scalar_lea.hbm %s6904_s0, %s4074_s21  ;;  %s4076_s22 = sadd.s32 134217728, %s4075_s24 }
  0x8e   : > { %4481 = dma.general (%p6903_p1), %s341_s30, 2048, %s355_s27, %s328_s11, %s5370_s7, [#allocation21], %s4076_s22, 0  }
  0x8f   : > { %s379_s21 = sand.u32 1, %s5327_s10   ;;  %s377_s28 = sand.u32 1, %s5359_s18  }
  0x90   : > { %s4077_s14 = sshll.u32 %s379_s21, 7  ;;  %s6905_s26 = ssub.s32 1, %s5351_s16 }
  0x91   : > { %s4465_s5 = sshll.u32 %s6905_s26, 6  ;;  %s6906_s6 = sshll.u32 %s5355_s17, 3 }
  0x92   : > { %s390_s29 = sadd.s32 %s4465_s5, %s6906_s6  ;;  %s381_s23 = scalar_lea.vmem [#allocation9], %s4077_s14 }
  0x93   : > { %s405_s25 = sshll.u32 %s381_s23, 4  ;;  %s4082_s11 = sshll.u32 %s390_s29, 6  ;;  %s406_s25 = int_to_ptr.vmem [resolvable:$true] %s405_s25 }
  0x94   : > { %p6907_p4 = scmp.ne.s32.totalorder %s6883_s8, 0  ;;  %s5371_s30 = smov 1024  }
  0x95   : > { %s5372_s22 = smov 512   ;;  %s5373_s7 = smov 2  }
  0x96   : > { %s4482_s27 = scalar_select %p6907_p4, [#allocation0], [#allocation33] }
  0x97   : > { %4483 = sst [smem:[#allocation23]] (%p6907_p4), %s5371_s30  ;;  %s5374_s21 = smov 256  }
  0x98   : > { %s397_s24 = sld [smem:[%s4482_s27]]   ;;  %s5375_s6 = smov 16  }
  0x99   : > { %4484 = sst [smem:[#allocation23 + $0x1]] (%p6907_p4), %s5372_s22  ;;  %s378_s27 = scalar_lea.sflag [#allocation10], %s377_s28 }
  0x9a   : > { %4485 = sst [smem:[#allocation23 + $0x2]] (%p6907_p4), %s5373_s7  ;;  %s6908_s1 = sld [smem:[#allocation79_spill]] }
  0x9b   : > { %4486 = sst [smem:[#allocation23 + $0x3]] (%p6907_p4), %s5374_s21  ;;  %s5376_s30 = smov [#allocation22]  }
  0x9c   : > { %4487 = sst [smem:[#allocation23 + $0x4]] (%p6907_p4), %s5374_s21 }
  0x9d   : > { %4488 = sst [smem:[#allocation23 + $0x5]] (%p6907_p4), %s5375_s6 }
  0x9e   : > { %s4083_s29 = sshll.u32 %s397_s24, 26 }
  0x9f   : > { %s4084_s23 = sadd.s32 134217728, %s4083_s29 }
  0xa0   : > { %s392_s5 = scalar_lea.hbm %s6908_s1, %s4082_s11 }
  0xa1   : > { %4489 = dma.general (%p6907_p4), %s392_s5, 2048, %s406_s25, %s378_s27, %s5376_s30, [#allocation23], %s4084_s23, 0  }
  0xa2 PF: > { %p6909_p3 = scmp.ne.s32.totalorder %s6900_s15, 0 }
  0xa4   : > { %439 = sbr.rel (%p6909_p3) target bundleno = 1398 (0x576), region = 40 }
  0xab   : > { %s5756_s22 = sand.u32 1, %s5335_s12   ;;  %p6910_p7 = scmp.ne.s32.totalorder %s6880_s20, 0 }
  0xac   : > { %s4086_s11 = sshll.u32 %s5756_s22, 7  ;;  %s442_s7 = scalar_lea.sflag [#allocation7], %s5756_s22 }
  0xad   : > { %s5760_s21 = scalar_lea.vmem [#allocation6], %s4086_s11 }
  0xae   : > { %5274 = dma.done.wait (%p6910_p7), %s442_s7, 2048  }
  0xaf   : > { %5276 = vsyncadd (%p6910_p7), %s442_s7, 4294965248  ;;  %s6825_s15 = sand.u32 1, %s5523_s19   ;;  %s452_s8 = sand.u32 1, %s5323_s9  }
  0xb0   : > { %s4087_s28 = sshll.u32 %s452_s8, 7  ;;  %s451_s25 = scalar_lea.sflag [#allocation10], %s6825_s15 }
  0xb1   : > { %s5770_s24 = scalar_lea.vmem [#allocation9], %s4087_s28  ;;  %p6911_p11 = scmp.ne.s32.totalorder %s6886_s2, 0 }
  0xb3   : > { %5278 = dma.done.wait (%p6911_p11), %s451_s25, 2048  }
  0xb4   : > { %5280 = vsyncadd (%p6911_p11), %s451_s25, 4294965248  ;;  %p6912_p8 = scmp.eq.s32.totalorder %s5523_s19, 0 }
  0xb6   : > { %5282 = dma.done.wait (%p6912_p8), [#allocation10], 4096   ;;  %p6913_p10 = pmov %p6912_p8 }
  0xb7   : > { %p6914_p12 = pmov %p6912_p8 }
  0xb8   : > { %5284 = vsyncadd (%p6913_p10), [#allocation10], 4294963200 }
  0xb9   : > { %5286 = dma.done.wait (%p6914_p12), [#allocation13], 4096   ;;  %p6915_p0 = pmov %p6912_p8 }
  0xba   : > { %s6916_s20 = sld [smem:[#allocation43_spill]]  ;;  %s6917_s14 = sld [smem:[#allocation47_spill]] }
  0xbb   : > { %5288 = vsyncadd (%p6915_p0), [#allocation13], 4294963200  ;;  %s4090_s26 = sshll.u32 %s5756_s22, 6  ;;  %s4091_s5 = sshll.u32 %s452_s8, 6 }
  0xbc   : > { %s6918_s7 = sld [smem:[#allocation80_spill]]  ;;  %s5798_s25 = scalar_lea.vmem [#allocation14], %s4090_s26 }
  0xbd   : > { %s5800_s15 = scalar_lea.vmem [#allocation15], %s4091_s5 }
  0xc0   : > { %s510_s2 = sand.u32 1, %s6916_s20   ;;  %s5787_s6 = sshll.u32 %s6917_s14, 1 }
  0xc1   : > { %s4092_s29 = sshll.u32 %s510_s2, 5  ;;  %p526_p9 = scmp.lt.s32.totalorder %s5787_s6, 3 }
  0xc2   : > { %s5802_s8 = scalar_lea.vmem [#allocation17], %s4092_s29  ;;  %s5804_s14 = scalar_lea.vmem [#allocation18], %s4092_s29 }
  0xc3   : > { %s527_s23 = scalar_select %p526_p9, %s5787_s6, 3 }
  0xc4   : > { %s6919_s20 = sld [smem:[#allocation46_spill]] }
  0xc5   : > { %s4095_s27 = sshll.u32 %s527_s23, 3 }
  0xc6   : > { %s5796_s28 = scalar_lea.vmem %s6918_s7, %s4095_s27 }
  0xca   : > { %p4096_p5 = scmp.ne.s32.totalorder %s6919_s20, 0 }
  0xcb   : > { %v5377_v0 = vmov (!%p4096_p5), 0.0  }
  0xcc   : > { %542 = sbr.rel (%p4096_p5) target bundleno = 211 (0xd3), region = 60  ;;  %543 = vst [vmem:[#allocation2] sm:$0xff] (!%p4096_p5), %v5377_v0  ;;  %544 = vst [vmem:[#allocation2 + $0x8] sm:$0xff] (!%p4096_p5), %v5377_v0 }
  0xcd   : > { %545 = vst [vmem:[#allocation3] sm:$0xff] (!%p4096_p5), %v5377_v0  ;;  %546 = vst [vmem:[#allocation3 + $0x8] sm:$0xff] (!%p4096_p5), %v5377_v0 }
  0xce   : > { %547 = vst [vmem:[#allocation4] sm:$0xff] (!%p4096_p5), %v5377_v0  ;;  %548 = vst [vmem:[#allocation4 + $0x8] sm:$0xff] (!%p4096_p5), %v5377_v0 }
  0xcf   : > { %549 = vst [vmem:[#allocation5] sm:$0xff] (!%p4096_p5), %v5377_v0  ;;  %550 = vst [vmem:[#allocation5 + $0x8] sm:$0xff] (!%p4096_p5), %v5377_v0 }
  0xd3 PF: > { %v5807_v1 = vld [vmem:[#allocation11 + $0x4] ss:$16 sps:$4 sm:$0xff]   ;;  %v5809_v2 = vld [vmem:[#allocation11] ss:$16 sps:$4 sm:$0xff]   ;;  %v6842_v3 = vmov 0   ;;  %v5896_v32 = vld [vmem:[#allocation2 + $0x8] sm:$0xff] }
  0xd4   : > { %795 = vmatprep.mubr.bf16.mxu0 %v6842_v3  ;;  %838 = vmatprep.mubr.bf16.mxu1 %v6842_v3  ;;  %v5814_v4 = vld [vmem:[#allocation11 + $0x24] ss:$16 sps:$4 sm:$0xff]   ;;  %v5818_v5 = vld [vmem:[#allocation11 + $0x20] ss:$16 sps:$4 sm:$0xff]   ;;  %v5824_v7 = vld [vmem:[#allocation11 + $0xc] ss:$16 sps:$4 sm:$0xff]  }
  0xd5   : > { %763 = vmatprep.subr.bf16.mxu0 %v5807_v1  ;;  %4711 = vset.pattern.permute.xlu0 %v6842_v3  ;;  %v5822_v6 = vld [vmem:[#allocation11 + $0x44] ss:$16 sps:$4 sm:$0xff]   ;;  %v5826_v8 = vld [vmem:[#allocation11 + $0x8] ss:$16 sps:$4 sm:$0xff]   ;;  %v5829_v9 = vld [vmem:[#allocation11 + $0x40] ss:$16 sps:$4 sm:$0xff]  }
  0xd6   : > { %764 = vmatpush1.bf16.msra.mxu0 %v5809_v2  ;;  %4712 = vset.pattern.permute.xlu1 %v6842_v3  ;;  %v5833_v10 = vld [vmem:[#allocation11 + $0x64] ss:$16 sps:$4 sm:$0xff]   ;;  %v5836_v11 = vld [vmem:[#allocation11 + $0x2c] ss:$16 sps:$4 sm:$0xff]   ;;  %v5838_v12 = vld [vmem:[#allocation11 + $0x28] ss:$16 sps:$4 sm:$0xff]  }
  0xd7   : > { %765 = vmatprep.subr.bf16.mxu0 %v5814_v4  ;;  %806 = vmatprep.subr.bf16.mxu1 %v5824_v7  ;;  %v5842_v13 = vld [vmem:[#allocation11 + $0x60] ss:$16 sps:$4 sm:$0xff]   ;;  %v5844_v14 = vld [vmem:[#allocation11 + $0x84] ss:$16 sps:$4 sm:$0xff]   ;;  %v5846_v15 = vld [vmem:[#allocation11 + $0x4c] ss:$16 sps:$4 sm:$0xff]  }
  0xd8   : > { %807 = vmatpush1.bf16.msra.mxu1 %v5826_v8  ;;  %v5850_v16 = vld [vmem:[#allocation11 + $0x48] ss:$16 sps:$4 sm:$0xff]   ;;  %v5853_v17 = vld [vmem:[#allocation11 + $0x6c] ss:$16 sps:$4 sm:$0xff]   ;;  %v5856_v18 = vld [vmem:[#allocation11 + $0x80] ss:$16 sps:$4 sm:$0xff]  }
  0xd9   : > { %808 = vmatprep.subr.bf16.mxu1 %v5836_v11  ;;  %v5859_v19 = vld [vmem:[#allocation11 + $0xa4] ss:$16 sps:$4 sm:$0xff]   ;;  %v5862_v20 = vld [vmem:[#allocation11 + $0x68] ss:$16 sps:$4 sm:$0xff]   ;;  %v5865_v21 = vld [vmem:[#allocation11 + $0x8c] ss:$16 sps:$4 sm:$0xff]  }
  0xda   : > { %766 = vmatpush1.bf16.msra.mxu0 %v5818_v5  ;;  %v5868_v22 = vld [vmem:[#allocation11 + $0xa0] ss:$16 sps:$4 sm:$0xff]   ;;  %v5871_v23 = vld [vmem:[#allocation11 + $0xc4] ss:$16 sps:$4 sm:$0xff]   ;;  %v5874_v24 = vld [vmem:[#allocation11 + $0x88] ss:$16 sps:$4 sm:$0xff]  }
  0xdb   : > { %767 = vmatprep.subr.bf16.mxu0 %v5822_v6  ;;  %v5877_v25 = vld [vmem:[#allocation11 + $0xac] ss:$16 sps:$4 sm:$0xff]   ;;  %v5879_v26 = vld [vmem:[#allocation11 + $0xc0] ss:$16 sps:$4 sm:$0xff]   ;;  %v5882_v27 = vld [vmem:[#allocation11 + $0xe4] ss:$16 sps:$4 sm:$0xff]  }
  0xdc   : > { %809 = vmatpush1.bf16.msra.mxu1 %v5838_v12  ;;  %v5886_v28 = vld [vmem:[#allocation11 + $0xa8] ss:$16 sps:$4 sm:$0xff]   ;;  %v5888_v29 = vld [vmem:[#allocation11 + $0xe0] ss:$16 sps:$4 sm:$0xff]   ;;  %v5891_v30 = vld [vmem:[#allocation11 + $0xcc] ss:$16 sps:$4 sm:$0xff]  }
  0xdd   : > { %810 = vmatprep.subr.bf16.mxu1 %v5846_v15  ;;  %v5893_v31 = vld [vmem:[#allocation2] sm:$0xff]  ;;  %v5902_v34 = vld [vmem:[#allocation11 + $0xc8] ss:$16 sps:$4 sm:$0xff]   ;;  %v5905_v35 = vld [vmem:[#allocation11 + $0xec] ss:$16 sps:$4 sm:$0xff]   ;;  %s6920_s26 = sld [smem:[#allocation46_spill]] }
  0xde   : > { %768 = vmatpush1.bf16.msra.mxu0 %v5829_v9  ;;  %v5899_v33 = vld [vmem:[#allocation12 + $0x4] ss:$16 sps:$4 sm:$0xff]   ;;  %v570_v36 = vpack.c.bf16 %v5896_v32, %v5893_v31  ;;  %v5910_v37 = vld [vmem:[#allocation12] ss:$16 sps:$4 sm:$0xff]   ;;  %v5916_v39 = vld [vmem:[#allocation11 + $0xe8] ss:$16 sps:$4 sm:$0xff]  }
  0xdf   : > { %769 = vmatprep.subr.bf16.mxu0 %v5833_v10  ;;  %v5913_v38 = vld [vmem:[#allocation12 + $0x24] ss:$16 sps:$4 sm:$0xff]   ;;  %v5919_v40 = vld [vmem:[#allocation12 + $0xc] ss:$16 sps:$4 sm:$0xff]   ;;  %v5922_v41 = vld [vmem:[#allocation12 + $0x20] ss:$16 sps:$4 sm:$0xff]  }
  0xe0   : > { %811 = vmatpush1.bf16.msra.mxu1 %v5850_v16  ;;  %v5926_v42 = vld [vmem:[#allocation12 + $0x44] ss:$16 sps:$4 sm:$0xff]   ;;  %v5929_v43 = vld [vmem:[#allocation12 + $0x8] ss:$16 sps:$4 sm:$0xff]   ;;  %v5932_v44 = vld [vmem:[#allocation12 + $0x2c] ss:$16 sps:$4 sm:$0xff]  }
  0xe1   : > { %812 = vmatprep.subr.bf16.mxu1 %v5853_v17  ;;  %v5935_v45 = vld [vmem:[#allocation12 + $0x40] ss:$16 sps:$4 sm:$0xff]   ;;  %v5937_v46 = vld [vmem:[#allocation12 + $0x64] ss:$16 sps:$4 sm:$0xff]   ;;  %v5945_v47 = vld [vmem:[#allocation12 + $0x28] ss:$16 sps:$4 sm:$0xff]  }
  0xe2   : > { %770 = vmatpush1.bf16.msra.mxu0 %v5842_v13  ;;  %6921 = vst [vmem:[#allocation59_spill] sm:$0xff] %v5935_v45  ;;  %6922 = vst [vmem:[#allocation60_spill] sm:$0xff] %v5937_v46  ;;  %v5948_v48 = vld [vmem:[#allocation12 + $0x4c] ss:$16 sps:$4 sm:$0xff]   ;;  %v5951_v49 = vld [vmem:[#allocation12 + $0x60] ss:$16 sps:$4 sm:$0xff]  }
  0xe3   : > { %771 = vmatprep.subr.bf16.mxu0 %v5844_v14  ;;  %s5940_s5 = sshll.u32 %s6920_s26, 2  ;;  %s6863_s29 = ssub.s32 1, %s6920_s26  ;;  %6923 = vst [vmem:[#allocation61_spill] sm:$0xff] %v5951_v49  ;;  %v5960_v51 = vld [vmem:[#allocation12 + $0x84] ss:$16 sps:$4 sm:$0xff]   ;;  %v5973_v55 = vld [vmem:[%s5796_s28 + $0x8] sm:$0xff] }
  0xe4   : > { %813 = vmatpush1.bf16.msra.mxu1 %v5862_v20  ;;  %v905_v50 = vstv %s5940_s5  ;;  %s1315_s23 = sadd.s32 1, %s5940_s5  ;;  %s5957_s27 = sshll.u32 %s6863_s29, 2  ;;  %6924 = vst [vmem:[#allocation62_spill] sm:$0xff] %v5960_v51  ;;  %v5962_v52 = vld [vmem:[#allocation12 + $0x48] ss:$16 sps:$4 sm:$0xff]   ;;  %v5970_v54 = vld [vmem:[%s5796_s28] sm:$0xff] }
  0xe5   : > { %814 = vmatprep.subr.bf16.mxu1 %v5865_v21  ;;  %6925 = vst [vmem:[#allocation63_spill] sm:$0xff] %v5962_v52  ;;  %s934_s30 = sadd.s32 3, %s5957_s27  ;;  %v5967_v53 = vld [vmem:[#allocation12 + $0x6c] ss:$16 sps:$4 sm:$0xff]   ;;  %v5975_v56 = vld [vmem:[#allocation12 + $0x80] ss:$16 sps:$4 sm:$0xff]   ;;  %vm906_vm0 = vcmp.lt.s32.totalorder %v905_v50, %v5970_v54  ;;  %vm907_vm1 = vcmp.lt.s32.totalorder %v905_v50, %v5973_v55  ;;  %v1668_v60 = vstv %s1315_s23 }
  0xe6   : > { %772 = vmatpush1.bf16.msra.mxu0 %v5856_v18  ;;  %6926 = vst [vmem:[#allocation64_spill] sm:$0xff] %v5967_v53  ;;  %6927 = vst [vmem:[#allocation65_spill] sm:$0xff] %v5975_v56  ;;  %v5980_v57 = vld [vmem:[#allocation12 + $0xa4] ss:$16 sps:$4 sm:$0xff]   ;;  %v5982_v58 = vld [vmem:[#allocation12 + $0x68] ss:$16 sps:$4 sm:$0xff]   ;;  %v1287_v61 = vstv %s934_s30  ;;  %vm1669_vm2 = vcmp.lt.s32.totalorder %v1668_v60, %v5970_v54  ;;  %vm1670_vm6 = vcmp.lt.s32.totalorder %v1668_v60, %v5973_v55 }
  0xe7   : > { %773 = vmatprep.subr.bf16.mxu0 %v5859_v19  ;;  %6928 = vst [vmem:[#allocation66_spill] sm:$0xff] %v5980_v57  ;;  %6929 = vst [vmem:[#allocation67_spill] sm:$0xff] %v5982_v58  ;;  %v908_v59 = vsel %vm906_vm0, 1, %v6842_v3  ;;  %v5986_v62 = vld [vmem:[#allocation12 + $0x8c] ss:$16 sps:$4 sm:$0xff]   ;;  %s1696_s11 = sadd.s32 2, %s5957_s27  ;;  %vm1288_vm3 = vcmp.lt.s32.totalorder %v1287_v61, %v5970_v54  ;;  %vm1289_vm4 = vcmp.lt.s32.totalorder %v1287_v61, %v5973_v55 }
  0xe8   : > { %815 = vmatpush1.bf16.msra.mxu1 %v5874_v24  ;;  %6930 = vst [vmem:[#allocation68_spill] sm:$0xff] %v5986_v62  ;;  %911 = vperm.xlu0 %4711, %v908_v59   ;;  %v909_v63 = vsel %vm907_vm1, 1, %v6842_v3  ;;  %v5992_v0 = vld [vmem:[#allocation12 + $0xa0] ss:$16 sps:$4 sm:$0xff]   ;;  %v5999_v50 = vld [vmem:[#allocation12 + $0x88] ss:$16 sps:$4 sm:$0xff]   ;;  %v2049_v59 = vstv %s1696_s11 }
  0xe9   : > { %816 = vmatprep.subr.bf16.mxu1 %v5877_v25  ;;  %6931 = vst [vmem:[#allocation69_spill] sm:$0xff] %v5992_v0  ;;  %s2077_s7 = sadd.s32 2, %s5940_s5  ;;  %vm2050_vm5 = vcmp.lt.s32.totalorder %v2049_v59, %v5970_v54  ;;  %v1291_v61 = vsel %vm1289_vm4, 1, %v6842_v3  ;;  %s2458_s28 = sadd.s32 1, %s5957_s27  ;;  %vm2051_vm8 = vcmp.lt.s32.totalorder %v2049_v59, %v5973_v55 }
  0xea   : > { %774 = vmatpush1.bf16.msra.mxu0 %v5868_v22  ;;  %v2811_v60 = vstv %s2458_s28  ;;  %s2839_s20 = sadd.s32 3, %s5940_s5  ;;  %v2053_v59 = vsel %vm2051_vm8, 1, %v6842_v3  ;;  %p4439_p13 = scmp.ne.s32.totalorder %s6920_s26, 1 }
  0xeb   : > { %775 = vmatprep.subr.bf16.mxu0 %v5871_v23  ;;  %vm2812_vm9 = vcmp.lt.s32.totalorder %v2811_v60, %v5970_v54  ;;  %vm2813_vm12 = vcmp.lt.s32.totalorder %v2811_v60, %v5973_v55 }
  0xec   : > { %817 = vmatpush1.bf16.msra.mxu1 %v5886_v28  ;;  %914 = vperm.xlu0 %4711, %v909_v63   ;;  %v6016_v63 = vld [vmem:[#allocation12 + $0xa8] ss:$16 sps:$4 sm:$0xff]  }
  0xed   : > { %818 = vmatprep.subr.bf16.mxu1 %v5891_v30 }
  0xee   : > { %776 = vmatpush1.bf16.msra.mxu0 %v5879_v26 }
  0xef   : > { %777 = vmatprep.subr.bf16.mxu0 %v5882_v27 }
  0xf0   : > { %819 = vmatpush1.bf16.msra.mxu1 %v5902_v34 }
  0xf1   : > { %820 = vmatprep.subr.bf16.mxu1 %v5905_v35 }
  0xf2   : > { %778 = vmatpush1.bf16.msra.mxu0 %v5888_v29 }
  0xf3   : > { %1145 = vmatprep.subr.bf16.mxu0 %v5899_v33 }
  0xf4   : > { %821 = vmatpush1.bf16.msra.mxu1 %v5916_v39 }
  0xf5   : > { %796 = vmatmul.mubr.bf16.vlgmr.msra.gmra.mrb[0].mxu0 %v570_v36  ;;  %1188 = vmatprep.subr.bf16.mxu1 %v5919_v40 }
  0xf6   : > { %1146 = vmatpush1.bf16.msra.mxu0 %v5910_v37  ;;  %1177 = vmatprep.mubr.bf16.mxu0 %v6842_v3 }
  0xf7   : > { %1147 = vmatprep.subr.bf16.mxu0 %v5913_v38  ;;  %839 = vmatmul.mubr.bf16.vlgmr.msra.gmra.mrb[0].mxu1 %v570_v36  ;;  %v5997_v36 = vld [vmem:[#allocation12 + $0xc4] ss:$16 sps:$4 sm:$0xff]  }
  0xf8   : > { %1189 = vmatpush1.bf16.msra.mxu1 %v5929_v43  ;;  %1220 = vmatprep.mubr.bf16.mxu1 %v6842_v3  ;;  %6932 = vst [vmem:[#allocation70_spill] sm:$0xff] %v5997_v36 }
  0xf9   : > { %1190 = vmatprep.subr.bf16.mxu1 %v5932_v44 }
  0xfa   : > { %1148 = vmatpush1.bf16.msra.mxu0 %v5922_v41 }
  0xfb   : > { %1149 = vmatprep.subr.bf16.mxu0 %v5926_v42 }
  0xfc   : > { %1191 = vmatpush1.bf16.msra.mxu1 %v5945_v47 }
  0xfd   : > { %1192 = vmatprep.subr.bf16.mxu1 %v5948_v48 }
  0xfe   : > { %1150 = vmatpush1.bf16.msra.mxu0 %v5935_v45  ;;  %v6031_v45 = vld [vmem:[#allocation4 + $0x8] sm:$0xff] }
  0xff   : > { %1151 = vmatprep.subr.bf16.mxu0 %v5937_v46  ;;  %v6010_v46 = vld [vmem:[#allocation12 + $0xc0] ss:$16 sps:$4 sm:$0xff]   ;;  %6936 = vst [vmem:[#allocation74_spill] sm:$0xff] %v6031_v45 }
 0x100   : > { %1193 = vmatpush1.bf16.msra.mxu1 %v5962_v52  ;;  %6934 = vst [vmem:[#allocation72_spill] sm:$0xff] %v6010_v46  ;;  %v2430_v52 = vstv %s2077_s7 }
 0x101   : > { %1194 = vmatprep.subr.bf16.mxu1 %v5967_v53  ;;  %v1671_v53 = vsel %vm1669_vm2, 1, %v6842_v3  ;;  %vm2431_vm7 = vcmp.lt.s32.totalorder %v2430_v52, %v5970_v54  ;;  %vm2432_vm10 = vcmp.lt.s32.totalorder %v2430_v52, %v5973_v55 }
 0x102   : > { %1152 = vmatpush1.bf16.msra.mxu0 %v5951_v49  ;;  %v1290_v49 = vsel %vm1288_vm3, 1, %v6842_v3  ;;  %1674 = vperm.xlu0 %4711, %v1671_v53   ;;  %v6035_v53 = vld [vmem:[#allocation12 + $0xc8] ss:$16 sps:$4 sm:$0xff]  }
 0x103   : > { %1153 = vmatprep.subr.bf16.mxu0 %v5960_v51  ;;  %v6003_v51 = vld [vmem:[#allocation12 + $0xac] ss:$16 sps:$4 sm:$0xff]   ;;  %1293 = vperm.xlu1 %4712, %v1290_v49   ;;  %v2052_v49 = vsel %vm2050_vm5, 1, %v6842_v3 }
 0x104   : > { %6933 = vst [vmem:[#allocation71_spill] sm:$0xff] %v6003_v51  ;;  %1195 = vmatpush1.bf16.msra.mxu1 %v5982_v58  ;;  %v6029_v58 = vld [vmem:[#allocation4] sm:$0xff] }
 0x105   : > { %1196 = vmatprep.subr.bf16.mxu1 %v5986_v62  ;;  %v6027_v62 = vld [vmem:[#allocation12 + $0xe0] ss:$16 sps:$4 sm:$0xff]  }
 0x106   : > { %1154 = vmatpush1.bf16.msra.mxu0 %v5975_v56  ;;  %v6014_v56 = vld [vmem:[#allocation12 + $0xe4] ss:$16 sps:$4 sm:$0xff]   ;;  %2055 = vperm.xlu0 %4711, %v2052_v49   ;;  %v3192_v49 = vstv %s2839_s20 }
 0x107   : > { %1155 = vmatprep.subr.bf16.mxu0 %v5980_v57  ;;  %6935 = vst [vmem:[#allocation73_spill] sm:$0xff] %v6014_v56  ;;  %v6020_v57 = vld [vmem:[#allocation12 + $0xcc] ss:$16 sps:$4 sm:$0xff]   ;;  %1296 = vperm.xlu1 %4712, %v1291_v61   ;;  %v952_v61 = vpack.c.bf16 %v6031_v45, %v6029_v58  ;;  %vm3193_vm11 = vcmp.lt.s32.totalorder %v3192_v49, %v5970_v54  ;;  %v2434_v45 = vsel %vm2432_vm10, 1, %v6842_v3 }
 0x108   : > { %1197 = vmatpush1.bf16.msra.mxu1 %v5999_v50  ;;  %vm3194_vm14 = vcmp.lt.s32.totalorder %v3192_v49, %v5973_v55 }
 0x109   : > { %1198 = vmatprep.subr.bf16.mxu1 %v6003_v51  ;;  %v2433_v51 = vsel %vm2431_vm7, 1, %v6842_v3 }
 0x10a   : > { %1156 = vmatpush1.bf16.msra.mxu0 %v5992_v0  ;;  %v6039_v0 = vld [vmem:[#allocation12 + $0xec] ss:$16 sps:$4 sm:$0xff]   ;;  %2436 = vperm.xlu0 %4711, %v2433_v51   ;;  %v3195_v51 = vsel %vm3193_vm11, 1, %v6842_v3 }
 0x10b   : > { %1157 = vmatprep.subr.bf16.mxu0 %v5997_v36  ;;  %v1672_v36 = vsel %vm1670_vm6, 1, %v6842_v3 }
 0x10c   : > { %1199 = vmatpush1.bf16.msra.mxu1 %v6016_v63  ;;  %1677 = vperm.xlu1 %4712, %v1672_v36   ;;  %v3571_v36 = vstv %s5957_s27 }
 0x10d   : > { %1200 = vmatprep.subr.bf16.mxu1 %v6020_v57  ;;  %vm3572_vm13 = vcmp.lt.s32.totalorder %v3571_v36, %v5970_v54  ;;  %vm3573_vm15 = vcmp.lt.s32.totalorder %v3571_v36, %v5973_v55 }
 0x10e   : > { %1158 = vmatpush1.bf16.msra.mxu0 %v6010_v46  ;;  %v6050_v46 = vld [vmem:[#allocation12 + $0xe8] ss:$16 sps:$4 sm:$0xff]  }
 0x10f   : > { %1159 = vmatprep.subr.bf16.mxu0 %v6014_v56  ;;  %v2814_v56 = vsel %vm2812_vm9, 1, %v6842_v3 }
 0x110   : > { %1201 = vmatpush1.bf16.msra.mxu1 %v6035_v53  ;;  %2058 = vperm.xlu1 %4712, %v2053_v59  }
 0x111   : > { %1202 = vmatprep.subr.bf16.mxu1 %v6039_v0  ;;  %2817 = vperm.xlu0 %4711, %v2814_v56  }
 0x112   : > { %1160 = vmatpush1.bf16.msra.mxu0 %v6027_v62 }
 0x113   : > { %1526 = vmatprep.subr.bf16.mxu0 %v5807_v1  ;;  %v2815_v1 = vsel %vm2813_vm12, 1, %v6842_v3 }
 0x114   : > { %1203 = vmatpush1.bf16.msra.mxu1 %v6050_v46  ;;  %2439 = vperm.xlu1 %4712, %v2434_v45  }
 0x115   : > { %1178 = vmatmul.mubr.bf16.vlgmr.msra.gmra.mrb[4].mxu0 %v952_v61  ;;  %1569 = vmatprep.subr.bf16.mxu1 %v5824_v7  ;;  %v556_v7 = vld [vmem:[%s5760_s21 + $0x10] sm:$0xff] }
 0x116   : > { %1527 = vmatpush1.bf16.msra.mxu0 %v5809_v2  ;;  %1558 = vmatprep.mubr.bf16.mxu0 %v6842_v3  ;;  %v3574_v2 = vsel %vm3572_vm13, 1, %v6842_v3 }
 0x117   : > { %1528 = vmatprep.subr.bf16.mxu0 %v5814_v4  ;;  %1221 = vmatmul.mubr.bf16.vlgmr.msra.gmra.mrb[4].mxu1 %v952_v61  ;;  %v3196_v4 = vsel %vm3194_vm14, 1, %v6842_v3 }
 0x118   : > { %3198 = vperm.xlu0 %4711, %v3195_v51   ;;  %1570 = vmatpush1.bf16.msra.mxu1 %v5826_v8 }
 0x119   : > { %2820 = vperm.xlu1 %4712, %v2815_v1   ;;  %1571 = vmatprep.subr.bf16.mxu1 %v5836_v11 }
 0x11a   : > { %1529 = vmatpush1.bf16.msra.mxu0 %v5818_v5  ;;  %1601 = vmatprep.mubr.bf16.mxu1 %v6842_v3  ;;  %v3575_v5 = vsel %vm3573_vm15, 1, %v6842_v3 }
 0x11b   : > { %1530 = vmatprep.subr.bf16.mxu0 %v5822_v6  ;;  %v554_v6 = vld [vmem:[%s5760_s21] sm:$0xff] }
 0x11c   : > { %3577 = vperm.xlu0 %4711, %v3574_v2   ;;  %1572 = vmatpush1.bf16.msra.mxu1 %v5838_v12  ;;  %v562_v8 = vunpack.c.l.bf16 %v554_v6  ;;  %v567_v12 = vunpack.c.h.bf16 %v556_v7 }
 0x11d   : > { %3201 = vperm.xlu1 %4712, %v3196_v4   ;;  %1573 = vmatprep.subr.bf16.mxu1 %v5846_v15 }
 0x11e   : > { %1531 = vmatpush1.bf16.msra.mxu0 %v5829_v9  ;;  %v563_v9 = vunpack.c.h.bf16 %v554_v6 }
 0x11f   : > { %1532 = vmatprep.subr.bf16.mxu0 %v5833_v10  ;;  %v566_v10 = vunpack.c.l.bf16 %v556_v7  ;;  %v4137_v7 = vld [vmem:[%s5770_s24 + $0x60] sm:$0xff] }
 0x120   : > { %1574 = vmatpush1.bf16.msra.mxu1 %v5850_v16 }
 0x121   : > { %3580 = vperm.xlu1 %4712, %v3575_v5   ;;  %1575 = vmatprep.subr.bf16.mxu1 %v5853_v17 }
 0x122   : > { %1533 = vmatpush1.bf16.msra.mxu0 %v5842_v13  ;;  %v555_v13 = vld [vmem:[%s5760_s21 + $0x8] sm:$0xff] }
 0x123   : > { %1534 = vmatprep.subr.bf16.mxu0 %v5844_v14 }
 0x124   : > { %1576 = vmatpush1.bf16.msra.mxu1 %v5862_v20 }
 0x125   : > { %1577 = vmatprep.subr.bf16.mxu1 %v5865_v21 }
 0x126   : > { %1535 = vmatpush1.bf16.msra.mxu0 %v5856_v18  ;;  %v557_v18 = vld [vmem:[%s5760_s21 + $0x18] sm:$0xff] }
 0x127   : > { %1536 = vmatprep.subr.bf16.mxu0 %v5859_v19 }
 0x128   : > { %1578 = vmatpush1.bf16.msra.mxu1 %v5874_v24 }
 0x129   : > { %1579 = vmatprep.subr.bf16.mxu1 %v5877_v25 }
 0x12a   : > { %1537 = vmatpush1.bf16.msra.mxu0 %v5868_v22  ;;  %v564_v22 = vunpack.c.l.bf16 %v555_v13 }
 0x12b   : > { %1538 = vmatprep.subr.bf16.mxu0 %v5871_v23 }
 0x12c   : > { %1580 = vmatpush1.bf16.msra.mxu1 %v5886_v28 }
 0x12d   : > { %1581 = vmatprep.subr.bf16.mxu1 %v5891_v30 }
 0x12e   : > { %1539 = vmatpush1.bf16.msra.mxu0 %v5879_v26 }
 0x12f   : > { %1540 = vmatprep.subr.bf16.mxu0 %v5882_v27  ;;  %v568_v27 = vunpack.c.l.bf16 %v557_v18 }
 0x130   : > { %1582 = vmatpush1.bf16.msra.mxu1 %v5902_v34 }
 0x131   : > { %1583 = vmatprep.subr.bf16.mxu1 %v5905_v35  ;;  %v569_v35 = vunpack.c.h.bf16 %v557_v18 }
 0x132   : > { %1541 = vmatpush1.bf16.msra.mxu0 %v5888_v29  ;;  %v565_v29 = vunpack.c.h.bf16 %v555_v13 }
 0x133   : > { %1907 = vmatprep.subr.bf16.mxu0 %v5899_v33 }
 0x134   : > { %1584 = vmatpush1.bf16.msra.mxu1 %v5916_v39 }
 0x135   : > { %1950 = vmatprep.subr.bf16.mxu1 %v5919_v40 }
 0x167   : > { %v6111_v6 = vpop.permute.xlu0 %911 }
 0x168   : > { %vm916_vm0 = vcmp.eq.s32.totalorder %v6111_v6, 1 }
 0x1c8   : > { %v797_v11 = vpop.f32.mrb[0].mxu0 }
 0x1c9   : > { %v849_v14 = vadd.f32 %v797_v11, %v562_v8  ;;  %v799_v15 = vpop.f32.mrb[1].mxu0 }
 0x1ca   : > { %v850_v16 = vadd.f32 %v799_v15, %v563_v9  ;;  %v801_v17 = vpop.f32.mrb[2].mxu0  ;;  %v840_v26 = vpop.f32.mrb[0].mxu1  ;;  %v560_v9 = vld [vmem:[#allocation3] sm:$0xff]  ;;  %v561_v15 = vld [vmem:[#allocation3 + $0x8] sm:$0xff] }
 0x1cb   : > { %v4130_v19 = vmul.f32 -1.442695, %v849_v14  ;;  %v853_v20 = vadd.f32 %v801_v17, %v566_v10  ;;  %v803_v21 = vpop.f32.mrb[3].mxu0  ;;  %v842_v30 = vpop.f32.mrb[1].mxu1  ;;  %v851_v33 = vadd.f32 %v840_v26, %v564_v22 }
 0x1cc   : > { %v4131_v23 = vmul.f32 -1.442695, %v850_v16  ;;  %v854_v24 = vadd.f32 %v803_v21, %v567_v12  ;;  %v844_v34 = vpop.f32.mrb[2].mxu1  ;;  %v852_v45 = vadd.f32 %v842_v30, %v565_v29  ;;  %v4139_v12 = vld [vmem:[%s5770_s24 + $0x70] sm:$0xff]  ;;  %v944_v16 = vunpack.c.l.bf16 %v4137_v7  ;;  %v4140_v30 = vld [vmem:[%s5770_s24 + $0x78] sm:$0xff] }
 0x1cd   : > { %4905 = vpow2.f32 %v4130_v19  ;;  %v4133_v25 = vmul.f32 -1.442695, %v853_v20  ;;  %v846_v39 = vpop.f32.mrb[3].mxu1  ;;  %v855_v40 = vadd.f32 %v844_v34, %v568_v27  ;;  %v4132_v52 = vmul.f32 -1.442695, %v851_v33  ;;  %v4138_v20 = vld [vmem:[%s5770_s24 + $0x68] sm:$0xff]  ;;  %v915_v27 = vpop.permute.xlu0 %914 }
 0x1ce   : > { %4907 = vpow2.f32 %v4131_v23  ;;  %v4134_v28 = vmul.f32 -1.442695, %v854_v24  ;;  %v856_v54 = vadd.f32 %v846_v39, %v569_v35  ;;  %v945_v19 = vunpack.c.h.bf16 %v4137_v7 }
 0x1cf   : > { %4909 = vpow2.f32 %v4133_v25  ;;  %v4135_v55 = vmul.f32 -1.442695, %v855_v40  ;;  %v948_v24 = vunpack.c.l.bf16 %v4139_v12  ;;  %v949_v29 = vunpack.c.h.bf16 %v4139_v12 }
 0x1d0   : > { %4911 = vpow2.f32 %v4134_v28  ;;  %vm917_vm1 = vcmp.eq.s32.totalorder %v915_v27, 1  ;;  %v946_v35 = vunpack.c.l.bf16 %v4138_v20 }
 0x1d1   : > { %4913 = vtanh.f32 %v852_v45 }
 0x1d2   : > { %4915 = vpow2.f32 %v4132_v52 }
 0x1d3   : > { %4917 = vtanh.f32 %v856_v54 }
 0x1d4   : > { %4919 = vpow2.f32 %v4135_v55 }
 0x1d7   : > { %v4906_v56 = vpop.eup %4905 }
 0x1d8   : > { %v4908_v60 = vpop.eup %4907  ;;  %v875_v61 = vadd.f32 1.0, %v4906_v56 }
 0x1d9   : > { %v4910_v49 = vpop.eup %4909  ;;  %v876_v59 = vadd.f32 1.0, %v4908_v60  ;;  %v950_v60 = vunpack.c.l.bf16 %v4140_v30 }
 0x1da   : > { %v4912_v36 = vpop.eup %4911  ;;  %4921 = vrcp.f32 %v875_v61  ;;  %v878_v51 = vadd.f32 1.0, %v4910_v49 }
 0x1db   : > { %4923 = vrcp.f32 %v876_v59  ;;  %v879_v1 = vadd.f32 1.0, %v4912_v36  ;;  %v4914_v2 = vpop.eup %4913 }
 0x1dc   : > { %4925 = vrcp.f32 %v878_v51  ;;  %v4916_v4 = vpop.eup %4915 }
 0x1dd   : > { %4927 = vrcp.f32 %v879_v1  ;;  %v4918_v5 = vpop.eup %4917  ;;  %v877_v11 = vadd.f32 1.0, %v4916_v4  ;;  %v947_v1 = vunpack.c.h.bf16 %v4138_v20 }
 0x1de   : > { %v4920_v8 = vpop.eup %4919 }
 0x1df   : > { %v880_v22 = vadd.f32 1.0, %v4920_v8  ;;  %4929 = vrcp.f32 %v877_v11  ;;  %v951_v8 = vunpack.c.h.bf16 %v4140_v30 }
 0x1e4   : > { %v4922_v10 = vpop.eup %4921 }
 0x1e5   : > { %v4924_v13 = vpop.eup %4923  ;;  %v897_v14 = vmul.f32 %v4922_v10, %v4914_v2 }
 0x1e6   : > { %v4926_v17 = vpop.eup %4925  ;;  %v895_v18 = vmul.f32 %v4924_v13, %v560_v9 }
 0x1e7   : > { %v4928_v21 = vpop.eup %4927  ;;  %v898_v23 = vmul.f32 %v4926_v17, %v4918_v5 }
 0x1e8   : > { %v899_v25 = vadd.f32 %v897_v14, %v895_v18  ;;  %v896_v26 = vmul.f32 %v4928_v21, %v561_v15  ;;  %v1179_v28 = vpop.f32.mrb[4].mxu0 }
 0x1e9   : > { %v1231_v33 = vadd.f32 %v1179_v28, %v944_v16  ;;  %v1181_v34 = vpop.f32.mrb[5].mxu0  ;;  %v4930_v12 = vpop.eup %4929 }
 0x1ea   : > { %4931 = vtanh.f32 %v899_v25  ;;  %v6120_v39 = vsel %vm916_vm0, %v899_v25, %v560_v9  ;;  %v900_v40 = vadd.f32 %v898_v23, %v896_v26  ;;  %v1232_v45 = vadd.f32 %v1181_v34, %v945_v19  ;;  %v1183_v52 = vpop.f32.mrb[6].mxu0  ;;  %v1222_v51 = vpop.f32.mrb[4].mxu1 }
 0x1eb   : > { %4933 = vrcp.f32 %v880_v22  ;;  %v4173_v54 = vmul.f32 -1.442695, %v1231_v33  ;;  %v1235_v55 = vadd.f32 %v1183_v52, %v948_v24  ;;  %v1185_v56 = vpop.f32.mrb[7].mxu0  ;;  %v1233_v4 = vadd.f32 %v1222_v51, %v946_v35  ;;  %v1224_v5 = vpop.f32.mrb[5].mxu1 }
 0x1ec   : > { %4935 = vtanh.f32 %v900_v40  ;;  %v6123_v61 = vsel %vm917_vm1, %v900_v40, %v561_v15  ;;  %v4174_v49 = vmul.f32 -1.442695, %v1232_v45  ;;  %v1236_v59 = vadd.f32 %v1185_v56, %v949_v29  ;;  %v1226_v7 = vpop.f32.mrb[6].mxu1  ;;  %v1294_v45 = vpop.permute.xlu1 %1293  ;;  %v6938_v56 = vld [vmem:[#allocation63_spill] sm:$0xff] }
 0x1ed   : > { %4937 = vpow2.f32 %v4173_v54  ;;  %v4176_v36 = vmul.f32 -1.442695, %v1235_v55  ;;  %v1237_v9 = vadd.f32 %v1226_v7, %v950_v60  ;;  %v1228_v10 = vpop.f32.mrb[7].mxu1  ;;  %v1234_v11 = vadd.f32 %v1224_v5, %v947_v1  ;;  %v943_v54 = vld [vmem:[#allocation5 + $0x8] sm:$0xff]  ;;  %v6937_v55 = vld [vmem:[#allocation59_spill] sm:$0xff] }
 0x1ee   : > { %4939 = vpow2.f32 %v4174_v49  ;;  %v4177_v2 = vmul.f32 -1.442695, %v1236_v59  ;;  %v4175_v13 = vmul.f32 -1.442695, %v1233_v4  ;;  %v1238_v14 = vadd.f32 %v1228_v10, %v951_v8  ;;  %v6939_v49 = vld [vmem:[#allocation60_spill] sm:$0xff]  ;;  %v6942_v4 = vld [vmem:[#allocation67_spill] sm:$0xff] }
 0x1ef   : > { %4941 = vpow2.f32 %v4176_v36  ;;  %v4178_v16 = vmul.f32 -1.442695, %v1237_v9  ;;  %vm1298_vm2 = vcmp.eq.s32.totalorder %v1294_v45, 1  ;;  %v6943_v8 = vld [vmem:[#allocation62_spill] sm:$0xff]  ;;  %v6944_v9 = vld [vmem:[#allocation68_spill] sm:$0xff] }
 0x1f0   : > { %4943 = vpow2.f32 %v4177_v2  ;;  %v1297_v1 = vpop.permute.xlu1 %1296  ;;  %v6941_v2 = vld [vmem:[#allocation61_spill] sm:$0xff] }
 0x1f1   : > { %4945 = vtanh.f32 %v1234_v11  ;;  %vm1299_vm3 = vcmp.eq.s32.totalorder %v1297_v1, 1  ;;  %v6945_v11 = vld [vmem:[#allocation65_spill] sm:$0xff] }
 0x1f2   : > { %4947 = vpow2.f32 %v4175_v13  ;;  %v6947_v13 = vld [vmem:[#allocation71_spill] sm:$0xff] }
 0x1f3   : > { %4949 = vtanh.f32 %v1238_v14  ;;  %v6948_v14 = vld [vmem:[#allocation69_spill] sm:$0xff] }
 0x1f4   : > { %v4932_v15 = vpop.eup %4931  ;;  %4951 = vpow2.f32 %v4178_v16  ;;  %v6949_v16 = vld [vmem:[#allocation70_spill] sm:$0xff]  ;;  %v6235_v45 = vld [vmem:[#allocation11 + $0x60] ss:$16 sps:$4 sm:$0xff]   ;;  %v6291_v1 = vld [vmem:[#allocation12 + $0x4] ss:$16 sps:$4 sm:$0xff]  }
 0x1f5   : > { %v4934_v17 = vpop.eup %4933  ;;  %v903_v18 = vmul.f32 %v4932_v15, %v4930_v12  ;;  %v6946_v12 = vld [vmem:[#allocation66_spill] sm:$0xff]  ;;  %6957 = vst [vmem:[#allocation61_spill] sm:$0xff] %v6291_v1 }
 0x1f6   : > { %v4936_v19 = vpop.eup %4935 }
 0x1f7   : > { %v4938_v20 = vpop.eup %4937  ;;  %v928_v21 = vsel %vm916_vm0, %v903_v18, 0.0  ;;  %v904_v22 = vmul.f32 %v4936_v19, %v4934_v17  ;;  %v6131_v26 = vsel %vm916_vm0, %v903_v18, %v5893_v31 }
 0x1f8   : > { %v4940_v23 = vpop.eup %4939  ;;  %930 = vst [vmem:[%s5798_s25] sm:$0xff] %v928_v21  ;;  %v1257_v24 = vadd.f32 1.0, %v4938_v20  ;;  %v6950_v20 = vld [vmem:[#allocation72_spill] sm:$0xff]  ;;  %v6951_v21 = vld [vmem:[#allocation73_spill] sm:$0xff] }
 0x1f9   : > { %v4942_v25 = vpop.eup %4941  ;;  %v6135_v28 = vsel %vm917_vm1, %v904_v22, %v5896_v32  ;;  %v929_v29 = vsel %vm917_vm1, %v904_v22, 0.0  ;;  %v1258_v30 = vadd.f32 1.0, %v4940_v23  ;;  %v6952_v23 = vld [vmem:[#allocation74_spill] sm:$0xff] }
 0x1fa   : > { %v4944_v33 = vpop.eup %4943  ;;  %931 = vst [vmem:[%s5798_s25 + $0x8] sm:$0xff] %v929_v29  ;;  %4953 = vrcp.f32 %v1257_v24  ;;  %v1260_v34 = vadd.f32 1.0, %v4942_v25  ;;  %v1333_v35 = vpack.c.bf16 %v6135_v28, %v6131_v26  ;;  %v6199_v29 = vld [vmem:[#allocation11] ss:$16 sps:$4 sm:$0xff]  }
 0x1fb   : > { %4955 = vrcp.f32 %v1258_v30  ;;  %v1261_v40 = vadd.f32 1.0, %v4944_v33  ;;  %v4946_v31 = vpop.eup %4945  ;;  %v6201_v30 = vld [vmem:[#allocation11 + $0x8] ss:$16 sps:$4 sm:$0xff]   ;;  %v6211_v33 = vld [vmem:[#allocation11 + $0x20] ss:$16 sps:$4 sm:$0xff]  }
 0x1fc   : > { %4957 = vrcp.f32 %v1260_v34  ;;  %1559 = vmatmul.mubr.bf16.vlgmr.msra.gmra.mrb[8].mxu0 %v1333_v35  ;;  %1602 = vmatmul.mubr.bf16.vlgmr.msra.gmra.mrb[8].mxu1 %v1333_v35  ;;  %v4948_v32 = vpop.eup %4947  ;;  %v6213_v34 = vld [vmem:[#allocation11 + $0x28] ss:$16 sps:$4 sm:$0xff]   ;;  %v6219_v35 = vld [vmem:[#allocation11 + $0x44] ss:$16 sps:$4 sm:$0xff]  }
 0x1fd   : > { %4959 = vrcp.f32 %v1261_v40  ;;  %1908 = vmatpush1.bf16.msra.mxu0 %v5910_v37  ;;  %1951 = vmatpush1.bf16.msra.mxu1 %v5929_v43  ;;  %v4950_v6 = vpop.eup %4949  ;;  %v942_v37 = vld [vmem:[#allocation5] sm:$0xff]  ;;  %v1259_v43 = vadd.f32 1.0, %v4948_v32  ;;  %v6221_v40 = vld [vmem:[#allocation11 + $0x4c] ss:$16 sps:$4 sm:$0xff]   ;;  %v6225_v32 = vld [vmem:[#allocation11 + $0x48] ss:$16 sps:$4 sm:$0xff]  }
 0x1fe   : > { %1909 = vmatprep.subr.bf16.mxu0 %v5913_v38  ;;  %1952 = vmatprep.subr.bf16.mxu1 %v5932_v44  ;;  %v4952_v27 = vpop.eup %4951 }
 0x1ff   : > { %1939 = vmatprep.mubr.bf16.mxu0 %v6842_v3  ;;  %1982 = vmatprep.mubr.bf16.mxu1 %v6842_v3  ;;  %4961 = vrcp.f32 %v1259_v43  ;;  %v6245_v43 = vld [vmem:[#allocation11 + $0x8c] ss:$16 sps:$4 sm:$0xff]  }
 0x201   : > { %1910 = vmatpush1.bf16.msra.mxu0 %v5922_v41  ;;  %1953 = vmatpush1.bf16.msra.mxu1 %v5945_v47  ;;  %v6940_v47 = vld [vmem:[#allocation64_spill] sm:$0xff] }
 0x202   : > { %1911 = vmatprep.subr.bf16.mxu0 %v5926_v42  ;;  %1954 = vmatprep.subr.bf16.mxu1 %v5948_v48  ;;  %v1262_v42 = vadd.f32 1.0, %v4952_v27  ;;  %v6233_v27 = vld [vmem:[#allocation11 + $0x6c] ss:$16 sps:$4 sm:$0xff]  }
 0x204   : > { %v4954_v38 = vpop.eup %4953 }
 0x205   : > { %v4956_v44 = vpop.eup %4955  ;;  %v1279_v52 = vmul.f32 %v4954_v38, %v4946_v31  ;;  %1912 = vmatpush1.bf16.msra.mxu0 %v6937_v55  ;;  %1955 = vmatpush1.bf16.msra.mxu1 %v6938_v56  ;;  %v6223_v31 = vld [vmem:[#allocation11 + $0x40] ss:$16 sps:$4 sm:$0xff]   ;;  %v6243_v38 = vld [vmem:[#allocation11 + $0x84] ss:$16 sps:$4 sm:$0xff]   ;;  %v6257_v55 = vld [vmem:[#allocation11 + $0xac] ss:$16 sps:$4 sm:$0xff]  }
 0x206   : > { %v4958_v60 = vpop.eup %4957  ;;  %v1277_v41 = vmul.f32 %v4956_v44, %v942_v37  ;;  %1913 = vmatprep.subr.bf16.mxu0 %v6939_v49  ;;  %1956 = vmatprep.subr.bf16.mxu1 %v6940_v47  ;;  %v6247_v44 = vld [vmem:[#allocation11 + $0x80] ss:$16 sps:$4 sm:$0xff]   ;;  %v6269_v49 = vld [vmem:[#allocation11 + $0xcc] ss:$16 sps:$4 sm:$0xff]  }
 0x207   : > { %v4960_v59 = vpop.eup %4959  ;;  %v1280_v48 = vmul.f32 %v4958_v60, %v4950_v6  ;;  %v6231_v6 = vld [vmem:[#allocation11 + $0x64] ss:$16 sps:$4 sm:$0xff]   ;;  %v6259_v56 = vld [vmem:[#allocation11 + $0xa0] ss:$16 sps:$4 sm:$0xff]   ;;  %v6261_v60 = vld [vmem:[#allocation11 + $0xa8] ss:$16 sps:$4 sm:$0xff]  }
 0x208   : > { %v1281_v36 = vadd.f32 %v1279_v52, %v1277_v41  ;;  %v1278_v51 = vmul.f32 %v4960_v59, %v943_v54  ;;  %v6249_v52 = vld [vmem:[#allocation11 + $0x88] ss:$16 sps:$4 sm:$0xff]   ;;  %v6267_v41 = vld [vmem:[#allocation11 + $0xc4] ss:$16 sps:$4 sm:$0xff]   ;;  %v6271_v47 = vld [vmem:[#allocation11 + $0xc0] ss:$16 sps:$4 sm:$0xff]  }
 0x209   : > { %1914 = vmatpush1.bf16.msra.mxu0 %v6941_v2  ;;  %1957 = vmatpush1.bf16.msra.mxu1 %v6942_v4  ;;  %v4962_v15 = vpop.eup %4961  ;;  %v6273_v59 = vld [vmem:[#allocation11 + $0xc8] ss:$16 sps:$4 sm:$0xff]   ;;  %v6293_v2 = vld [vmem:[#allocation12 + $0xc] ss:$16 sps:$4 sm:$0xff]   ;;  %v4181_v4 = vld [vmem:[%s5760_s21 + $0x20] sm:$0xff] }
 0x20a   : > { %4963 = vtanh.f32 %v1281_v36  ;;  %v6158_v5 = vsel %vm1298_vm2, %v1281_v36, %v942_v37  ;;  %v1282_v7 = vadd.f32 %v1280_v48, %v1278_v51  ;;  %1915 = vmatprep.subr.bf16.mxu0 %v6943_v8  ;;  %1958 = vmatprep.subr.bf16.mxu1 %v6944_v9  ;;  %v6238_v37 = vld [vmem:[#allocation11 + $0x68] ss:$16 sps:$4 sm:$0xff]   ;;  %v6281_v48 = vld [vmem:[#allocation11 + $0xec] ss:$16 sps:$4 sm:$0xff]   ;;  %v6283_v36 = vld [vmem:[#allocation11 + $0xe0] ss:$16 sps:$4 sm:$0xff]   ;;  %v1325_v8 = vunpack.c.l.bf16 %v4181_v4 }
 0x20b   : > { %4965 = vrcp.f32 %v1262_v42  ;;  %v6279_v42 = vld [vmem:[#allocation11 + $0xe4] ss:$16 sps:$4 sm:$0xff]   ;;  %6954 = vst [vmem:[#allocation63_spill] sm:$0xff] %v6281_v48  ;;  %6955 = vst [vmem:[#allocation60_spill] sm:$0xff] %v6283_v36  ;;  %v6285_v51 = vld [vmem:[#allocation11 + $0xe8] ss:$16 sps:$4 sm:$0xff]   ;;  %v1326_v9 = vunpack.c.h.bf16 %v4181_v4 }
 0x20c   : > { %4967 = vtanh.f32 %v1282_v7  ;;  %v6163_v10 = vsel %vm1299_vm3, %v1282_v7, %v943_v54  ;;  %v6255_v54 = vld [vmem:[#allocation11 + $0xa4] ss:$16 sps:$4 sm:$0xff]   ;;  %6953 = vst [vmem:[#allocation59_spill] sm:$0xff] %v6279_v42  ;;  %6956 = vst [vmem:[#allocation64_spill] sm:$0xff] %v6285_v51 }
 0x20d   : > { %1916 = vmatpush1.bf16.msra.mxu0 %v6945_v11  ;;  %1959 = vmatpush1.bf16.msra.mxu1 %v5999_v50  ;;  %6958 = vst [vmem:[#allocation67_spill] sm:$0xff] %v6293_v2  ;;  %v4183_v7 = vld [vmem:[%s5760_s21 + $0x30] sm:$0xff] }
 0x20e   : > { %1917 = vmatprep.subr.bf16.mxu0 %v6946_v12  ;;  %1960 = vmatprep.subr.bf16.mxu1 %v6947_v13  ;;  %v1329_v11 = vunpack.c.l.bf16 %v4183_v7 }
 0x211   : > { %1918 = vmatpush1.bf16.msra.mxu0 %v6948_v14  ;;  %1961 = vmatpush1.bf16.msra.mxu1 %v6016_v63  ;;  %v1330_v14 = vunpack.c.h.bf16 %v4183_v7 }
 0x212   : > { %1919 = vmatprep.subr.bf16.mxu0 %v6949_v16  ;;  %1962 = vmatprep.subr.bf16.mxu1 %v6020_v57  ;;  %v4182_v16 = vld [vmem:[%s5760_s21 + $0x28] sm:$0xff] }
 0x213   : > { %v1328_v7 = vunpack.c.h.bf16 %v4182_v16 }
 0x214   : > { %v4964_v17 = vpop.eup %4963 }
 0x215   : > { %v4966_v18 = vpop.eup %4965  ;;  %v1285_v19 = vmul.f32 %v4964_v17, %v4962_v15  ;;  %1920 = vmatpush1.bf16.msra.mxu0 %v6950_v20  ;;  %1963 = vmatpush1.bf16.msra.mxu1 %v6035_v53  ;;  %v6197_v53 = vld [vmem:[#allocation11 + $0xc] ss:$16 sps:$4 sm:$0xff]  }
 0x216   : > { %v4968_v50 = vpop.eup %4967  ;;  %1921 = vmatprep.subr.bf16.mxu0 %v6951_v21  ;;  %1964 = vmatprep.subr.bf16.mxu1 %v6039_v0 }
 0x217   : > { %v1310_v63 = vsel %vm1298_vm2, %v1285_v19, 0.0  ;;  %v1286_v22 = vmul.f32 %v4968_v50, %v4966_v18  ;;  %v6181_v57 = vsel %vm1298_vm2, %v1285_v19, %v6029_v58  ;;  %v6195_v58 = vld [vmem:[#allocation11 + $0x4] ss:$16 sps:$4 sm:$0xff]   ;;  %v4184_v50 = vld [vmem:[%s5760_s21 + $0x38] sm:$0xff] }
 0x218   : > { %4179 = vst [vmem:[%s5800_s15 + $0x30] sm:$0xff] %v1310_v63 }
 0x219   : > { %v6185_v24 = vsel %vm1299_vm3, %v1286_v22, %v6952_v23  ;;  %v1311_v25 = vsel %vm1299_vm3, %v1286_v22, 0.0  ;;  %1922 = vmatpush1.bf16.msra.mxu0 %v6027_v62  ;;  %1965 = vmatpush1.bf16.msra.mxu1 %v6050_v46  ;;  %v6207_v46 = vld [vmem:[#allocation11 + $0x24] ss:$16 sps:$4 sm:$0xff]   ;;  %v6209_v62 = vld [vmem:[#allocation11 + $0x2c] ss:$16 sps:$4 sm:$0xff]  }
 0x21a   : > { %4180 = vst [vmem:[%s5800_s15 + $0x38] sm:$0xff] %v1311_v25  ;;  %v1714_v0 = vpack.c.bf16 %v6185_v24, %v6181_v57  ;;  %2288 = vmatprep.subr.bf16.mxu0 %v6195_v58  ;;  %2331 = vmatprep.subr.bf16.mxu1 %v6197_v53 }
 0x21c   : > { %1940 = vmatmul.mubr.bf16.vlgmr.msra.gmra.mrb[12].mxu0 %v1714_v0  ;;  %1983 = vmatmul.mubr.bf16.vlgmr.msra.gmra.mrb[12].mxu1 %v1714_v0  ;;  %v1327_v0 = vunpack.c.l.bf16 %v4182_v16 }
 0x21d   : > { %2320 = vmatprep.mubr.bf16.mxu0 %v6842_v3  ;;  %2363 = vmatprep.mubr.bf16.mxu1 %v6842_v3 }
 0x21e   : > { %2289 = vmatpush1.bf16.msra.mxu0 %v6199_v29  ;;  %2332 = vmatpush1.bf16.msra.mxu1 %v6201_v30 }
 0x21f   : > { %2290 = vmatprep.subr.bf16.mxu0 %v6207_v46  ;;  %2333 = vmatprep.subr.bf16.mxu1 %v6209_v62 }
 0x222   : > { %2291 = vmatpush1.bf16.msra.mxu0 %v6211_v33  ;;  %2334 = vmatpush1.bf16.msra.mxu1 %v6213_v34 }
 0x223   : > { %2292 = vmatprep.subr.bf16.mxu0 %v6219_v35  ;;  %2335 = vmatprep.subr.bf16.mxu1 %v6221_v40 }
 0x226   : > { %2293 = vmatpush1.bf16.msra.mxu0 %v6223_v31  ;;  %2336 = vmatpush1.bf16.msra.mxu1 %v6225_v32 }
 0x227   : > { %2294 = vmatprep.subr.bf16.mxu0 %v6231_v6  ;;  %2337 = vmatprep.subr.bf16.mxu1 %v6233_v27 }
 0x22a   : > { %2295 = vmatpush1.bf16.msra.mxu0 %v6235_v45  ;;  %2338 = vmatpush1.bf16.msra.mxu1 %v6238_v37 }
 0x22b   : > { %2296 = vmatprep.subr.bf16.mxu0 %v6243_v38  ;;  %2339 = vmatprep.subr.bf16.mxu1 %v6245_v43 }
 0x22e   : > { %2297 = vmatpush1.bf16.msra.mxu0 %v6247_v44  ;;  %2340 = vmatpush1.bf16.msra.mxu1 %v6249_v52 }
 0x22f   : > { %2298 = vmatprep.subr.bf16.mxu0 %v6255_v54  ;;  %2341 = vmatprep.subr.bf16.mxu1 %v6257_v55 }
 0x232   : > { %2299 = vmatpush1.bf16.msra.mxu0 %v6259_v56  ;;  %2342 = vmatpush1.bf16.msra.mxu1 %v6261_v60 }
 0x233   : > { %2300 = vmatprep.subr.bf16.mxu0 %v6267_v41  ;;  %2343 = vmatprep.subr.bf16.mxu1 %v6269_v49 }
 0x236   : > { %2301 = vmatpush1.bf16.msra.mxu0 %v6271_v47  ;;  %2344 = vmatpush1.bf16.msra.mxu1 %v6273_v59 }
 0x237   : > { %2302 = vmatprep.subr.bf16.mxu0 %v6279_v42  ;;  %2345 = vmatprep.subr.bf16.mxu1 %v6281_v48 }
 0x23a   : > { %2303 = vmatpush1.bf16.msra.mxu0 %v6283_v36  ;;  %2346 = vmatpush1.bf16.msra.mxu1 %v6285_v51 }
 0x23b   : > { %2669 = vmatprep.subr.bf16.mxu0 %v6291_v1  ;;  %2712 = vmatprep.subr.bf16.mxu1 %v6293_v2  ;;  %v1331_v1 = vunpack.c.l.bf16 %v4184_v50 }
 0x2cf   : > { %v1560_v12 = vpop.f32.mrb[8].mxu0  ;;  %v1603_v13 = vpop.f32.mrb[8].mxu1 }
 0x2d0   : > { %v1612_v15 = vadd.f32 %v1560_v12, %v1325_v8  ;;  %v1562_v17 = vpop.f32.mrb[9].mxu0  ;;  %v1605_v18 = vpop.f32.mrb[9].mxu1  ;;  %v1614_v8 = vadd.f32 %v1603_v13, %v1327_v0 }
 0x2d1   : > { %v1613_v19 = vadd.f32 %v1562_v17, %v1326_v9  ;;  %v1564_v20 = vpop.f32.mrb[10].mxu0  ;;  %v1607_v21 = vpop.f32.mrb[10].mxu1  ;;  %v1615_v9 = vadd.f32 %v1605_v18, %v1328_v7  ;;  %v1332_v17 = vunpack.c.h.bf16 %v4184_v50  ;;  %v4225_v18 = vld [vmem:[%s5770_s24 + $0x40] sm:$0xff] }
 0x2d2   : > { %v4217_v63 = vmul.f32 -1.442695, %v1612_v15  ;;  %v1616_v22 = vadd.f32 %v1564_v20, %v1329_v11  ;;  %v1566_v23 = vpop.f32.mrb[11].mxu0  ;;  %v1609_v25 = vpop.f32.mrb[11].mxu1  ;;  %v1618_v12 = vadd.f32 %v1607_v21, %v1331_v1  ;;  %v4219_v36 = vmul.f32 -1.442695, %v1614_v8 }
 0x2d3   : > { %v4218_v3 = vmul.f32 -1.442695, %v1613_v19  ;;  %v1617_v2 = vadd.f32 %v1566_v23, %v1330_v14  ;;  %v1619_v20 = vadd.f32 %v1609_v25, %v1332_v17  ;;  %v4227_v23 = vld [vmem:[%s5770_s24 + $0x50] sm:$0xff]  ;;  %v1707_v0 = vunpack.c.h.bf16 %v4225_v18  ;;  %v6303_v7 = vpop.permute.xlu0 %1674 }
 0x2d4   : > { %4969 = vpow2.f32 %v4217_v63  ;;  %v4220_v4 = vmul.f32 -1.442695, %v1616_v22  ;;  %v4222_v15 = vmul.f32 -1.442695, %v1618_v12  ;;  %v1706_v22 = vunpack.c.l.bf16 %v4225_v18 }
 0x2d5   : > { %v4221_v51 = vmul.f32 -1.442695, %v1617_v2  ;;  %4971 = vpow2.f32 %v4218_v3  ;;  %vm1679_vm4 = vcmp.eq.s32.totalorder %v6303_v7, 1  ;;  %v6339_v7 = vld [vmem:[#allocation12 + $0x24] ss:$16 sps:$4 sm:$0xff]  }
 0x2d6   : > { %4973 = vpow2.f32 %v4220_v4 }
 0x2d7   : > { %4975 = vpow2.f32 %v4221_v51 }
 0x2d8   : > { %4977 = vtanh.f32 %v1615_v9 }
 0x2d9   : > { %4979 = vpow2.f32 %v4219_v36 }
 0x2da   : > { %4981 = vpow2.f32 %v4222_v15  ;;  %v4226_v15 = vld [vmem:[%s5770_s24 + $0x48] sm:$0xff] }
 0x2de   : > { %v4970_v11 = vpop.eup %4969 }
 0x2df   : > { %v1638_v48 = vadd.f32 1.0, %v4970_v11  ;;  %v4972_v14 = vpop.eup %4971 }
 0x2e0   : > { %v4974_v19 = vpop.eup %4973  ;;  %v1639_v3 = vadd.f32 1.0, %v4972_v14 }
 0x2e1   : > { %4983 = vrcp.f32 %v1638_v48  ;;  %v1641_v2 = vadd.f32 1.0, %v4974_v19  ;;  %v4976_v1 = vpop.eup %4975 }
 0x2e2   : > { %4985 = vtanh.f32 %v1619_v20  ;;  %v1642_v51 = vadd.f32 1.0, %v4976_v1  ;;  %v4978_v13 = vpop.eup %4977  ;;  %v1710_v20 = vunpack.c.l.bf16 %v4227_v23 }
 0x2e3   : > { %4987 = vrcp.f32 %v1639_v3  ;;  %v4980_v16 = vpop.eup %4979 }
 0x2e4   : > { %4989 = vrcp.f32 %v1641_v2  ;;  %v4982_v50 = vpop.eup %4981  ;;  %v1640_v25 = vadd.f32 1.0, %v4980_v16 }
 0x2e5   : > { %4991 = vrcp.f32 %v1642_v51  ;;  %v1643_v12 = vadd.f32 1.0, %v4982_v50  ;;  %v1711_v51 = vunpack.c.h.bf16 %v4227_v23  ;;  %v4228_v50 = vld [vmem:[%s5770_s24 + $0x58] sm:$0xff]  ;;  %v1678_v23 = vpop.permute.xlu1 %1677 }
 0x2e6   : > { %4993 = vrcp.f32 %v1640_v25  ;;  %vm1680_vm5 = vcmp.eq.s32.totalorder %v1678_v23, 1  ;;  %v6345_v23 = vld [vmem:[#allocation12 + $0x20] ss:$16 sps:$4 sm:$0xff]  }
 0x2eb   : > { %v4984_v21 = vpop.eup %4983 }
 0x2ec   : > { %v4986_v36 = vpop.eup %4985  ;;  %v1660_v63 = vmul.f32 %v4984_v21, %v4978_v13 }
 0x2ed   : > { %v4988_v48 = vpop.eup %4987 }
 0x2ee   : > { %v4990_v4 = vpop.eup %4989  ;;  %v1658_v8 = vmul.f32 %v4988_v48, %v6120_v39 }
 0x2ef   : > { %v1661_v9 = vmul.f32 %v4990_v4, %v4986_v36  ;;  %v1941_v17 = vpop.f32.mrb[12].mxu0  ;;  %v1984_v11 = vpop.f32.mrb[12].mxu1 }
 0x2f0   : > { %v4992_v14 = vpop.eup %4991  ;;  %v1662_v19 = vadd.f32 %v1660_v63, %v1658_v8  ;;  %v1993_v3 = vadd.f32 %v1941_v17, %v1706_v22  ;;  %v1943_v2 = vpop.f32.mrb[13].mxu0  ;;  %v1708_v22 = vunpack.c.l.bf16 %v4226_v15 }
 0x2f1   : > { %v1986_v1 = vpop.f32.mrb[13].mxu1  ;;  %v1659_v13 = vmul.f32 %v4992_v14, %v6123_v61  ;;  %v1994_v16 = vadd.f32 %v1943_v2, %v1707_v0  ;;  %v1945_v18 = vpop.f32.mrb[14].mxu0  ;;  %v1712_v0 = vunpack.c.l.bf16 %v4228_v50 }
 0x2f2   : > { %v1988_v21 = vpop.f32.mrb[14].mxu1  ;;  %4995 = vtanh.f32 %v1662_v19  ;;  %v6313_v36 = vsel %vm1679_vm4, %v1662_v19, %v6120_v39  ;;  %v4261_v63 = vmul.f32 -1.442695, %v1993_v3  ;;  %v1947_v48 = vpop.f32.mrb[15].mxu0  ;;  %v1997_v17 = vadd.f32 %v1945_v18, %v1710_v20 }
 0x2f3   : > { %6959 = vst [vmem:[#allocation62_spill] sm:$0xff] %v6313_v36  ;;  %v1990_v4 = vpop.f32.mrb[15].mxu1  ;;  %4997 = vrcp.f32 %v1643_v12  ;;  %v1663_v8 = vadd.f32 %v1661_v9, %v1659_v13  ;;  %v4262_v25 = vmul.f32 -1.442695, %v1994_v16  ;;  %v1998_v14 = vadd.f32 %v1947_v48, %v1711_v51  ;;  %v4994_v9 = vpop.eup %4993 }
 0x2f4   : > { %4999 = vpow2.f32 %v4261_v63  ;;  %v4264_v39 = vmul.f32 -1.442695, %v1997_v17  ;;  %v1709_v19 = vunpack.c.h.bf16 %v4226_v15  ;;  %v1995_v36 = vadd.f32 %v1984_v11, %v1708_v22  ;;  %v6332_v17 = vld [vmem:[#allocation12] ss:$16 sps:$4 sm:$0xff]  }
 0x2f5   : > { %5001 = vtanh.f32 %v1663_v8  ;;  %v6317_v2 = vsel %vm1680_vm5, %v1663_v8, %v6123_v61  ;;  %v4265_v3 = vmul.f32 -1.442695, %v1998_v14  ;;  %v1999_v42 = vadd.f32 %v1988_v21, %v1712_v0 }
 0x2f6   : > { %5003 = vpow2.f32 %v4262_v25  ;;  %v1996_v12 = vadd.f32 %v1986_v1, %v1709_v19  ;;  %v4263_v20 = vmul.f32 -1.442695, %v1995_v36  ;;  %v1713_v13 = vunpack.c.h.bf16 %v4228_v50  ;;  %v6347_v19 = vld [vmem:[#allocation12 + $0x28] ss:$16 sps:$4 sm:$0xff]  }
 0x2f7   : > { %5005 = vpow2.f32 %v4264_v39  ;;  %v4266_v51 = vmul.f32 -1.442695, %v1999_v42 }
 0x2f8   : > { %5007 = vpow2.f32 %v4265_v3  ;;  %v2000_v21 = vadd.f32 %v1990_v4, %v1713_v13  ;;  %v6334_v4 = vld [vmem:[#allocation12 + $0x8] ss:$16 sps:$4 sm:$0xff]   ;;  %v6351_v3 = vld [vmem:[#allocation12 + $0x44] ss:$16 sps:$4 sm:$0xff]  }
 0x2f9   : > { %5009 = vtanh.f32 %v1996_v12  ;;  %v6353_v12 = vld [vmem:[#allocation12 + $0x4c] ss:$16 sps:$4 sm:$0xff]  }
 0x2fa   : > { %5011 = vpow2.f32 %v4263_v20  ;;  %v6960_v20 = vmov 0  }
 0x2fb   : > { %5013 = vpow2.f32 %v4266_v51  ;;  %v6359_v51 = vld [vmem:[#allocation12 + $0x40] ss:$16 sps:$4 sm:$0xff]  }
 0x2fc   : > { %v4996_v16 = vpop.eup %4995 }
 0x2fd   : > { %v4998_v18 = vpop.eup %4997  ;;  %v1666_v63 = vmul.f32 %v4996_v16, %v4994_v9 }
 0x2fe   : > { %v5000_v48 = vpop.eup %4999 }
 0x2ff   : > { %v5002_v61 = vpop.eup %5001  ;;  %v1691_v15 = vsel %vm1679_vm4, %v1666_v63, 0.0  ;;  %v2019_v11 = vadd.f32 1.0, %v5000_v48  ;;  %v6325_v42 = vsel %vm1679_vm4, %v1666_v63, %v6131_v26  ;;  %v6341_v26 = vld [vmem:[#allocation12 + $0x2c] ss:$16 sps:$4 sm:$0xff]   ;;  %v6365_v48 = vld [vmem:[#allocation12 + $0x64] ss:$16 sps:$4 sm:$0xff]  }
 0x300   : > { %4223 = vst [vmem:[%s5798_s25 + $0x10] sm:$0xff] %v1691_v15  ;;  %v1667_v1 = vmul.f32 %v5002_v61, %v4998_v18  ;;  %v5004_v22 = vpop.eup %5003  ;;  %v6361_v18 = vld [vmem:[#allocation12 + $0x48] ss:$16 sps:$4 sm:$0xff]   ;;  %v6367_v61 = vld [vmem:[#allocation12 + $0x6c] ss:$16 sps:$4 sm:$0xff]  }
 0x301   : > { %5015 = vrcp.f32 %v2019_v11  ;;  %v5006_v50 = vpop.eup %5005  ;;  %v2020_v25 = vadd.f32 1.0, %v5004_v22  ;;  %6961 = vst [vmem:[#allocation68_spill] sm:$0xff] %v6361_v18  ;;  %6962 = vst [vmem:[#allocation65_spill] sm:$0xff] %v6367_v61  ;;  %v6371_v22 = vld [vmem:[#allocation12 + $0x60] ss:$16 sps:$4 sm:$0xff]  }
 0x302   : > { %v6329_v36 = vsel %vm1680_vm5, %v1667_v1, %v6135_v28  ;;  %v1692_v8 = vsel %vm1680_vm5, %v1667_v1, 0.0  ;;  %v2022_v0 = vadd.f32 1.0, %v5006_v50  ;;  %5017 = vtanh.f32 %v2000_v21  ;;  %v5008_v39 = vpop.eup %5007  ;;  %v6373_v50 = vld [vmem:[#allocation12 + $0x68] ss:$16 sps:$4 sm:$0xff]  }
 0x303   : > { %4224 = vst [vmem:[%s5798_s25 + $0x18] sm:$0xff] %v1692_v8  ;;  %v2095_v14 = vpack.c.bf16 %v6329_v36, %v6325_v42  ;;  %5019 = vrcp.f32 %v2020_v25  ;;  %v2023_v28 = vadd.f32 1.0, %v5008_v39  ;;  %v5010_v9 = vpop.eup %5009 }
 0x304   : > { %5021 = vrcp.f32 %v2022_v0  ;;  %v5012_v13 = vpop.eup %5011  ;;  %v6378_v0 = vld [vmem:[#allocation12 + $0x84] ss:$16 sps:$4 sm:$0xff]  }
 0x305   : > { %2321 = vmatmul.mubr.bf16.vlgmr.msra.gmra.mrb[16].mxu0 %v2095_v14  ;;  %2364 = vmatmul.mubr.bf16.vlgmr.msra.gmra.mrb[16].mxu1 %v2095_v14  ;;  %5023 = vrcp.f32 %v2023_v28  ;;  %v5014_v16 = vpop.eup %5013  ;;  %v2021_v1 = vadd.f32 1.0, %v5012_v13  ;;  %v6380_v14 = vld [vmem:[#allocation12 + $0x8c] ss:$16 sps:$4 sm:$0xff]  }
 0x306   : > { %2670 = vmatpush1.bf16.msra.mxu0 %v6332_v17  ;;  %2713 = vmatpush1.bf16.msra.mxu1 %v6334_v4  ;;  %6963 = vst [vmem:[#allocation66_spill] sm:$0xff] %v6380_v14 }
 0x307   : > { %2671 = vmatprep.subr.bf16.mxu0 %v6339_v7  ;;  %2714 = vmatprep.subr.bf16.mxu1 %v6341_v26  ;;  %5025 = vrcp.f32 %v2021_v1  ;;  %v2059_v1 = vpop.permute.xlu1 %2058 }
 0x308   : > { %2701 = vmatprep.mubr.bf16.mxu0 %v6960_v20  ;;  %2744 = vmatprep.mubr.bf16.mxu1 %v6960_v20  ;;  %vm2061_vm7 = vcmp.eq.s32.totalorder %v2059_v1, 1 }
 0x30a   : > { %2672 = vmatpush1.bf16.msra.mxu0 %v6345_v23  ;;  %2715 = vmatpush1.bf16.msra.mxu1 %v6347_v19 }
 0x30b   : > { %v5016_v63 = vpop.eup %5015  ;;  %2673 = vmatprep.subr.bf16.mxu0 %v6351_v3  ;;  %2716 = vmatprep.subr.bf16.mxu1 %v6353_v12 }
 0x30c   : > { %v2041_v15 = vmul.f32 %v5016_v63, %v5010_v9  ;;  %v5018_v11 = vpop.eup %5017  ;;  %v2056_v9 = vpop.permute.xlu0 %2055  ;;  %v2024_v63 = vadd.f32 1.0, %v5014_v16  ;;  %v6395_v16 = vld [vmem:[#allocation12 + $0xa4] ss:$16 sps:$4 sm:$0xff]  }
 0x30d   : > { %v5020_v21 = vpop.eup %5019  ;;  %vm2060_vm6 = vcmp.eq.s32.totalorder %v2056_v9, 1  ;;  %6966 = vst [vmem:[#allocation70_spill] sm:$0xff] %v6395_v16 }
 0x30e   : > { %2674 = vmatpush1.bf16.msra.mxu0 %v6359_v51  ;;  %2717 = vmatpush1.bf16.msra.mxu1 %v6361_v18  ;;  %v5022_v8 = vpop.eup %5021  ;;  %v2039_v25 = vmul.f32 %v5020_v21, %v6158_v5  ;;  %v6385_v21 = vld [vmem:[#allocation12 + $0x80] ss:$16 sps:$4 sm:$0xff]  }
 0x30f   : > { %2675 = vmatprep.subr.bf16.mxu0 %v6365_v48  ;;  %2718 = vmatprep.subr.bf16.mxu1 %v6367_v61  ;;  %v2042_v39 = vmul.f32 %v5022_v8, %v5018_v11  ;;  %v5024_v28 = vpop.eup %5023  ;;  %6964 = vst [vmem:[#allocation71_spill] sm:$0xff] %v6385_v21  ;;  %v6387_v61 = vld [vmem:[#allocation12 + $0x88] ss:$16 sps:$4 sm:$0xff]  }
 0x310   : > { %v2043_v13 = vadd.f32 %v2041_v15, %v2039_v25  ;;  %v2040_v18 = vmul.f32 %v5024_v28, %v6163_v10  ;;  %6965 = vst [vmem:[#allocation69_spill] sm:$0xff] %v6387_v61  ;;  %v6397_v15 = vld [vmem:[#allocation12 + $0xac] ss:$16 sps:$4 sm:$0xff]   ;;  %v6407_v28 = vld [vmem:[#allocation12 + $0xa8] ss:$16 sps:$4 sm:$0xff]  }
 0x311   : > { %6967 = vst [vmem:[#allocation72_spill] sm:$0xff] %v6397_v15  ;;  %6969 = vst [vmem:[#allocation74_spill] sm:$0xff] %v6407_v28 }
 0x312   : > { %2676 = vmatpush1.bf16.msra.mxu0 %v6371_v22  ;;  %2719 = vmatpush1.bf16.msra.mxu1 %v6373_v50  ;;  %5027 = vtanh.f32 %v2043_v13  ;;  %v6391_v11 = vsel %vm2060_vm6, %v2043_v13, %v6158_v5  ;;  %v2044_v8 = vadd.f32 %v2042_v39, %v2040_v18  ;;  %v6405_v5 = vld [vmem:[#allocation12 + $0xa0] ss:$16 sps:$4 sm:$0xff]   ;;  %v6411_v18 = vld [vmem:[#allocation12 + $0xc4] ss:$16 sps:$4 sm:$0xff]   ;;  %v6413_v39 = vld [vmem:[#allocation12 + $0xcc] ss:$16 sps:$4 sm:$0xff]  }
 0x313   : > { %2677 = vmatprep.subr.bf16.mxu0 %v6378_v0  ;;  %2720 = vmatprep.subr.bf16.mxu1 %v6380_v14  ;;  %5029 = vrcp.f32 %v2024_v63  ;;  %6968 = vst [vmem:[#allocation73_spill] sm:$0xff] %v6405_v5  ;;  %6970 = vst [vmem:[#allocation75_spill] sm:$0xff] %v6411_v18  ;;  %v6419_v13 = vld [vmem:[#allocation12 + $0xc8] ss:$16 sps:$4 sm:$0xff]   ;;  %v6423_v63 = vld [vmem:[#allocation12 + $0xe4] ss:$16 sps:$4 sm:$0xff]  }
 0x314   : > { %5031 = vtanh.f32 %v2044_v8  ;;  %v6401_v25 = vsel %vm2061_vm7, %v2044_v8, %v6163_v10  ;;  %6971 = vst [vmem:[#allocation76_spill] sm:$0xff] %v6413_v39  ;;  %v6417_v10 = vld [vmem:[#allocation12 + $0xc0] ss:$16 sps:$4 sm:$0xff]   ;;  %6972 = vst [vmem:[#allocation77_spill] sm:$0xff] %v6423_v63  ;;  %v6425_v8 = vld [vmem:[#allocation12 + $0xec] ss:$16 sps:$4 sm:$0xff]  }
 0x316   : > { %2678 = vmatpush1.bf16.msra.mxu0 %v6385_v21  ;;  %2721 = vmatpush1.bf16.msra.mxu1 %v6387_v61 }
 0x317   : > { %2679 = vmatprep.subr.bf16.mxu0 %v6395_v16  ;;  %2722 = vmatprep.subr.bf16.mxu1 %v6397_v15  ;;  %v5026_v15 = vpop.eup %5025 }
 0x31a   : > { %2680 = vmatpush1.bf16.msra.mxu0 %v6405_v5  ;;  %2723 = vmatpush1.bf16.msra.mxu1 %v6407_v28  ;;  %v6429_v28 = vld [vmem:[#allocation12 + $0xe0] ss:$16 sps:$4 sm:$0xff]   ;;  %v6431_v5 = vld [vmem:[#allocation12 + $0xe8] ss:$16 sps:$4 sm:$0xff]  }
 0x31b   : > { %2681 = vmatprep.subr.bf16.mxu0 %v6411_v18  ;;  %2724 = vmatprep.subr.bf16.mxu1 %v6413_v39 }
 0x31c   : > { %v5028_v16 = vpop.eup %5027 }
 0x31d   : > { %v2047_v61 = vmul.f32 %v5028_v16, %v5026_v15  ;;  %v5030_v18 = vpop.eup %5029 }
 0x31e   : > { %2682 = vmatpush1.bf16.msra.mxu0 %v6417_v10  ;;  %2725 = vmatpush1.bf16.msra.mxu1 %v6419_v13  ;;  %v5032_v39 = vpop.eup %5031 }
 0x31f   : > { %2683 = vmatprep.subr.bf16.mxu0 %v6423_v63  ;;  %2726 = vmatprep.subr.bf16.mxu1 %v6425_v8  ;;  %v2072_v21 = vsel %vm2060_vm6, %v2047_v61, 0.0  ;;  %v2048_v14 = vmul.f32 %v5032_v39, %v5030_v18  ;;  %v6441_v16 = vsel %vm2060_vm6, %v2047_v61, %v6181_v57  ;;  %v6973_v57 = vld [vmem:[#allocation59_spill] sm:$0xff] }
 0x320   : > { %4267 = vst [vmem:[%s5800_s15 + $0x20] sm:$0xff] %v2072_v21 }
 0x321   : > { %v6445_v15 = vsel %vm2061_vm7, %v2048_v14, %v6185_v24  ;;  %v2073_v63 = vsel %vm2061_vm7, %v2048_v14, 0.0  ;;  %v6974_v24 = vld [vmem:[#allocation63_spill] sm:$0xff] }
 0x322   : > { %2684 = vmatpush1.bf16.msra.mxu0 %v6429_v28  ;;  %2727 = vmatpush1.bf16.msra.mxu1 %v6431_v5  ;;  %4268 = vst [vmem:[%s5800_s15 + $0x28] sm:$0xff] %v2073_v63  ;;  %v2476_v21 = vpack.c.bf16 %v6445_v15, %v6441_v16 }
 0x323   : > { %3050 = vmatprep.subr.bf16.mxu0 %v6195_v58  ;;  %3093 = vmatprep.subr.bf16.mxu1 %v6197_v53  ;;  %v6975_v58 = vld [vmem:[#allocation60_spill] sm:$0xff] }
 0x324   : > { %v6976_v53 = vld [vmem:[#allocation64_spill] sm:$0xff] }
 0x325   : > { %2702 = vmatmul.mubr.bf16.vlgmr.msra.gmra.mrb[20].mxu0 %v2476_v21  ;;  %2745 = vmatmul.mubr.bf16.vlgmr.msra.gmra.mrb[20].mxu1 %v2476_v21 }
 0x326   : > { %3051 = vmatpush1.bf16.msra.mxu0 %v6199_v29  ;;  %3094 = vmatpush1.bf16.msra.mxu1 %v6201_v30  ;;  %v6977_v29 = vld [vmem:[#allocation61_spill] sm:$0xff]  ;;  %v6978_v30 = vld [vmem:[#allocation67_spill] sm:$0xff] }
 0x327   : > { %3052 = vmatprep.subr.bf16.mxu0 %v6207_v46  ;;  %3095 = vmatprep.subr.bf16.mxu1 %v6209_v62  ;;  %v4269_v46 = vld [vmem:[%s5760_s21 + $0x40] sm:$0xff]  ;;  %v4271_v62 = vld [vmem:[%s5760_s21 + $0x50] sm:$0xff] }
 0x328   : > { %3082 = vmatprep.mubr.bf16.mxu0 %v6960_v20  ;;  %3125 = vmatprep.mubr.bf16.mxu1 %v6960_v20 }
 0x32a   : > { %3053 = vmatpush1.bf16.msra.mxu0 %v6211_v33  ;;  %3096 = vmatpush1.bf16.msra.mxu1 %v6213_v34  ;;  %v2087_v33 = vunpack.c.l.bf16 %v4269_v46  ;;  %v2088_v34 = vunpack.c.h.bf16 %v4269_v46 }
 0x32b   : > { %3054 = vmatprep.subr.bf16.mxu0 %v6219_v35  ;;  %3097 = vmatprep.subr.bf16.mxu1 %v6221_v40  ;;  %v2091_v35 = vunpack.c.l.bf16 %v4271_v62 }
 0x32e   : > { %3055 = vmatpush1.bf16.msra.mxu0 %v6223_v31  ;;  %3098 = vmatpush1.bf16.msra.mxu1 %v6225_v32  ;;  %v2092_v32 = vunpack.c.h.bf16 %v4271_v62 }
 0x32f   : > { %3056 = vmatprep.subr.bf16.mxu0 %v6231_v6  ;;  %3099 = vmatprep.subr.bf16.mxu1 %v6233_v27  ;;  %v4270_v27 = vld [vmem:[%s5760_s21 + $0x48] sm:$0xff] }
 0x330   : > { %v2090_v9 = vunpack.c.h.bf16 %v4270_v27 }
 0x332   : > { %3057 = vmatpush1.bf16.msra.mxu0 %v6235_v45  ;;  %3100 = vmatpush1.bf16.msra.mxu1 %v6238_v37 }
 0x333   : > { %3058 = vmatprep.subr.bf16.mxu0 %v6243_v38  ;;  %3101 = vmatprep.subr.bf16.mxu1 %v6245_v43 }
 0x336   : > { %3059 = vmatpush1.bf16.msra.mxu0 %v6247_v44  ;;  %3102 = vmatpush1.bf16.msra.mxu1 %v6249_v52  ;;  %v4272_v44 = vld [vmem:[%s5760_s21 + $0x58] sm:$0xff] }
 0x337   : > { %3060 = vmatprep.subr.bf16.mxu0 %v6255_v54  ;;  %3103 = vmatprep.subr.bf16.mxu1 %v6257_v55  ;;  %v2093_v61 = vunpack.c.l.bf16 %v4272_v44  ;;  %v2094_v63 = vunpack.c.h.bf16 %v4272_v44 }
 0x33a   : > { %3061 = vmatpush1.bf16.msra.mxu0 %v6259_v56  ;;  %3104 = vmatpush1.bf16.msra.mxu1 %v6261_v60 }
 0x33b   : > { %3062 = vmatprep.subr.bf16.mxu0 %v6267_v41  ;;  %3105 = vmatprep.subr.bf16.mxu1 %v6269_v49  ;;  %v2089_v41 = vunpack.c.l.bf16 %v4270_v27 }
 0x33e   : > { %3063 = vmatpush1.bf16.msra.mxu0 %v6271_v47  ;;  %3106 = vmatpush1.bf16.msra.mxu1 %v6273_v59 }
 0x33f   : > { %3064 = vmatprep.subr.bf16.mxu0 %v6973_v57  ;;  %3107 = vmatprep.subr.bf16.mxu1 %v6974_v24 }
 0x342   : > { %3065 = vmatpush1.bf16.msra.mxu0 %v6975_v58  ;;  %3108 = vmatpush1.bf16.msra.mxu1 %v6976_v53 }
 0x343   : > { %3429 = vmatprep.subr.bf16.mxu0 %v6977_v29  ;;  %3472 = vmatprep.subr.bf16.mxu1 %v6978_v30 }
 0x3d8   : > { %v2322_v40 = vpop.f32.mrb[16].mxu0  ;;  %v2365_v31 = vpop.f32.mrb[16].mxu1 }
 0x3d9   : > { %v2374_v6 = vadd.f32 %v2322_v40, %v2087_v33  ;;  %v2324_v45 = vpop.f32.mrb[17].mxu0  ;;  %v2367_v37 = vpop.f32.mrb[17].mxu1  ;;  %v2376_v1 = vadd.f32 %v2365_v31, %v2089_v41 }
 0x3da   : > { %v2375_v38 = vadd.f32 %v2324_v45, %v2088_v34  ;;  %v2326_v43 = vpop.f32.mrb[18].mxu0  ;;  %v2369_v52 = vpop.f32.mrb[18].mxu1  ;;  %v2377_v39 = vadd.f32 %v2367_v37, %v2090_v9  ;;  %v4315_v37 = vld [vmem:[%s5770_s24 + $0x30] sm:$0xff] }
 0x3db   : > { %v4305_v54 = vmul.f32 -1.442695, %v2374_v6  ;;  %v2378_v55 = vadd.f32 %v2326_v43, %v2091_v35  ;;  %v2328_v56 = vpop.f32.mrb[19].mxu0  ;;  %v2371_v60 = vpop.f32.mrb[19].mxu1  ;;  %v2380_v18 = vadd.f32 %v2369_v52, %v2093_v61  ;;  %v4307_v21 = vmul.f32 -1.442695, %v2376_v1 }
 0x3dc   : > { %v4306_v49 = vmul.f32 -1.442695, %v2375_v38  ;;  %v2379_v47 = vadd.f32 %v2328_v56, %v2092_v32  ;;  %v2381_v58 = vadd.f32 %v2371_v60, %v2094_v63  ;;  %v4313_v32 = vld [vmem:[%s5770_s24 + $0x20] sm:$0xff]  ;;  %v6494_v60 = vpop.permute.xlu0 %2436  ;;  %v6496_v41 = vpop.permute.xlu1 %2439 }
 0x3dd   : > { %5033 = vpow2.f32 %v4305_v54  ;;  %v4308_v59 = vmul.f32 -1.442695, %v2378_v55  ;;  %v4310_v57 = vmul.f32 -1.442695, %v2380_v18  ;;  %v2468_v44 = vunpack.c.l.bf16 %v4313_v32  ;;  %v6979_v54 = vld [vmem:[#allocation62_spill] sm:$0xff] }
 0x3de   : > { %v4309_v14 = vmul.f32 -1.442695, %v2379_v47  ;;  %5035 = vpow2.f32 %v4306_v49  ;;  %v2469_v56 = vunpack.c.h.bf16 %v4313_v32  ;;  %v2472_v47 = vunpack.c.l.bf16 %v4315_v37 }
 0x3df   : > { %5037 = vpow2.f32 %v4308_v59  ;;  %v2473_v18 = vunpack.c.h.bf16 %v4315_v37  ;;  %vm2441_vm8 = vcmp.eq.s32.totalorder %v6494_v60, 1  ;;  %vm2442_vm9 = vcmp.eq.s32.totalorder %v6496_v41, 1 }
 0x3e0   : > { %5039 = vpow2.f32 %v4309_v14 }
 0x3e1   : > { %5041 = vtanh.f32 %v2377_v39 }
 0x3e2   : > { %5043 = vpow2.f32 %v4307_v21 }
 0x3e3   : > { %5045 = vpow2.f32 %v4310_v57 }
 0x3e7   : > { %v5034_v24 = vpop.eup %5033 }
 0x3e8   : > { %v2400_v53 = vadd.f32 1.0, %v5034_v24  ;;  %v5036_v29 = vpop.eup %5035 }
 0x3e9   : > { %v5038_v30 = vpop.eup %5037  ;;  %v2401_v46 = vadd.f32 1.0, %v5036_v29 }
 0x3ea   : > { %5047 = vrcp.f32 %v2400_v53  ;;  %v2403_v62 = vadd.f32 1.0, %v5038_v30  ;;  %v5040_v33 = vpop.eup %5039 }
 0x3eb   : > { %5049 = vtanh.f32 %v2381_v58  ;;  %v2404_v34 = vadd.f32 1.0, %v5040_v33  ;;  %v5042_v35 = vpop.eup %5041  ;;  %v4314_v58 = vld [vmem:[%s5770_s24 + $0x28] sm:$0xff] }
 0x3ec   : > { %5051 = vrcp.f32 %v2401_v46  ;;  %v5044_v40 = vpop.eup %5043 }
 0x3ed   : > { %5053 = vrcp.f32 %v2403_v62  ;;  %v5046_v31 = vpop.eup %5045  ;;  %v2402_v43 = vadd.f32 1.0, %v5044_v40 }
 0x3ee   : > { %5055 = vrcp.f32 %v2404_v34  ;;  %v2405_v14 = vadd.f32 1.0, %v5046_v31  ;;  %v4316_v34 = vld [vmem:[%s5770_s24 + $0x38] sm:$0xff] }
 0x3ef   : > { %5057 = vrcp.f32 %v2402_v43  ;;  %v2474_v37 = vunpack.c.l.bf16 %v4316_v34  ;;  %v2471_v43 = vunpack.c.h.bf16 %v4314_v58 }
 0x3f4   : > { %v5048_v6 = vpop.eup %5047 }
 0x3f5   : > { %v5050_v27 = vpop.eup %5049  ;;  %v2422_v45 = vmul.f32 %v5048_v6, %v5042_v35 }
 0x3f6   : > { %v5052_v38 = vpop.eup %5051 }
 0x3f7   : > { %v5054_v52 = vpop.eup %5053  ;;  %v2420_v55 = vmul.f32 %v5052_v38, %v6979_v54 }
 0x3f8   : > { %v2423_v49 = vmul.f32 %v5054_v52, %v5050_v27  ;;  %v5056_v59 = vpop.eup %5055  ;;  %v2703_v9 = vpop.f32.mrb[20].mxu0  ;;  %v2470_v27 = vunpack.c.l.bf16 %v4314_v58 }
 0x3f9   : > { %v2424_v61 = vadd.f32 %v2422_v45, %v2420_v55  ;;  %v2746_v1 = vpop.f32.mrb[20].mxu1  ;;  %v2421_v39 = vmul.f32 %v5056_v59, %v6317_v2  ;;  %v2755_v63 = vadd.f32 %v2703_v9, %v2468_v44  ;;  %v2705_v21 = vpop.f32.mrb[21].mxu0 }
 0x3fa   : > { %v2748_v57 = vpop.f32.mrb[21].mxu1  ;;  %v2756_v53 = vadd.f32 %v2705_v21, %v2469_v56  ;;  %v2707_v29 = vpop.f32.mrb[22].mxu0  ;;  %v2757_v44 = vadd.f32 %v2746_v1, %v2470_v27 }
 0x3fb   : > { %5059 = vtanh.f32 %v2424_v61  ;;  %v6503_v24 = vsel %vm2441_vm8, %v2424_v61, %v6979_v54  ;;  %v2750_v30 = vpop.f32.mrb[22].mxu1  ;;  %v2425_v46 = vadd.f32 %v2423_v49, %v2421_v39  ;;  %v4349_v62 = vmul.f32 -1.442695, %v2755_v63  ;;  %v2709_v35 = vpop.f32.mrb[23].mxu0 }
 0x3fc   : > { %v2759_v33 = vadd.f32 %v2707_v29, %v2472_v47  ;;  %v2752_v40 = vpop.f32.mrb[23].mxu1  ;;  %5061 = vrcp.f32 %v2405_v14  ;;  %v4350_v31 = vmul.f32 -1.442695, %v2756_v53  ;;  %v2760_v32 = vadd.f32 %v2709_v35, %v2473_v18  ;;  %v5058_v54 = vpop.eup %5057 }
 0x3fd   : > { %5063 = vtanh.f32 %v2425_v46  ;;  %v6511_v6 = vsel %vm2442_vm9, %v2425_v46, %v6317_v2  ;;  %v2761_v52 = vadd.f32 %v2750_v30, %v2474_v37  ;;  %v2758_v56 = vadd.f32 %v2748_v57, %v2471_v43  ;;  %v6986_v43 = vld [vmem:[#allocation72_spill] sm:$0xff] }
 0x3fe   : > { %v4352_v45 = vmul.f32 -1.442695, %v2759_v33  ;;  %5065 = vpow2.f32 %v4349_v62  ;;  %v4353_v38 = vmul.f32 -1.442695, %v2760_v32  ;;  %v2475_v49 = vunpack.c.h.bf16 %v4316_v34 }
 0x3ff   : > { %5067 = vpow2.f32 %v4350_v31  ;;  %v4351_v59 = vmul.f32 -1.442695, %v2757_v44  ;;  %v4354_v61 = vmul.f32 -1.442695, %v2761_v52  ;;  %v6988_v44 = vld [vmem:[#allocation74_spill] sm:$0xff]  ;;  %v6989_v52 = vld [vmem:[#allocation75_spill] sm:$0xff] }
 0x400   : > { %5069 = vpow2.f32 %v4352_v45  ;;  %v2762_v1 = vadd.f32 %v2752_v40, %v2475_v49  ;;  %v2821_v45 = vpop.permute.xlu1 %2820  ;;  %v6991_v49 = vld [vmem:[#allocation77_spill] sm:$0xff] }
 0x401   : > { %5071 = vpow2.f32 %v4353_v38  ;;  %vm2823_vm11 = vcmp.eq.s32.totalorder %v2821_v45, 1 }
 0x402   : > { %5073 = vtanh.f32 %v2758_v56 }
 0x403   : > { %5075 = vpow2.f32 %v4351_v59 }
 0x404   : > { %5077 = vpow2.f32 %v4354_v61 }
 0x405   : > { %v5060_v55 = vpop.eup %5059 }
 0x406   : > { %v2428_v47 = vmul.f32 %v5060_v55, %v5058_v54  ;;  %v5062_v2 = vpop.eup %5061  ;;  %v6990_v54 = vld [vmem:[#allocation76_spill] sm:$0xff] }
 0x407   : > { %v5064_v14 = vpop.eup %5063 }
 0x408   : > { %v2453_v9 = vsel %vm2441_vm8, %v2428_v47, 0.0  ;;  %v5066_v18 = vpop.eup %5065  ;;  %v2429_v39 = vmul.f32 %v5064_v14, %v5062_v2  ;;  %v6519_v57 = vsel %vm2441_vm8, %v2428_v47, %v6325_v42 }
 0x409   : > { %4311 = vst [vmem:[%s5798_s25 + $0x20] sm:$0xff] %v2453_v9  ;;  %v2781_v63 = vadd.f32 1.0, %v5066_v18  ;;  %v5068_v21 = vpop.eup %5067 }
 0x40a   : > { %v6524_v58 = vsel %vm2442_vm9, %v2429_v39, %v6329_v36  ;;  %v2454_v53 = vsel %vm2442_vm9, %v2429_v39, 0.0  ;;  %v5070_v29 = vpop.eup %5069  ;;  %v2782_v30 = vadd.f32 1.0, %v5068_v21 }
 0x40b   : > { %4312 = vst [vmem:[%s5798_s25 + $0x28] sm:$0xff] %v2454_v53  ;;  %5079 = vrcp.f32 %v2781_v63  ;;  %v2857_v46 = vpack.c.bf16 %v6524_v58, %v6519_v57  ;;  %v2784_v62 = vadd.f32 1.0, %v5070_v29  ;;  %v5072_v42 = vpop.eup %5071 }
 0x40c   : > { %5081 = vtanh.f32 %v2762_v1  ;;  %v2785_v36 = vadd.f32 1.0, %v5072_v42  ;;  %v5074_v60 = vpop.eup %5073 }
 0x40d   : > { %5083 = vrcp.f32 %v2782_v30  ;;  %3083 = vmatmul.mubr.bf16.vlgmr.msra.gmra.mrb[24].mxu0 %v2857_v46  ;;  %3126 = vmatmul.mubr.bf16.vlgmr.msra.gmra.mrb[24].mxu1 %v2857_v46  ;;  %v5076_v41 = vpop.eup %5075 }
 0x40e   : > { %5085 = vrcp.f32 %v2784_v62  ;;  %3430 = vmatpush1.bf16.msra.mxu0 %v6332_v17  ;;  %3473 = vmatpush1.bf16.msra.mxu1 %v6334_v4  ;;  %v5078_v17 = vpop.eup %5077  ;;  %v4360_v62 = vld [vmem:[%s5760_s21 + $0x78] sm:$0xff] }
 0x40f   : > { %3431 = vmatprep.subr.bf16.mxu0 %v6339_v7  ;;  %3474 = vmatprep.subr.bf16.mxu1 %v6341_v26  ;;  %5087 = vrcp.f32 %v2785_v36  ;;  %v6980_v26 = vld [vmem:[#allocation68_spill] sm:$0xff]  ;;  %v2786_v32 = vadd.f32 1.0, %v5078_v17 }
 0x410   : > { %3461 = vmatprep.mubr.bf16.mxu0 %v6960_v20  ;;  %3504 = vmatprep.mubr.bf16.mxu1 %v6960_v20  ;;  %v2783_v20 = vadd.f32 1.0, %v5076_v41 }
 0x412   : > { %3432 = vmatpush1.bf16.msra.mxu0 %v6345_v23  ;;  %3475 = vmatpush1.bf16.msra.mxu1 %v6347_v19  ;;  %v6981_v23 = vld [vmem:[#allocation65_spill] sm:$0xff]  ;;  %5089 = vrcp.f32 %v2783_v20 }
 0x413   : > { %3433 = vmatprep.subr.bf16.mxu0 %v6351_v3  ;;  %3476 = vmatprep.subr.bf16.mxu1 %v6353_v12  ;;  %v2818_v12 = vpop.permute.xlu0 %2817 }
 0x414   : > { %vm2822_vm10 = vcmp.eq.s32.totalorder %v2818_v12, 1 }
 0x415   : > { %v5080_v4 = vpop.eup %5079 }
 0x416   : > { %v5082_v7 = vpop.eup %5081  ;;  %v2803_v33 = vmul.f32 %v5080_v4, %v5074_v60  ;;  %3434 = vmatpush1.bf16.msra.mxu0 %v6359_v51  ;;  %3477 = vmatpush1.bf16.msra.mxu1 %v6980_v26 }
 0x417   : > { %v5084_v34 = vpop.eup %5083  ;;  %3435 = vmatprep.subr.bf16.mxu0 %v6365_v48  ;;  %3478 = vmatprep.subr.bf16.mxu1 %v6981_v23  ;;  %v6982_v48 = vld [vmem:[#allocation66_spill] sm:$0xff] }
 0x418   : > { %v5086_v19 = vpop.eup %5085  ;;  %v2801_v35 = vmul.f32 %v5084_v34, %v6391_v11  ;;  %v2855_v34 = vunpack.c.l.bf16 %v4360_v62 }
 0x419   : > { %v2804_v3 = vmul.f32 %v5086_v19, %v5082_v7  ;;  %v5088_v40 = vpop.eup %5087 }
 0x41a   : > { %v2805_v31 = vadd.f32 %v2803_v33, %v2801_v35  ;;  %3436 = vmatpush1.bf16.msra.mxu0 %v6371_v22  ;;  %3479 = vmatpush1.bf16.msra.mxu1 %v6373_v50  ;;  %v2802_v51 = vmul.f32 %v5088_v40, %v6401_v25  ;;  %v6983_v22 = vld [vmem:[#allocation71_spill] sm:$0xff]  ;;  %v6984_v50 = vld [vmem:[#allocation69_spill] sm:$0xff]  ;;  %v2856_v40 = vunpack.c.h.bf16 %v4360_v62 }
 0x41b   : > { %3437 = vmatprep.subr.bf16.mxu0 %v6378_v0  ;;  %3480 = vmatprep.subr.bf16.mxu1 %v6982_v48  ;;  %v6985_v0 = vld [vmem:[#allocation70_spill] sm:$0xff] }
 0x41c   : > { %5091 = vtanh.f32 %v2805_v31  ;;  %v6553_v27 = vsel %vm2822_vm10, %v2805_v31, %v6391_v11  ;;  %v2806_v37 = vadd.f32 %v2804_v3, %v2802_v51  ;;  %v6987_v11 = vld [vmem:[#allocation73_spill] sm:$0xff]  ;;  %v5090_v55 = vpop.eup %5089 }
 0x41d   : > { %5093 = vrcp.f32 %v2786_v32 }
 0x41e   : > { %3438 = vmatpush1.bf16.msra.mxu0 %v6983_v22  ;;  %3481 = vmatpush1.bf16.msra.mxu1 %v6984_v50  ;;  %5095 = vtanh.f32 %v2806_v37  ;;  %v6559_v38 = vsel %vm2823_vm11, %v2806_v37, %v6401_v25 }
 0x41f   : > { %3439 = vmatprep.subr.bf16.mxu0 %v6985_v0  ;;  %3482 = vmatprep.subr.bf16.mxu1 %v6986_v43 }
 0x422   : > { %3440 = vmatpush1.bf16.msra.mxu0 %v6987_v11  ;;  %3483 = vmatpush1.bf16.msra.mxu1 %v6988_v44 }
 0x423   : > { %3441 = vmatprep.subr.bf16.mxu0 %v6989_v52  ;;  %3484 = vmatprep.subr.bf16.mxu1 %v6990_v54 }
 0x426   : > { %v5092_v56 = vpop.eup %5091  ;;  %3442 = vmatpush1.bf16.msra.mxu0 %v6417_v10  ;;  %3485 = vmatpush1.bf16.msra.mxu1 %v6419_v13 }
 0x427   : > { %v2809_v25 = vmul.f32 %v5092_v56, %v5090_v55  ;;  %3443 = vmatprep.subr.bf16.mxu0 %v6991_v49  ;;  %3486 = vmatprep.subr.bf16.mxu1 %v6425_v8  ;;  %v5094_v47 = vpop.eup %5093  ;;  %v3220_v55 = vld [vmem:[%s5770_s24] sm:$0xff] }
 0x428   : > { %v5096_v59 = vpop.eup %5095 }
 0x429   : > { %v2834_v2 = vsel %vm2822_vm10, %v2809_v25, 0.0  ;;  %v2810_v61 = vmul.f32 %v5096_v59, %v5094_v47  ;;  %v6577_v10 = vsel %vm2822_vm10, %v2809_v25, %v6441_v16  ;;  %v3222_v59 = vld [vmem:[%s5770_s24 + $0x10] sm:$0xff] }
 0x42a   : > { %4355 = vst [vmem:[%s5800_s15 + $0x10] sm:$0xff] %v2834_v2  ;;  %3444 = vmatpush1.bf16.msra.mxu0 %v6429_v28  ;;  %3487 = vmatpush1.bf16.msra.mxu1 %v6431_v5  ;;  %v4357_v28 = vld [vmem:[%s5760_s21 + $0x60] sm:$0xff]  ;;  %v4359_v5 = vld [vmem:[%s5760_s21 + $0x70] sm:$0xff] }
 0x42b   : > { %v6581_v13 = vsel %vm2823_vm11, %v2810_v61, %v6445_v15  ;;  %v2835_v8 = vsel %vm2823_vm11, %v2810_v61, 0.0  ;;  %v2849_v9 = vunpack.c.l.bf16 %v4357_v28  ;;  %v2850_v18 = vunpack.c.h.bf16 %v4357_v28  ;;  %v4358_v15 = vld [vmem:[%s5760_s21 + $0x68] sm:$0xff] }
 0x42c   : > { %4356 = vst [vmem:[%s5800_s15 + $0x18] sm:$0xff] %v2835_v8  ;;  %v3236_v14 = vpack.c.bf16 %v6581_v13, %v6577_v10  ;;  %v2853_v16 = vunpack.c.l.bf16 %v4359_v5  ;;  %v2854_v63 = vunpack.c.h.bf16 %v4359_v5  ;;  %v2851_v4 = vunpack.c.l.bf16 %v4358_v15 }
 0x42d   : > { %v2852_v23 = vunpack.c.h.bf16 %v4358_v15  ;;  %v3228_v8 = vunpack.c.l.bf16 %v3220_v55  ;;  %v3229_v28 = vunpack.c.h.bf16 %v3220_v55  ;;  %v3221_v15 = vld [vmem:[%s5770_s24 + $0x8] sm:$0xff] }
 0x42e   : > { %3462 = vmatmul.mubr.bf16.vlgmr.msra.gmra.mrb[28].mxu0 %v3236_v14  ;;  %3505 = vmatmul.mubr.bf16.vlgmr.msra.gmra.mrb[28].mxu1 %v3236_v14 }
 0x4e0   : > { %v3084_v39 = vpop.f32.mrb[24].mxu0  ;;  %v3127_v1 = vpop.f32.mrb[24].mxu1 }
 0x4e1   : > { %v3136_v21 = vadd.f32 %v3084_v39, %v2849_v9  ;;  %v3086_v53 = vpop.f32.mrb[25].mxu0  ;;  %v3129_v29 = vpop.f32.mrb[25].mxu1  ;;  %v3138_v19 = vadd.f32 %v3127_v1, %v2851_v4  ;;  %v3232_v1 = vunpack.c.l.bf16 %v3222_v59 }
 0x4e2   : > { %v3137_v30 = vadd.f32 %v3086_v53, %v2850_v18  ;;  %v3088_v46 = vpop.f32.mrb[26].mxu0  ;;  %v3131_v42 = vpop.f32.mrb[26].mxu1  ;;  %v3139_v3 = vadd.f32 %v3129_v29, %v2852_v23  ;;  %v3233_v29 = vunpack.c.h.bf16 %v3222_v59  ;;  %v3223_v23 = vld [vmem:[%s5770_s24 + $0x18] sm:$0xff] }
 0x4e3   : > { %v4393_v36 = vmul.f32 -1.442695, %v3136_v21  ;;  %v3140_v60 = vadd.f32 %v3088_v46, %v2853_v16  ;;  %v3090_v41 = vpop.f32.mrb[27].mxu0  ;;  %v3133_v17 = vpop.f32.mrb[27].mxu1  ;;  %v3142_v35 = vadd.f32 %v3131_v42, %v2855_v34  ;;  %v4395_v12 = vmul.f32 -1.442695, %v3138_v19 }
 0x4e4   : > { %v4394_v7 = vmul.f32 -1.442695, %v3137_v30  ;;  %v3141_v33 = vadd.f32 %v3090_v41, %v2854_v63  ;;  %v3143_v51 = vadd.f32 %v3133_v17, %v2856_v40  ;;  %v3199_v9 = vpop.permute.xlu0 %3198  ;;  %v6594_v18 = vpop.permute.xlu1 %3201 }
 0x4e5   : > { %5097 = vpow2.f32 %v4393_v36  ;;  %v4396_v26 = vmul.f32 -1.442695, %v3140_v60  ;;  %v4398_v31 = vmul.f32 -1.442695, %v3142_v35  ;;  %vm3203_vm12 = vcmp.eq.s32.totalorder %v3199_v9, 1 }
 0x4e6   : > { %v4397_v20 = vmul.f32 -1.442695, %v3141_v33  ;;  %5099 = vpow2.f32 %v4394_v7  ;;  %vm3204_vm13 = vcmp.eq.s32.totalorder %v6594_v18, 1  ;;  %v3230_v7 = vunpack.c.l.bf16 %v3221_v15 }
 0x4e7   : > { %5101 = vpow2.f32 %v4396_v26 }
 0x4e8   : > { %5103 = vpow2.f32 %v4397_v20 }
 0x4e9   : > { %5105 = vtanh.f32 %v3139_v3  ;;  %v3234_v3 = vunpack.c.l.bf16 %v3223_v23 }
 0x4ea   : > { %5107 = vpow2.f32 %v4395_v12 }
 0x4eb   : > { %5109 = vpow2.f32 %v4398_v31  ;;  %v3231_v31 = vunpack.c.h.bf16 %v3221_v15 }
 0x4ef   : > { %v5098_v32 = vpop.eup %5097 }
 0x4f0   : > { %v3162_v48 = vadd.f32 1.0, %v5098_v32  ;;  %v5100_v45 = vpop.eup %5099 }
 0x4f1   : > { %v5102_v37 = vpop.eup %5101  ;;  %v3163_v22 = vadd.f32 1.0, %v5100_v45 }
 0x4f2   : > { %5111 = vrcp.f32 %v3162_v48  ;;  %v3165_v50 = vadd.f32 1.0, %v5102_v37  ;;  %v5104_v0 = vpop.eup %5103 }
 0x4f3   : > { %5113 = vtanh.f32 %v3143_v51  ;;  %v3166_v43 = vadd.f32 1.0, %v5104_v0  ;;  %v5106_v11 = vpop.eup %5105 }
 0x4f4   : > { %5115 = vrcp.f32 %v3163_v22  ;;  %v5108_v44 = vpop.eup %5107 }
 0x4f5   : > { %5117 = vrcp.f32 %v3165_v50  ;;  %v5110_v52 = vpop.eup %5109  ;;  %v3164_v47 = vadd.f32 1.0, %v5108_v44  ;;  %v3235_v50 = vunpack.c.h.bf16 %v3223_v23 }
 0x4f6   : > { %5119 = vrcp.f32 %v3166_v43  ;;  %v3167_v39 = vadd.f32 1.0, %v5110_v52 }
 0x4f7   : > { %5121 = vrcp.f32 %v3164_v47 }
 0x4fc   : > { %v5112_v54 = vpop.eup %5111 }
 0x4fd   : > { %v5114_v56 = vpop.eup %5113  ;;  %v3184_v25 = vmul.f32 %v5112_v54, %v5106_v11 }
 0x4fe   : > { %v5116_v49 = vpop.eup %5115 }
 0x4ff   : > { %v5118_v2 = vpop.eup %5117  ;;  %v3182_v61 = vmul.f32 %v5116_v49, %v6503_v24 }
 0x500   : > { %v3185_v14 = vmul.f32 %v5118_v2, %v5114_v56  ;;  %v5120_v5 = vpop.eup %5119 }
 0x501   : > { %v3186_v16 = vadd.f32 %v3184_v25, %v3182_v61  ;;  %v3183_v63 = vmul.f32 %v5120_v5, %v6511_v6  ;;  %v3463_v21 = vpop.f32.mrb[28].mxu0  ;;  %v3506_v53 = vpop.f32.mrb[28].mxu1 }
 0x502   : > { %v3515_v46 = vadd.f32 %v3463_v21, %v3228_v8  ;;  %v3465_v62 = vpop.f32.mrb[29].mxu0  ;;  %v3508_v42 = vpop.f32.mrb[29].mxu1  ;;  %v3517_v12 = vadd.f32 %v3506_v53, %v3230_v7 }
 0x503   : > { %5123 = vtanh.f32 %v3186_v16  ;;  %v3211_v30 = vsel %vm3203_vm12, %v3186_v16, %v6503_v24  ;;  %v3187_v36 = vadd.f32 %v3185_v14, %v3183_v63  ;;  %v3516_v60 = vadd.f32 %v3465_v62, %v3229_v28  ;;  %v3467_v41 = vpop.f32.mrb[30].mxu0  ;;  %v3510_v17 = vpop.f32.mrb[30].mxu1 }
 0x504   : > { %3213 = vst [vmem:[#allocation3] sm:$0xff] %v3211_v30  ;;  %5125 = vrcp.f32 %v3167_v39  ;;  %v4433_v4 = vmul.f32 -1.442695, %v3515_v46  ;;  %v3519_v33 = vadd.f32 %v3467_v41, %v3232_v1  ;;  %v3469_v26 = vpop.f32.mrb[31].mxu0  ;;  %v3512_v34 = vpop.f32.mrb[31].mxu1  ;;  %v3521_v48 = vadd.f32 %v3510_v17, %v3234_v3 }
 0x505   : > { %5127 = vtanh.f32 %v3187_v36  ;;  %v3212_v24 = vsel %vm3204_vm13, %v3187_v36, %v6511_v6  ;;  %v4434_v20 = vmul.f32 -1.442695, %v3516_v60  ;;  %v3520_v19 = vadd.f32 %v3469_v26, %v3233_v29  ;;  %v5122_v32 = vpop.eup %5121  ;;  %v3578_v1 = vpop.permute.xlu0 %3577 }
 0x506   : > { %3214 = vst [vmem:[#allocation3 + $0x8] sm:$0xff] %v3212_v24  ;;  %5129 = vpow2.f32 %v4433_v4  ;;  %v4436_v35 = vmul.f32 -1.442695, %v3519_v33  ;;  %v4435_v37 = vmul.f32 -1.442695, %v3517_v12  ;;  %v3518_v22 = vadd.f32 %v3508_v42, %v3231_v31  ;;  %v3581_v46 = vpop.permute.xlu1 %3580 }
 0x507   : > { %5131 = vpow2.f32 %v4434_v20  ;;  %v4437_v40 = vmul.f32 -1.442695, %v3520_v19  ;;  %v4438_v54 = vmul.f32 -1.442695, %v3521_v48  ;;  %v3522_v47 = vadd.f32 %v3512_v34, %v3235_v50 }
 0x508   : > { %5133 = vpow2.f32 %v4436_v35  ;;  %vm3582_vm14 = vcmp.eq.s32.totalorder %v3578_v1, 1  ;;  %vm3583_vm15 = vcmp.eq.s32.totalorder %v3581_v46, 1 }
 0x509   : > { %5135 = vpow2.f32 %v4437_v40 }
 0x50a   : > { %5137 = vpow2.f32 %v4435_v37 }
 0x50b   : > { %5139 = vtanh.f32 %v3518_v22  ;;  %v3611_v19 = vld [vmem:[#allocation3] sm:$0xff] (!%p4439_p13) }
 0x50c   : > { %3613 = vst [vmem:[%s5804_s14] sm:$0xff] (!%p4439_p13), %v3611_v19 }
 0x50d   : > { %v5124_v51 = vpop.eup %5123  ;;  %v3612_v35 = vld [vmem:[#allocation3 + $0x8] sm:$0xff] (!%p4439_p13) }
 0x50e   : > { %v3190_v45 = vmul.f32 %v5124_v51, %v5122_v32  ;;  %v5126_v6 = vpop.eup %5125  ;;  %3614 = vst [vmem:[%s5804_s14 + $0x8] sm:$0xff] (!%p4439_p13), %v3612_v35 }
 0x50f   : > { %v5128_v0 = vpop.eup %5127 }
 0x510   : > { %v3205_v43 = vsel %vm3203_vm12, %v3190_v45, %v6519_v57  ;;  %v3215_v11 = vsel %vm3203_vm12, %v3190_v45, 0.0  ;;  %v5130_v44 = vpop.eup %5129  ;;  %v3191_v52 = vmul.f32 %v5128_v0, %v5126_v6 }
 0x511   : > { %3207 = vst [vmem:[#allocation2] sm:$0xff] %v3205_v43  ;;  %4399 = vst [vmem:[%s5798_s25 + $0x30] sm:$0xff] %v3215_v11  ;;  %v3541_v55 = vadd.f32 1.0, %v5130_v44  ;;  %v5132_v56 = vpop.eup %5131 }
 0x512   : > { %v3206_v25 = vsel %vm3204_vm13, %v3191_v52, %v6524_v58  ;;  %v3216_v49 = vsel %vm3204_vm13, %v3191_v52, 0.0  ;;  %v3542_v57 = vadd.f32 1.0, %v5132_v56  ;;  %v5134_v59 = vpop.eup %5133 }
 0x513   : > { %3208 = vst [vmem:[#allocation2 + $0x8] sm:$0xff] %v3206_v25  ;;  %4400 = vst [vmem:[%s5798_s25 + $0x38] sm:$0xff] %v3216_v49  ;;  %5141 = vrcp.f32 %v3541_v55  ;;  %v3544_v2 = vadd.f32 1.0, %v5134_v59  ;;  %v5136_v61 = vpop.eup %5135 }
 0x514   : > { %5143 = vpow2.f32 %v4438_v54  ;;  %v3545_v8 = vadd.f32 1.0, %v5136_v61  ;;  %v5138_v14 = vpop.eup %5137 }
 0x515   : > { %5145 = vrcp.f32 %v3542_v57  ;;  %v5140_v58 = vpop.eup %5139  ;;  %v3543_v16 = vadd.f32 1.0, %v5138_v14 }
 0x516   : > { %5147 = vtanh.f32 %v3522_v47 }
 0x517   : > { %5149 = vrcp.f32 %v3544_v2 }
 0x518   : > { %5151 = vrcp.f32 %v3545_v8 }
 0x519   : > { %5153 = vrcp.f32 %v3543_v16 }
 0x51d   : > { %v5142_v28 = vpop.eup %5141 }
 0x51e   : > { %v5144_v5 = vpop.eup %5143  ;;  %v3563_v9 = vmul.f32 %v5142_v28, %v5140_v58 }
 0x51f   : > { %v5146_v18 = vpop.eup %5145  ;;  %v3546_v30 = vadd.f32 1.0, %v5144_v5 }
 0x520   : > { %v5148_v39 = vpop.eup %5147  ;;  %v3561_v63 = vmul.f32 %v5146_v18, %v6553_v27 }
 0x521   : > { %v5150_v21 = vpop.eup %5149 }
 0x522   : > { %v3565_v15 = vadd.f32 %v3563_v9, %v3561_v63  ;;  %v3564_v53 = vmul.f32 %v5150_v21, %v5148_v39  ;;  %v5152_v29 = vpop.eup %5151 }
 0x523   : > { %v3562_v42 = vmul.f32 %v5152_v29, %v6559_v38  ;;  %v5154_v41 = vpop.eup %5153 }
 0x524   : > { %5155 = vtanh.f32 %v3565_v15  ;;  %v3590_v62 = vsel %vm3582_vm14, %v3565_v15, %v6553_v27 }
 0x525   : > { %3592 = vst [vmem:[#allocation5] sm:$0xff] %v3590_v62  ;;  %v3566_v36 = vadd.f32 %v3564_v53, %v3562_v42  ;;  %5157 = vrcp.f32 %v3546_v30 }
 0x527   : > { %5159 = vtanh.f32 %v3566_v36  ;;  %v3591_v60 = vsel %vm3583_vm15, %v3566_v36, %v6559_v38  ;;  %v3602_v38 = vld [vmem:[#allocation2] sm:$0xff] (!%p4439_p13) }
 0x528   : > { %3593 = vst [vmem:[#allocation5 + $0x8] sm:$0xff] %v3591_v60  ;;  %3604 = vst [vmem:[%s5802_s8] sm:$0xff] (!%p4439_p13), %v3602_v38 }
 0x52c   : > { %v3615_v3 = vld [vmem:[#allocation5] sm:$0xff] (!%p4439_p13) }
 0x52d   : > { %4442 = vst [vmem:[%s5804_s14 + $0x10] sm:$0xff] (!%p4439_p13), %v3615_v3 }
 0x52e   : > { %v5156_v17 = vpop.eup %5155 }
 0x52f   : > { %v3569_v4 = vmul.f32 %v5156_v17, %v5154_v41  ;;  %v5158_v7 = vpop.eup %5157  ;;  %3601 = sbr.rel (%p4439_p13) target bundleno = 1342 (0x53e), region = 64  ;;  %v3616_v40 = vld [vmem:[#allocation5 + $0x8] sm:$0xff] (!%p4439_p13) }
 0x530   : > { %4443 = vst [vmem:[%s5804_s14 + $0x18] sm:$0xff] (!%p4439_p13), %v3616_v40 }
 0x531   : > { %v3584_v27 = vsel %vm3582_vm14, %v3569_v4, %v6577_v10  ;;  %v3594_v33 = vsel %vm3582_vm14, %v3569_v4, 0.0  ;;  %v5160_v26 = vpop.eup %5159  ;;  %v3603_v10 = vld [vmem:[#allocation2 + $0x8] sm:$0xff] (!%p4439_p13) }
 0x532   : > { %3586 = vst [vmem:[#allocation4] sm:$0xff] %v3584_v27  ;;  %3596 = vst [vmem:[%s5800_s15] sm:$0xff] %v3594_v33  ;;  %v3570_v34 = vmul.f32 %v5160_v26, %v5158_v7 }
 0x533   : > { %3605 = vst [vmem:[%s5802_s8 + $0x8] sm:$0xff] (!%p4439_p13), %v3603_v10 }
 0x534   : > { %v3585_v24 = vsel %vm3583_vm15, %v3570_v34, %v6581_v13  ;;  %v3595_v20 = vsel %vm3583_vm15, %v3570_v34, 0.0 }
 0x535   : > { %3587 = vst [vmem:[#allocation4 + $0x8] sm:$0xff] %v3585_v24  ;;  %3597 = vst [vmem:[%s5800_s15 + $0x8] sm:$0xff] %v3595_v20 }
 0x539   : > { %v3606_v23 = vld [vmem:[#allocation4] sm:$0xff] }
 0x53a   : > { %4440 = vst [vmem:[%s5802_s8 + $0x10] sm:$0xff] %v3606_v23 }
 0x53c   : > { %v3607_v13 = vld [vmem:[#allocation4 + $0x8] sm:$0xff] }
 0x53d   : > { %4441 = vst [vmem:[%s5802_s8 + $0x18] sm:$0xff] %v3607_v13 }
 0x53e PF: > { %s3621_s24 = scalar_lea.sflag [#allocation8], %s5756_s22  ;;  %s6993_s26 = sand.u32 1, %s5523_s19  }
 0x53f   : > { %s6641_s5 = scalar_lea.sflag [#allocation16], %s6993_s26  ;;  %s6645_s23 = scalar_lea.sflag [#allocation19], %s510_s2 }
 0x540   : > { %s6994_s27 = sld [smem:[#allocation46_spill]]  ;;  %s6995_s30 = sld [smem:[#allocation52_spill]] }
 0x541   : > { %s3668_s7 = sshll.u32 %s5798_s25, 4  ;;  %s6996_s21 = sld [smem:[#allocation81_spill]]  ;;  %s3669_s7 = int_to_ptr.vmem [resolvable:$true] %s3668_s7 }
 0x542   : > { %s5379_s26 = smov 256   ;;  %s5380_s29 = smov 512  }
 0x543   : > { %s5381_s0 = smov 2   ;;  %s5382_s1 = smov 128  }
 0x544   : > { %s5383_s25 = smov 8  }
 0x546   : > { %s4466_s11 = sshll.u32 %s6994_s27, 4  ;;  %p6997_p2 = scmp.ne.s32.totalorder %s6995_s30, 0 }
 0x547   : > { %s3649_s28 = sadd.s32 %s4466_s11, %s5787_s6  ;;  %s5384_s11 = smov [#allocation24]  }
 0x548   : > { %s4451_s19 = sshll.u32 %s3649_s28, 7  ;;  %4496 = sst [smem:[#allocation25]] (%p6997_p2), %s5379_s26 }
 0x549   : > { %s3651_s2 = scalar_lea.hbm %s6996_s21, %s4451_s19  ;;  %4497 = sst [smem:[#allocation25 + $0x1]] (%p6997_p2), %s5380_s29 }
 0x54a   : > { %4498 = sst [smem:[#allocation25 + $0x2]] (%p6997_p2), %s5381_s0  ;;  %s5385_s28 = smov 0  }
 0x54b   : > { %4499 = sst [smem:[#allocation25 + $0x3]] (%p6997_p2), %s5382_s1 }
 0x54c   : > { %4500 = sst [smem:[#allocation25 + $0x4]] (%p6997_p2), %s5382_s1 }
 0x54d   : > { %4501 = sst [smem:[#allocation25 + $0x5]] (%p6997_p2), %s5383_s25 }
 0x54e   : > { %4502 = dma.general (%p6997_p2), %s3669_s7, 1024, %s3651_s2, %s3621_s24, %s5384_s11, [#allocation25], %s5385_s28, 0  }
 0x54f   : > { %s6998_s19 = ssub.s32 1, %s6994_s27  ;;  %s6999_s29 = sld [smem:[#allocation54_spill]] }
 0x550   : > { %s4467_s0 = sshll.u32 %s6998_s19, 4  ;;  %s3717_s22 = sshll.u32 %s5800_s15, 4  ;;  %s3718_s22 = int_to_ptr.vmem [resolvable:$true] %s3717_s22 }
 0x551   : > { %s3698_s1 = sadd.s32 %s4467_s0, %s5787_s6  ;;  %s7000_s24 = sld [smem:[#allocation82_spill]] }
 0x552   : > { %s4455_s20 = sshll.u32 %s3698_s1, 7  ;;  %s5386_s27 = smov 256  }
 0x553   : > { %s5387_s2 = smov 512   ;;  %s5388_s26 = smov 2  }
 0x554   : > { %s5389_s25 = smov 128   ;;  %s5390_s15 = smov 8  }
 0x555   : > { %p7001_p6 = scmp.ne.s32.totalorder %s6999_s29, 0  ;;  %s5391_s6 = smov [#allocation26]  }
 0x556   : > { %s5392_s11 = smov 0  }
 0x557   : > { %s3700_s7 = scalar_lea.hbm %s7000_s24, %s4455_s20  ;;  %4503 = sst [smem:[#allocation27]] (%p7001_p6), %s5386_s27 }
 0x558   : > { %4504 = sst [smem:[#allocation27 + $0x1]] (%p7001_p6), %s5387_s2 }
 0x559   : > { %4505 = sst [smem:[#allocation27 + $0x2]] (%p7001_p6), %s5388_s26 }
 0x55a   : > { %4506 = sst [smem:[#allocation27 + $0x3]] (%p7001_p6), %s5389_s25 }
 0x55b   : > { %4507 = sst [smem:[#allocation27 + $0x4]] (%p7001_p6), %s5389_s25 }
 0x55c   : > { %4508 = sst [smem:[#allocation27 + $0x5]] (%p7001_p6), %s5390_s15 }
 0x55d   : > { %4509 = dma.general (%p7001_p6), %s3718_s22, 1024, %s3700_s7, %s6641_s5, %s5391_s6, [#allocation27], %s5392_s11, 0  }
 0x55e   : > { %s7002_s28 = sld [smem:[#allocation47_spill]]  ;;  %s7003_s19 = sld [smem:[#allocation57_spill]] }
 0x55f   : > { %s3762_s1 = sshll.u32 %s5802_s8, 4  ;;  %s7004_s30 = sld [smem:[#allocation83_spill]]  ;;  %s3763_s1 = int_to_ptr.vmem [resolvable:$true] %s3762_s1 }
 0x560   : > { %s5393_s27 = smov 256   ;;  %s5394_s29 = smov 512  }
 0x561   : > { %s5395_s22 = smov 2   ;;  %s5396_s7 = smov 128  }
 0x562   : > { %s5397_s8 = smov 8   ;;  %s5398_s2 = smov [#allocation28]  }
 0x563   : > { %s5399_s26 = smov 0  }
 0x564   : > { %s4468_s0 = sshll.u32 %s7002_s28, 8  ;;  %p7005_p1 = scmp.ne.s32.totalorder %s7003_s19, 0 }
 0x565   : > { %s3745_s24 = scalar_lea.hbm %s7004_s30, %s4468_s0 }
 0x566   : > { %4510 = sst [smem:[#allocation29]] (%p7005_p1), %s5393_s27 }
 0x567   : > { %4511 = sst [smem:[#allocation29 + $0x1]] (%p7005_p1), %s5394_s29 }
 0x568   : > { %4512 = sst [smem:[#allocation29 + $0x2]] (%p7005_p1), %s5395_s22 }
 0x569   : > { %4513 = sst [smem:[#allocation29 + $0x3]] (%p7005_p1), %s5396_s7 }
 0x56a   : > { %4514 = sst [smem:[#allocation29 + $0x4]] (%p7005_p1), %s5396_s7 }
 0x56b   : > { %4515 = sst [smem:[#allocation29 + $0x5]] (%p7005_p1), %s5397_s8 }
 0x56c   : > { %4516 = dma.general (%p7005_p1), %s3763_s1, 512, %s3745_s24, %s6641_s5, %s5398_s2, [#allocation29], %s5399_s26, 0  }
 0x56d   : > { %s7006_s6 = sld [smem:[#allocation84_spill]]  ;;  %s3807_s28 = sshll.u32 %s5804_s14, 4  ;;  %s3808_s28 = int_to_ptr.vmem [resolvable:$true] %s3807_s28 }
 0x56e   : > { %s5400_s20 = smov 256   ;;  %s5401_s21 = smov 512  }
 0x56f   : > { %4517 = sst [smem:[#allocation31]] (%p7005_p1), %s5400_s20  ;;  %s5402_s5 = smov 2  }
 0x570   : > { %4518 = sst [smem:[#allocation31 + $0x1]] (%p7005_p1), %s5401_s21  ;;  %s5403_s1 = smov 128  }
 0x571   : > { %4519 = sst [smem:[#allocation31 + $0x2]] (%p7005_p1), %s5402_s5  ;;  %s5404_s30 = smov 8  }
 0x572   : > { %4520 = sst [smem:[#allocation31 + $0x3]] (%p7005_p1), %s5403_s1  ;;  %s5406_s14 = smov 0  }
 0x573   : > { %s3790_s11 = scalar_lea.hbm %s7006_s6, %s4468_s0  ;;  %4521 = sst [smem:[#allocation31 + $0x4]] (%p7005_p1), %s5403_s1 }
 0x574   : > { %4522 = sst [smem:[#allocation31 + $0x5]] (%p7005_p1), %s5404_s30  ;;  %s5405_s0 = smov [#allocation30]  }
 0x575   : > { %4523 = dma.general (%p7005_p1), %s3808_s28, 512, %s3790_s11, %s6645_s23, %s5405_s0, [#allocation31], %s5406_s14, 0  }
 0x576 PF: > { %s7007_s24 = sld [smem:[#allocation45_spill]]  ;;  %s7008_s27 = sld [smem:[#allocation53_spill]] }
 0x577   : > { %p4552_p4 = scmp.ge.s32.totalorder %s5359_s18, 2 }
 0x57c   : > { %s3835_s29 = sand.u32 1, %s7007_s24   ;;  %p7009_p3 = scmp.ne.s32.totalorder %s7008_s27, 0 }
 0x57d   : > { %s3836_s22 = scalar_lea.sflag [#allocation8], %s3835_s29 }
 0x57e   : > { %p4536_p7 = pnand %p4552_p4, %p7009_p3 }
 0x580   : > { %5290 = dma.done.wait (!%p4536_p7), %s3836_s22, 1024  }
 0x581   : > { %5292 = vsyncadd (!%p4536_p7), %s3836_s22, 4294966272  ;;  %s7010_s7 = sadd.s32 4294967294, %s5359_s18   ;;  %s7011_s8 = sld [smem:[#allocation55_spill]] }
 0x582   : > { %s3844_s2 = sand.u32 1, %s7010_s7  }
 0x583   : > { %s3845_s26 = scalar_lea.sflag [#allocation16], %s3844_s2 }
 0x587   : > { %p7012_p11 = scmp.ne.s32.totalorder %s7011_s8, 0 }
 0x589   : > { %p4539_p8 = pnand %p4552_p4, %p7012_p11 }
 0x58b   : > { %5294 = dma.done.wait (!%p4539_p8), %s3845_s26, 1024  }
 0x58c   : > { %5296 = vsyncadd (!%p4539_p8), %s3845_s26, 4294966272  ;;  %s7013_s23 = sld [smem:[#allocation58_spill]] }
 0x592   : > { %p7014_p10 = scmp.ne.s32.totalorder %s7013_s23, 0 }
 0x594   : > { %p4542_p12 = pnand %p4552_p4, %p7014_p10 }
 0x596   : > { %5298 = dma.done.wait (!%p4542_p12), %s3845_s26, 512  }
 0x597   : > { %5300 = vsyncadd (!%p4542_p12), %s3845_s26, 4294966784  ;;  %s7015_s19 = sld [smem:[#allocation42_spill]] }
 0x59d   : > { %s3862_s25 = sand.u32 1, %s7015_s19  }
 0x59e   : > { %s3863_s15 = scalar_lea.sflag [#allocation19], %s3862_s25 }
 0x59f   : > { %5302 = dma.done.wait (!%p4542_p12), %s3863_s15, 512  }
 0x5a0   : > { %5304 = vsyncadd (!%p4542_p12), %s3863_s15, 4294966784  ;;  %s35_s18 = sadd.s32 1, %s5359_s18   ;;  %s7017_s27 = sld [smem:[#allocation43_spill]] }
 0x5a1   : > { %p6740_p0 = scmp.ge.s32.totalorder %s35_s18, 6   ;;  %s7018_s28 = sld [smem:[#allocation44_spill]] }
 0x5a2   : > { %s7019_s29 = sld [smem:[#allocation56_spill]]  ;;  %s7020_s11 = sld [smem:[#allocation51_spill]] }
 0x5a3   : > { %s7021_s20 = sld [smem:[#allocation50_spill]]  ;;  %s7022_s21 = sld [smem:[#allocation48_spill]] }
 0x5a4   : > { %s7023_s5 = sld [smem:[#allocation49_spill]]  ;;  %s7024_s30 = smov %s5323_s9 }
 0x5a5   : > { %s7025_s9 = smov %s5327_s10  ;;  %s7030_s14 = smov %s5351_s16 }
 0x5a6   : > { %s7031_s15 = smov %s5355_s17  ;;  %34 = sbr.rel (!%p6740_p0) target bundleno = 25 (0x19), region = 210 }
 0x5a8   : > { %s7026_s10 = smov %s7020_s11  ;;  %s7027_s11 = smov %s5335_s12 }
 0x5a9   : > { %s7028_s12 = smov %s5339_s13  ;;  %s7029_s13 = smov %s7021_s20 }
 0x5aa   : > { %s7032_s16 = smov %s7022_s21  ;;  %s7033_s17 = smov %s7023_s5 }
 0x5ad   :  { %3868 = vsyncpa [#allocation7], 1 }
 0x5ae   :  { %3870 = vsyncpa [#allocation7 + $0x1], 1 }
 0x5af   :  { %3871 = vsyncpa [#allocation10], 1 }
 0x5b0   :  { %3873 = vsyncpa [#allocation10 + $0x1], 1 }
 0x5b1   :  { %3874 = vsyncpa [#allocation13], 1 }
 0x5b2   :  { %3875 = vsyncpa [#allocation8], 1 }
 0x5b3   :  { %3877 = vsyncpa [#allocation8 + $0x1], 1 }
 0x5b4   :  { %3878 = vsyncpa [#allocation16], 1 }
 0x5b5   :  { %3880 = vsyncpa [#allocation16 + $0x1], 1 }
 0x5b6   :  { %3881 = vsyncpa [#allocation19], 1 }
 0x5b7   :  { %3883 = vsyncpa [#allocation19 + $0x1], 1 }

</bundles_post_ra>
